<compile_context>
chip_gen: v6e
topology: v6e:2x2x1
jax: 0.10.0
libtpu: 0.0.40
codegen_flags: <defaults>
</compile_context>

<pallas_src>
import functools

import jax
import jax.numpy as jnp
from jax.experimental import pallas as pl
from jax.experimental.pallas import tpu as pltpu

_EPS = 1e-5
_LANE = 128
_VMEM_LIMIT = 64 * 1024 * 1024


# ------------------------------ small helpers -------------------------------

def _round_up(x, m):
    return (x + m - 1) // m * m


def _pad_axis(a, axis, target):
    pad = target - a.shape[axis]
    if pad <= 0:
        return a
    cfg = [(0, 0)] * a.ndim
    cfg[axis] = (0, pad)
    return jnp.pad(a, cfg)


def _row_tile(p):
    # largest friendly row tile; rows are padded up to a multiple of it.
    if p >= 512:
        return 512
    if p >= 256:
        return 256
    return 128


def _compiler_params():
    return pltpu.CompilerParams(
        dimension_semantics=("parallel",),
        vmem_limit_bytes=_VMEM_LIMIT,
    )


# ------------------------------ Pallas kernels -------------------------------

def _mm_bn_act_kernel(x_ref, w_ref, sb_ref, o_ref, *, relu):
    """1x1 conv as matmul + folded BN (+ optional ReLU). bf16 in, fp32 acc."""
    acc = jnp.dot(x_ref[...], w_ref[...], preferred_element_type=jnp.float32)
    acc = acc * sb_ref[0, :] + sb_ref[1, :]
    if relu:
        acc = jnp.maximum(acc, 0.0)
    o_ref[...] = acc.astype(o_ref.dtype)


def _conv2_taps(xph_ref, w2_ref, sb2_ref, *, stride, ho, wo):
    """3x3 conv (stride folded into phase decomposition) + BN2 + ReLU.

    Returns a bf16 (ho*wo, Cp) activation ready for the conv3 matmul.
    """
    cp = w2_ref.shape[-1]
    acc = jnp.zeros((ho * wo, cp), jnp.float32)
    for kh in range(3):
        for kw in range(3):
            ph = (kh % stride) * stride + (kw % stride)
            hs = kh // stride
            ws = kw // stride
            xs = xph_ref[ph, hs:hs + ho, ws:ws + wo, :]          # (ho, wo, Cp)
            acc = acc + jnp.dot(xs.reshape(ho * wo, cp), w2_ref[kh * 3 + kw],
                                preferred_element_type=jnp.float32)
    return jnp.maximum(acc * sb2_ref[0, :] + sb2_ref[1, :], 0.0).astype(jnp.bfloat16)


def _tail_identity_kernel(xph_ref, w2_ref, sb2_ref, w3_ref, sb3_ref, res_ref,
                          o_ref, *, stride, ho, wo):
    """conv2+BN2+ReLU -> conv3+BN3 -> + identity residual -> ReLU, fused."""
    co = w3_ref.shape[-1]
    h2 = _conv2_taps(xph_ref, w2_ref, sb2_ref, stride=stride, ho=ho, wo=wo)
    out = jnp.dot(h2, w3_ref[...], preferred_element_type=jnp.float32)
    out = out * sb3_ref[0, :] + sb3_ref[1, :]
    out = out + res_ref[0].astype(jnp.float32)
    o_ref[0] = jnp.maximum(out, 0.0).reshape(ho, wo, co).astype(o_ref.dtype)


def _tail_projection_kernel(xph_ref, w2_ref, sb2_ref, w3_ref, sb3_ref,
                            xsc_ref, wsc_ref, sbsc_ref, o_ref,
                            *, stride, ho, wo):
    """conv2+BN2+ReLU -> conv3+BN3 -> + (1x1 proj conv + BN) -> ReLU, fused."""
    co = w3_ref.shape[-1]
    h2 = _conv2_taps(xph_ref, w2_ref, sb2_ref, stride=stride, ho=ho, wo=wo)
    out = jnp.dot(h2, w3_ref[...], preferred_element_type=jnp.float32)
    out = out * sb3_ref[0, :] + sb3_ref[1, :]
    sc = jnp.dot(xsc_ref[0], wsc_ref[...], preferred_element_type=jnp.float32)
    sc = sc * sbsc_ref[0, :] + sbsc_ref[1, :]
    o_ref[0] = jnp.maximum(out + sc, 0.0).reshape(ho, wo, co).astype(o_ref.dtype)


# ------------------------------ pallas_call wrappers -------------------------

def _matmul_bn_act(x, w, sb, *, relu, out_dtype):
    p, k = x.shape
    co = w.shape[1]
    tp = _row_tile(p)
    pp = _round_up(p, tp)
    x = _pad_axis(x, 0, pp)
    flops = 2 * pp * k * co
    bytes_accessed = pp * k * 2 + k * co * 2 + 2 * co * 4 \
        + pp * co * jnp.dtype(out_dtype).itemsize
    out = pl.pallas_call(
        functools.partial(_mm_bn_act_kernel, relu=relu),
        out_shape=jax.ShapeDtypeStruct((pp, co), out_dtype),
        grid=(pp // tp,),
        in_specs=[
            pl.BlockSpec((tp, k), lambda i: (i, 0)),
            pl.BlockSpec((k, co), lambda i: (0, 0)),    # resident weights
            pl.BlockSpec((2, co), lambda i: (0, 0)),    # resident scale/bias
        ],
        out_specs=pl.BlockSpec((tp, co), lambda i: (i, 0)),
        compiler_params=_compiler_params(),
        cost_estimate=pl.CostEstimate(flops=int(flops), transcendentals=0,
                                      bytes_accessed=int(bytes_accessed)),
    )(x, w, sb)
    return out[:p]


def _fused_tail(out1, w2, sb2, w3, sb3, stride, *, residual=None, projection=None):
    """conv2(3x3,stride)+BN2+ReLU + conv3(1x1)+BN3 + shortcut + add + ReLU."""
    n, h, w, cp = out1.shape
    co = w3.shape[1]
    s = stride
    ho = (h - 1) // s + 1
    wo = (w - 1) // s + 1
    hp = _round_up(h + 2, s)
    wp = _round_up(w + 2, s)
    xp = jnp.pad(out1, ((0, 0), (1, hp - h - 1), (1, wp - w - 1), (0, 0)))
    # Fold the conv stride into a phase decomposition in the wrapper so the
    # kernel only ever does contiguous (non-strided) slices; activation HBM
    # traffic stays ~1x (vs 9x for a materialized im2col).
    if s == 1:
        xph = xp                                             # (N, Hp, Wp, Cp)
    else:
        phases = [xp[:, i::s, j::s, :] for i in range(s) for j in range(s)]
        xph = jnp.stack(phases, axis=1)                      # (N, s*s, Hph, Wph, Cp)
        xph = xph.reshape(n * s * s, xph.shape[2], xph.shape[3], cp)
    hph, wph = xph.shape[-3], xph.shape[-2]

    flops = n * (18 * ho * wo * cp * cp + 2 * ho * wo * cp * co)
    bytes_accessed = (xph.size * 2 + w2.size * 2 + w3.size * 2
                      + (sb2.size + sb3.size) * 4 + n * ho * wo * co * 4)

    in_specs = [
        pl.BlockSpec((s * s, hph, wph, cp), lambda i: (i, 0, 0, 0)),
        pl.BlockSpec((9, cp, cp), lambda i: (0, 0, 0)),       # resident weights
        pl.BlockSpec((2, cp), lambda i: (0, 0)),              # resident scale/bias
        pl.BlockSpec((cp, co), lambda i: (0, 0)),
        pl.BlockSpec((2, co), lambda i: (0, 0)),
    ]
    args = [xph, w2, sb2, w3, sb3]

    if projection is not None:
        xsc, wsc, sbsc = projection                           # (N, Ho*Wo, Cin_p), ...
        ksc = xsc.shape[-1]
        kernel = functools.partial(_tail_projection_kernel, stride=s, ho=ho, wo=wo)
        in_specs += [
            pl.BlockSpec((1, ho * wo, ksc), lambda i: (i, 0, 0)),
            pl.BlockSpec((ksc, co), lambda i: (0, 0)),
            pl.BlockSpec((2, co), lambda i: (0, 0)),
        ]
        args += [xsc, wsc, sbsc]
        flops += 2 * n * ho * wo * ksc * co
        bytes_accessed += xsc.size * 2 + wsc.size * 2 + sbsc.size * 4
    else:
        res = residual                                        # (N, Ho*Wo, Co_p) bf16
        kernel = functools.partial(_tail_identity_kernel, stride=s, ho=ho, wo=wo)
        in_specs.append(pl.BlockSpec((1, ho * wo, co), lambda i: (i, 0, 0)))
        args.append(res)
        bytes_accessed += res.size * 2

    return pl.pallas_call(
        kernel,
        out_shape=jax.ShapeDtypeStruct((n, ho, wo, co), jnp.float32),
        grid=(n,),
        in_specs=in_specs,
        out_specs=pl.BlockSpec((1, ho, wo, co), lambda i: (i, 0, 0, 0)),
        compiler_params=_compiler_params(),
        cost_estimate=pl.CostEstimate(flops=int(flops), transcendentals=0,
                                      bytes_accessed=int(bytes_accessed)),
    )(*args)


# ------------------------------ parameter prep -------------------------------

def _fold_bn(p):
    scale = p["gamma"] / jnp.sqrt(p["var"] + _EPS)
    bias = p["beta"] - p["mean"] * scale
    return scale, bias


def _sb_padded(p, cpad):
    scale, bias = _fold_bn(p)
    sb = jnp.stack([scale, bias], axis=0)                    # (2, C)
    return _pad_axis(sb, 1, cpad).astype(jnp.float32)


def _w1x1_padded(w_oihw, kpad, cpad):
    w = w_oihw[:, :, 0, 0].T                                 # (Cin, Cout)
    return _pad_axis(_pad_axis(w, 0, kpad), 1, cpad).astype(jnp.bfloat16)


def _w3x3_padded(w_oihw, cpad):
    cout, cin = w_oihw.shape[0], w_oihw.shape[1]
    w = jnp.transpose(w_oihw, (2, 3, 1, 0)).reshape(9, cin, cout)
    return _pad_axis(_pad_axis(w, 1, cpad), 2, cpad).astype(jnp.bfloat16)


def init_bottleneck(key, in_planes, planes, stride):
    exp = 4
    ks = jax.random.split(key, 8)

    def nrm(k, shape, s=0.1):
        return s * jax.random.normal(k, shape, jnp.float32)

    def bn(k, c):
        k1, k2, k3, k4 = jax.random.split(k, 4)
        return dict(gamma=1.0 + nrm(k1, (c,)), beta=nrm(k2, (c,)),
                    mean=nrm(k3, (c,)),
                    var=jax.random.uniform(k4, (c,), jnp.float32, 0.5, 1.5))

    params = dict(
        conv1_w=nrm(ks[0], (planes, in_planes, 1, 1)),
        bn1=bn(ks[1], planes),
        conv2_w=nrm(ks[2], (planes, planes, 3, 3)),
        bn2=bn(ks[3], planes),
        conv3_w=nrm(ks[4], (exp * planes, planes, 1, 1)),
        bn3=bn(ks[5], exp * planes),
    )
    if stride != 1 or in_planes != exp * planes:
        params["short_w"] = nrm(ks[6], (exp * planes, in_planes, 1, 1))
        params["short_bn"] = bn(ks[7], exp * planes)
    return params


# ------------------------------ forward pass ---------------------------------

def _bottleneck_forward(params, x_nchw, stride):
    exp = 4
    x = jnp.transpose(x_nchw, (0, 2, 3, 1)).astype(jnp.float32)   # NCHW -> NHWC
    n, h, w, cin = x.shape
    planes = params["conv1_w"].shape[0]
    cout = exp * planes
    cin_p = _round_up(cin, _LANE)
    cp = _round_up(planes, _LANE)
    co_p = _round_up(cout, _LANE)
    ho = (h - 1) // stride + 1
    wo = (w - 1) // stride + 1

    xb = _pad_axis(x, 3, cin_p).astype(jnp.bfloat16)              # lane-dense bf16

    # conv1 (1x1) + bn1 + relu   (kernel A: tiled matmul over N*H*W rows)
    w1 = _w1x1_padded(params["conv1_w"], cin_p, cp)
    sb1 = _sb_padded(params["bn1"], cp)
    out1 = _matmul_bn_act(xb.reshape(n * h * w, cin_p), w1, sb1,
                          relu=True, out_dtype=jnp.bfloat16)
    out1 = out1.reshape(n, h, w, cp)

    # conv2 + bn2 + relu + conv3 + bn3 + shortcut + add + relu  (kernel B, fused)
    w2 = _w3x3_padded(params["conv2_w"], cp)
    sb2 = _sb_padded(params["bn2"], cp)
    w3 = _w1x1_padded(params["conv3_w"], cp, co_p)
    sb3 = _sb_padded(params["bn3"], co_p)

    if "short_w" in params:
        wsc = _w1x1_padded(params["short_w"], cin_p, co_p)
        sbsc = _sb_padded(params["short_bn"], co_p)
        xsc = xb[:, ::stride, ::stride, :].reshape(n, ho * wo, cin_p)
        out = _fused_tail(out1, w2, sb2, w3, sb3, stride,
                          projection=(xsc, wsc, sbsc))
    else:
        res = xb.reshape(n, h * w, co_p)                          # cin_p == co_p here
        out = _fused_tail(out1, w2, sb2, w3, sb3, stride, residual=res)

    out = out[..., :cout]                                         # (N,Ho,Wo,Cout) f32
    return jnp.transpose(out, (0, 3, 1, 2))                       # NHWC -> NCHW


bottleneck_forward = jax.jit(_bottleneck_forward, static_argnames="stride")


# ------------------------------ pure-JAX reference ---------------------------

def _q(v):  # bf16 round-trip (matches the kernel's bf16 inputs / fp32 accumulate)
    return v.astype(jnp.bfloat16).astype(jnp.float32)


def ref_forward(params, x_nchw, stride):
    x = jnp.transpose(x_nchw, (0, 2, 3, 1)).astype(jnp.float32)
    xq = _q(x)

    def conv(inp, w_oihw, s, pad):
        w = _q(jnp.transpose(w_oihw, (2, 3, 1, 0)))
        return jax.lax.conv_general_dilated(
            inp, w, (s, s), [(pad, pad), (pad, pad)],
            dimension_numbers=("NHWC", "HWIO", "NHWC"))

    def bn(v, p):
        scale = p["gamma"] / jnp.sqrt(p["var"] + _EPS)
        return v * scale + (p["beta"] - p["mean"] * scale)

    out = _q(jax.nn.relu(bn(conv(xq, params["conv1_w"], 1, 0), params["bn1"])))
    out = _q(jax.nn.relu(bn(conv(out, params["conv2_w"], stride, 1), params["bn2"])))
    out = bn(conv(out, params["conv3_w"], 1, 0), params["bn3"])
    if "short_w" in params:
        sc = bn(conv(xq, params["short_w"], stride, 0), params["short_bn"])
    else:
        sc = xq
    return jnp.transpose(jax.nn.relu(out + sc), (0, 3, 1, 2))


# ----------------------------------- main -------------------------------------

if __name__ == "__main__":
    key = jax.random.PRNGKey(0)
    kx, kx2, kp1, kp2, kp3 = jax.random.split(key, 5)

    x = jax.random.normal(kx, (2, 4, 16, 16), jnp.float32)        # NCHW like PyTorch

    # Case 1: projection shortcut (in_planes != 4*planes), stride=1
    p1 = init_bottleneck(kp1, in_planes=4, planes=8, stride=1)
    y1 = jax.block_until_ready(bottleneck_forward(p1, x, stride=1))
    r1 = ref_forward(p1, x, stride=1)
    assert y1.shape == (2, 32, 16, 16)
    assert jnp.allclose(y1, r1, atol=1e-2, rtol=1e-2), float(jnp.max(jnp.abs(y1 - r1)))

    # Case 2: projection shortcut with downsampling, stride=2
    p2 = init_bottleneck(kp2, in_planes=4, planes=8, stride=2)
    y2 = jax.block_until_ready(bottleneck_forward(p2, x, stride=2))
    r2 = ref_forward(p2, x, stride=2)
    assert y2.shape == (2, 32, 8, 8)
    assert jnp.allclose(y2, r2, atol=1e-2, rtol=1e-2), float(jnp.max(jnp.abs(y2 - r2)))

    # Case 3: identity shortcut (stride=1, in_planes == 4*planes)
    x3 = jax.random.normal(kx2, (2, 16, 16, 16), jnp.float32)
    p3 = init_bottleneck(kp3, in_planes=16, planes=4, stride=1)
    y3 = jax.block_until_ready(bottleneck_forward(p3, x3, stride=1))
    r3 = ref_forward(p3, x3, stride=1)
    assert y3.shape == (2, 16, 16, 16)
    assert jnp.allclose(y3, r3, atol=1e-2, rtol=1e-2), float(jnp.max(jnp.abs(y3 - r3)))

    print("KERNEL_OK")
</pallas_src>

<mosaic_0001>
module attributes {stable_mosaic.version = 11 : i64} {
  func.func @_mm_bn_act_kernel(%arg0: i32, %arg1: memref<512x128xbf16, #tpu.memory_space<vmem>>, %arg2: memref<128x128xbf16, #tpu.memory_space<vmem>>, %arg3: memref<2x128xf32, #tpu.memory_space<vmem>>, %arg4: memref<512x128xbf16, #tpu.memory_space<vmem>>) attributes {dimension_semantics = [#tpu.dimension_semantics<parallel>], iteration_bounds = array<i64: 1>, scalar_prefetch = 0 : i64, scratch_operands = 0 : i64, tpu.core_type = #tpu.core_type<tc>, window_params = [{transform_indices = @transform_0, window_bounds = array<i64: 512, 128>}, {pipeline_mode = #tpu.pipeline_mode<synchronous>, transform_indices = @transform_1, window_bounds = array<i64: 128, 128>}, {pipeline_mode = #tpu.pipeline_mode<synchronous>, transform_indices = @transform_2, window_bounds = array<i64: 2, 128>}, {transform_indices = @transform_3, window_bounds = array<i64: 512, 128>}]} {
    %c0 = arith.constant 0 : index
    %c0_0 = arith.constant 0 : index
    %0 = vector.load %arg1[%c0, %c0_0] : memref<512x128xbf16, #tpu.memory_space<vmem>>, vector<512x128xbf16>
    %c0_1 = arith.constant 0 : index
    %c0_2 = arith.constant 0 : index
    %1 = vector.load %arg2[%c0_1, %c0_2] : memref<128x128xbf16, #tpu.memory_space<vmem>>, vector<128x128xbf16>
    %cst = arith.constant dense<0.000000e+00> : vector<512x128xf32>
    %2 = tpu.matmul %0, %1, %cst {dimension_numbers = #tpu.dot_dimension_numbers<[1], [0], [0], [1], [0, 0, 1, 1], [], []>} : vector<512x128xbf16>, vector<128x128xbf16>, vector<512x128xf32> -> vector<512x128xf32>
    %c0_3 = arith.constant 0 : index
    %c0_4 = arith.constant 0 : index
    %3 = vector.load %arg3[%c0_3, %c0_4] : memref<2x128xf32, #tpu.memory_space<vmem>>, vector<1x128xf32>
    %4 = vector.shape_cast %3 : vector<1x128xf32> to vector<128xf32>
    %5 = vector.shape_cast %4 : vector<128xf32> to vector<1x128xf32>
    %6 = vector.broadcast %5 : vector<1x128xf32> to vector<512x128xf32>
    %7 = arith.mulf %2, %6 : vector<512x128xf32>
    %c1 = arith.constant 1 : index
    %c0_5 = arith.constant 0 : index
    %8 = vector.load %arg3[%c1, %c0_5] : memref<2x128xf32, #tpu.memory_space<vmem>>, vector<1x128xf32>
    %9 = vector.shape_cast %8 : vector<1x128xf32> to vector<128xf32>
    %10 = vector.shape_cast %9 : vector<128xf32> to vector<1x128xf32>
    %11 = vector.broadcast %10 : vector<1x128xf32> to vector<512x128xf32>
    %12 = arith.addf %7, %11 : vector<512x128xf32>
    %cst_6 = arith.constant 0.000000e+00 : f32
    %13 = vector.broadcast %cst_6 : f32 to vector<512x128xf32>
    %14 = arith.maximumf %12, %13 : vector<512x128xf32>
    %15 = arith.truncf %14 : vector<512x128xf32> to vector<512x128xbf16>
    %c0_7 = arith.constant 0 : index
    %c0_8 = arith.constant 0 : index
    %16 = vector.load %arg4[%c0_7, %c0_8] : memref<512x128xbf16, #tpu.memory_space<vmem>>, vector<512x128xbf16>
    tpu.vector_store %arg4[%c0_7, %c0_8], %15 {strides = array<i32>} : memref<512x128xbf16, #tpu.memory_space<vmem>>, vector<512x128xbf16>,
    return
  }
  func.func @transform_0(%arg0: i32) -> (i32, i32) {
    %c0_i32 = arith.constant 0 : i32
    %c0_i32_0 = arith.constant 0 : i32
    return %arg0, %c0_i32 : i32, i32
  }
  func.func @transform_1(%arg0: i32) -> (i32, i32) {
    %c0_i32 = arith.constant 0 : i32
    %c0_i32_0 = arith.constant 0 : i32
    %c0_i32_1 = arith.constant 0 : i32
    return %c0_i32, %c0_i32_0 : i32, i32
  }
  func.func @transform_2(%arg0: i32) -> (i32, i32) {
    %c0_i32 = arith.constant 0 : i32
    %c0_i32_0 = arith.constant 0 : i32
    %c0_i32_1 = arith.constant 0 : i32
    return %c0_i32, %c0_i32_0 : i32, i32
  }
  func.func @transform_3(%arg0: i32) -> (i32, i32) {
    %c0_i32 = arith.constant 0 : i32
    %c0_i32_0 = arith.constant 0 : i32
    return %arg0, %c0_i32 : i32, i32
  }
}

module attributes {stable_mosaic.version = 11 : i64} {
  func.func @_tail_projection_kernel(%arg0: i32, %arg1: memref<1x18x18x128xbf16, #tpu.memory_space<vmem>>, %arg2: memref<9x128x128xbf16, #tpu.memory_space<vmem>>, %arg3: memref<2x128xf32, #tpu.memory_space<vmem>>, %arg4: memref<128x128xbf16, #tpu.memory_space<vmem>>, %arg5: memref<2x128xf32, #tpu.memory_space<vmem>>, %arg6: memref<1x256x128xbf16, #tpu.memory_space<vmem>>, %arg7: memref<128x128xbf16, #tpu.memory_space<vmem>>, %arg8: memref<2x128xf32, #tpu.memory_space<vmem>>, %arg9: memref<1x16x16x128xf32, #tpu.memory_space<vmem>>) attributes {dimension_semantics = [#tpu.dimension_semantics<parallel>], iteration_bounds = array<i64: 2>, scalar_prefetch = 0 : i64, scratch_operands = 0 : i64, tpu.core_type = #tpu.core_type<tc>, window_params = [{transform_indices = @transform_0, window_bounds = array<i64: 1, 18, 18, 128>}, {pipeline_mode = #tpu.pipeline_mode<synchronous>, transform_indices = @transform_1, window_bounds = array<i64: 9, 128, 128>}, {pipeline_mode = #tpu.pipeline_mode<synchronous>, transform_indices = @transform_2, window_bounds = array<i64: 2, 128>}, {pipeline_mode = #tpu.pipeline_mode<synchronous>, transform_indices = @transform_3, window_bounds = array<i64: 128, 128>}, {pipeline_mode = #tpu.pipeline_mode<synchronous>, transform_indices = @transform_4, window_bounds = array<i64: 2, 128>}, {transform_indices = @transform_5, window_bounds = array<i64: 1, 256, 128>}, {pipeline_mode = #tpu.pipeline_mode<synchronous>, transform_indices = @transform_6, window_bounds = array<i64: 128, 128>}, {pipeline_mode = #tpu.pipeline_mode<synchronous>, transform_indices = @transform_7, window_bounds = array<i64: 2, 128>}, {transform_indices = @transform_8, window_bounds = array<i64: 1, 16, 16, 128>}]} {
    %cst = arith.constant 0.000000e+00 : f32
    %0 = vector.broadcast %cst : f32 to vector<256x128xf32>
    %c0 = arith.constant 0 : index
    %c0_0 = arith.constant 0 : index
    %c0_1 = arith.constant 0 : index
    %c0_2 = arith.constant 0 : index
    %1 = vector.load %arg1[%c0, %c0_0, %c0_1, %c0_2] : memref<1x18x18x128xbf16, #tpu.memory_space<vmem>>, vector<1x16x16x128xbf16>
    %2 = vector.shape_cast %1 : vector<1x16x16x128xbf16> to vector<16x16x128xbf16>
    %3 = vector.shape_cast %2 : vector<16x16x128xbf16> to vector<256x128xbf16>
    %c0_3 = arith.constant 0 : index
    %c0_4 = arith.constant 0 : index
    %c0_5 = arith.constant 0 : index
    %4 = vector.load %arg2[%c0_3, %c0_4, %c0_5] : memref<9x128x128xbf16, #tpu.memory_space<vmem>>, vector<1x128x128xbf16>
    %5 = vector.shape_cast %4 : vector<1x128x128xbf16> to vector<128x128xbf16>
    %cst_6 = arith.constant dense<0.000000e+00> : vector<256x128xf32>
    %6 = tpu.matmul %3, %5, %cst_6 {dimension_numbers = #tpu.dot_dimension_numbers<[1], [0], [0], [1], [0, 0, 1, 1], [], []>} : vector<256x128xbf16>, vector<128x128xbf16>, vector<256x128xf32> -> vector<256x128xf32>
    %7 = arith.addf %0, %6 : vector<256x128xf32>
    %c0_7 = arith.constant 0 : index
    %c0_8 = arith.constant 0 : index
    %c1 = arith.constant 1 : index
    %c0_9 = arith.constant 0 : index
    %8 = vector.load %arg1[%c0_7, %c0_8, %c1, %c0_9] : memref<1x18x18x128xbf16, #tpu.memory_space<vmem>>, vector<1x16x16x128xbf16>
    %9 = vector.shape_cast %8 : vector<1x16x16x128xbf16> to vector<16x16x128xbf16>
    %10 = vector.shape_cast %9 : vector<16x16x128xbf16> to vector<256x128xbf16>
    %c1_10 = arith.constant 1 : index
    %c0_11 = arith.constant 0 : index
    %c0_12 = arith.constant 0 : index
    %11 = vector.load %arg2[%c1_10, %c0_11, %c0_12] : memref<9x128x128xbf16, #tpu.memory_space<vmem>>, vector<1x128x128xbf16>
    %12 = vector.shape_cast %11 : vector<1x128x128xbf16> to vector<128x128xbf16>
    %cst_13 = arith.constant dense<0.000000e+00> : vector<256x128xf32>
    %13 = tpu.matmul %10, %12, %cst_13 {dimension_numbers = #tpu.dot_dimension_numbers<[1], [0], [0], [1], [0, 0, 1, 1], [], []>} : vector<256x128xbf16>, vector<128x128xbf16>, vector<256x128xf32> -> vector<256x128xf32>
    %14 = arith.addf %7, %13 : vector<256x128xf32>
    %c0_14 = arith.constant 0 : index
    %c0_15 = arith.constant 0 : index
    %c2 = arith.constant 2 : index
    %c0_16 = arith.constant 0 : index
    %15 = vector.load %arg1[%c0_14, %c0_15, %c2, %c0_16] : memref<1x18x18x128xbf16, #tpu.memory_space<vmem>>, vector<1x16x16x128xbf16>
    %16 = vector.shape_cast %15 : vector<1x16x16x128xbf16> to vector<16x16x128xbf16>
    %17 = vector.shape_cast %16 : vector<16x16x128xbf16> to vector<256x128xbf16>
    %c2_17 = arith.constant 2 : index
    %c0_18 = arith.constant 0 : index
    %c0_19 = arith.constant 0 : index
    %18 = vector.load %arg2[%c2_17, %c0_18, %c0_19] : memref<9x128x128xbf16, #tpu.memory_space<vmem>>, vector<1x128x128xbf16>
    %19 = vector.shape_cast %18 : vector<1x128x128xbf16> to vector<128x128xbf16>
    %cst_20 = arith.constant dense<0.000000e+00> : vector<256x128xf32>
    %20 = tpu.matmul %17, %19, %cst_20 {dimension_numbers = #tpu.dot_dimension_numbers<[1], [0], [0], [1], [0, 0, 1, 1], [], []>} : vector<256x128xbf16>, vector<128x128xbf16>, vector<256x128xf32> -> vector<256x128xf32>
    %21 = arith.addf %14, %20 : vector<256x128xf32>
    %c0_21 = arith.constant 0 : index
    %c1_22 = arith.constant 1 : index
    %c0_23 = arith.constant 0 : index
    %c0_24 = arith.constant 0 : index
    %22 = vector.load %arg1[%c0_21, %c1_22, %c0_23, %c0_24] : memref<1x18x18x128xbf16, #tpu.memory_space<vmem>>, vector<1x16x16x128xbf16>
    %23 = vector.shape_cast %22 : vector<1x16x16x128xbf16> to vector<16x16x128xbf16>
    %24 = vector.shape_cast %23 : vector<16x16x128xbf16> to vector<256x128xbf16>
    %c3 = arith.constant 3 : index
    %c0_25 = arith.constant 0 : index
    %c0_26 = arith.constant 0 : index
    %25 = vector.load %arg2[%c3, %c0_25, %c0_26] : memref<9x128x128xbf16, #tpu.memory_space<vmem>>, vector<1x128x128xbf16>
    %26 = vector.shape_cast %25 : vector<1x128x128xbf16> to vector<128x128xbf16>
    %cst_27 = arith.constant dense<0.000000e+00> : vector<256x128xf32>
    %27 = tpu.matmul %24, %26, %cst_27 {dimension_numbers = #tpu.dot_dimension_numbers<[1], [0], [0], [1], [0, 0, 1, 1], [], []>} : vector<256x128xbf16>, vector<128x128xbf16>, vector<256x128xf32> -> vector<256x128xf32>
    %28 = arith.addf %21, %27 : vector<256x128xf32>
    %c0_28 = arith.constant 0 : index
    %c1_29 = arith.constant 1 : index
    %c1_30 = arith.constant 1 : index
    %c0_31 = arith.constant 0 : index
    %29 = vector.load %arg1[%c0_28, %c1_29, %c1_30, %c0_31] : memref<1x18x18x128xbf16, #tpu.memory_space<vmem>>, vector<1x16x16x128xbf16>
    %30 = vector.shape_cast %29 : vector<1x16x16x128xbf16> to vector<16x16x128xbf16>
    %31 = vector.shape_cast %30 : vector<16x16x128xbf16> to vector<256x128xbf16>
    %c4 = arith.constant 4 : index
    %c0_32 = arith.constant 0 : index
    %c0_33 = arith.constant 0 : index
    %32 = vector.load %arg2[%c4, %c0_32, %c0_33] : memref<9x128x128xbf16, #tpu.memory_space<vmem>>, vector<1x128x128xbf16>
    %33 = vector.shape_cast %32 : vector<1x128x128xbf16> to vector<128x128xbf16>
    %cst_34 = arith.constant dense<0.000000e+00> : vector<256x128xf32>
    %34 = tpu.matmul %31, %33, %cst_34 {dimension_numbers = #tpu.dot_dimension_numbers<[1], [0], [0], [1], [0, 0, 1, 1], [], []>} : vector<256x128xbf16>, vector<128x128xbf16>, vector<256x128xf32> -> vector<256x128xf32>
    %35 = arith.addf %28, %34 : vector<256x128xf32>
    %c0_35 = arith.constant 0 : index
    %c1_36 = arith.constant 1 : index
    %c2_37 = arith.constant 2 : index
    %c0_38 = arith.constant 0 : index
    %36 = vector.load %arg1[%c0_35, %c1_36, %c2_37, %c0_38] : memref<1x18x18x128xbf16, #tpu.memory_space<vmem>>, vector<1x16x16x128xbf16>
    %37 = vector.shape_cast %36 : vector<1x16x16x128xbf16> to vector<16x16x128xbf16>
    %38 = vector.shape_cast %37 : vector<16x16x128xbf16> to vector<256x128xbf16>
    %c5 = arith.constant 5 : index
    %c0_39 = arith.constant 0 : index
    %c0_40 = arith.constant 0 : index
    %39 = vector.load %arg2[%c5, %c0_39, %c0_40] : memref<9x128x128xbf16, #tpu.memory_space<vmem>>, vector<1x128x128xbf16>
    %40 = vector.shape_cast %39 : vector<1x128x128xbf16> to vector<128x128xbf16>
    %cst_41 = arith.constant dense<0.000000e+00> : vector<256x128xf32>
    %41 = tpu.matmul %38, %40, %cst_41 {dimension_numbers = #tpu.dot_dimension_numbers<[1], [0], [0], [1], [0, 0, 1, 1], [], []>} : vector<256x128xbf16>, vector<128x128xbf16>, vector<256x128xf32> -> vector<256x128xf32>
    %42 = arith.addf %35, %41 : vector<256x128xf32>
    %c0_42 = arith.constant 0 : index
    %c2_43 = arith.constant 2 : index
    %c0_44 = arith.constant 0 : index
    %c0_45 = arith.constant 0 : index
    %43 = vector.load %arg1[%c0_42, %c2_43, %c0_44, %c0_45] : memref<1x18x18x128xbf16, #tpu.memory_space<vmem>>, vector<1x16x16x128xbf16>
    %44 = vector.shape_cast %43 : vector<1x16x16x128xbf16> to vector<16x16x128xbf16>
    %45 = vector.shape_cast %44 : vector<16x16x128xbf16> to vector<256x128xbf16>
    %c6 = arith.constant 6 : index
    %c0_46 = arith.constant 0 : index
    %c0_47 = arith.constant 0 : index
    %46 = vector.load %arg2[%c6, %c0_46, %c0_47] : memref<9x128x128xbf16, #tpu.memory_space<vmem>>, vector<1x128x128xbf16>
    %47 = vector.shape_cast %46 : vector<1x128x128xbf16> to vector<128x128xbf16>
    %cst_48 = arith.constant dense<0.000000e+00> : vector<256x128xf32>
    %48 = tpu.matmul %45, %47, %cst_48 {dimension_numbers = #tpu.dot_dimension_numbers<[1], [0], [0], [1], [0, 0, 1, 1], [], []>} : vector<256x128xbf16>, vector<128x128xbf16>, vector<256x128xf32> -> vector<256x128xf32>
    %49 = arith.addf %42, %48 : vector<256x128xf32>
    %c0_49 = arith.constant 0 : index
    %c2_50 = arith.constant 2 : index
    %c1_51 = arith.constant 1 : index
    %c0_52 = arith.constant 0 : index
    %50 = vector.load %arg1[%c0_49, %c2_50, %c1_51, %c0_52] : memref<1x18x18x128xbf16, #tpu.memory_space<vmem>>, vector<1x16x16x128xbf16>
    %51 = vector.shape_cast %50 : vector<1x16x16x128xbf16> to vector<16x16x128xbf16>
    %52 = vector.shape_cast %51 : vector<16x16x128xbf16> to vector<256x128xbf16>
    %c7 = arith.constant 7 : index
    %c0_53 = arith.constant 0 : index
    %c0_54 = arith.constant 0 : index
    %53 = vector.load %arg2[%c7, %c0_53, %c0_54] : memref<9x128x128xbf16, #tpu.memory_space<vmem>>, vector<1x128x128xbf16>
    %54 = vector.shape_cast %53 : vector<1x128x128xbf16> to vector<128x128xbf16>
    %cst_55 = arith.constant dense<0.000000e+00> : vector<256x128xf32>
    %55 = tpu.matmul %52, %54, %cst_55 {dimension_numbers = #tpu.dot_dimension_numbers<[1], [0], [0], [1], [0, 0, 1, 1], [], []>} : vector<256x128xbf16>, vector<128x128xbf16>, vector<256x128xf32> -> vector<256x128xf32>
    %56 = arith.addf %49, %55 : vector<256x128xf32>
    %c0_56 = arith.constant 0 : index
    %c2_57 = arith.constant 2 : index
    %c2_58 = arith.constant 2 : index
    %c0_59 = arith.constant 0 : index
    %57 = vector.load %arg1[%c0_56, %c2_57, %c2_58, %c0_59] : memref<1x18x18x128xbf16, #tpu.memory_space<vmem>>, vector<1x16x16x128xbf16>
    %58 = vector.shape_cast %57 : vector<1x16x16x128xbf16> to vector<16x16x128xbf16>
    %59 = vector.shape_cast %58 : vector<16x16x128xbf16> to vector<256x128xbf16>
    %c8 = arith.constant 8 : index
    %c0_60 = arith.constant 0 : index
    %c0_61 = arith.constant 0 : index
    %60 = vector.load %arg2[%c8, %c0_60, %c0_61] : memref<9x128x128xbf16, #tpu.memory_space<vmem>>, vector<1x128x128xbf16>
    %61 = vector.shape_cast %60 : vector<1x128x128xbf16> to vector<128x128xbf16>
    %cst_62 = arith.constant dense<0.000000e+00> : vector<256x128xf32>
    %62 = tpu.matmul %59, %61, %cst_62 {dimension_numbers = #tpu.dot_dimension_numbers<[1], [0], [0], [1], [0, 0, 1, 1], [], []>} : vector<256x128xbf16>, vector<128x128xbf16>, vector<256x128xf32> -> vector<256x128xf32>
    %63 = arith.addf %56, %62 : vector<256x128xf32>
    %c0_63 = arith.constant 0 : index
    %c0_64 = arith.constant 0 : index
    %64 = vector.load %arg3[%c0_63, %c0_64] : memref<2x128xf32, #tpu.memory_space<vmem>>, vector<1x128xf32>
    %65 = vector.shape_cast %64 : vector<1x128xf32> to vector<128xf32>
    %66 = vector.shape_cast %65 : vector<128xf32> to vector<1x128xf32>
    %67 = vector.broadcast %66 : vector<1x128xf32> to vector<256x128xf32>
    %68 = arith.mulf %63, %67 : vector<256x128xf32>
    %c1_65 = arith.constant 1 : index
    %c0_66 = arith.constant 0 : index
    %69 = vector.load %arg3[%c1_65, %c0_66] : memref<2x128xf32, #tpu.memory_space<vmem>>, vector<1x128xf32>
    %70 = vector.shape_cast %69 : vector<1x128xf32> to vector<128xf32>
    %71 = vector.shape_cast %70 : vector<128xf32> to vector<1x128xf32>
    %72 = vector.broadcast %71 : vector<1x128xf32> to vector<256x128xf32>
    %73 = arith.addf %68, %72 : vector<256x128xf32>
    %cst_67 = arith.constant 0.000000e+00 : f32
    %74 = vector.broadcast %cst_67 : f32 to vector<256x128xf32>
    %75 = arith.maximumf %73, %74 : vector<256x128xf32>
    %76 = arith.truncf %75 : vector<256x128xf32> to vector<256x128xbf16>
    %c0_68 = arith.constant 0 : index
    %c0_69 = arith.constant 0 : index
    %77 = vector.load %arg4[%c0_68, %c0_69] : memref<128x128xbf16, #tpu.memory_space<vmem>>, vector<128x128xbf16>
    %cst_70 = arith.constant dense<0.000000e+00> : vector<256x128xf32>
    %78 = tpu.matmul %76, %77, %cst_70 {dimension_numbers = #tpu.dot_dimension_numbers<[1], [0], [0], [1], [0, 0, 1, 1], [], []>} : vector<256x128xbf16>, vector<128x128xbf16>, vector<256x128xf32> -> vector<256x128xf32>
    %c0_71 = arith.constant 0 : index
    %c0_72 = arith.constant 0 : index
    %79 = vector.load %arg5[%c0_71, %c0_72] : memref<2x128xf32, #tpu.memory_space<vmem>>, vector<1x128xf32>
    %80 = vector.shape_cast %79 : vector<1x128xf32> to vector<128xf32>
    %81 = vector.shape_cast %80 : vector<128xf32> to vector<1x128xf32>
    %82 = vector.broadcast %81 : vector<1x128xf32> to vector<256x128xf32>
    %83 = arith.mulf %78, %82 : vector<256x128xf32>
    %c1_73 = arith.constant 1 : index
    %c0_74 = arith.constant 0 : index
    %84 = vector.load %arg5[%c1_73, %c0_74] : memref<2x128xf32, #tpu.memory_space<vmem>>, vector<1x128xf32>
    %85 = vector.shape_cast %84 : vector<1x128xf32> to vector<128xf32>
    %86 = vector.shape_cast %85 : vector<128xf32> to vector<1x128xf32>
    %87 = vector.broadcast %86 : vector<1x128xf32> to vector<256x128xf32>
    %88 = arith.addf %83, %87 : vector<256x128xf32>
    %c0_75 = arith.constant 0 : index
    %c0_76 = arith.constant 0 : index
    %c0_77 = arith.constant 0 : index
    %89 = vector.load %arg6[%c0_75, %c0_76, %c0_77] : memref<1x256x128xbf16, #tpu.memory_space<vmem>>, vector<1x256x128xbf16>
    %90 = vector.shape_cast %89 : vector<1x256x128xbf16> to vector<256x128xbf16>
    %c0_78 = arith.constant 0 : index
    %c0_79 = arith.constant 0 : index
    %91 = vector.load %arg7[%c0_78, %c0_79] : memref<128x128xbf16, #tpu.memory_space<vmem>>, vector<128x128xbf16>
    %cst_80 = arith.constant dense<0.000000e+00> : vector<256x128xf32>
    %92 = tpu.matmul %90, %91, %cst_80 {dimension_numbers = #tpu.dot_dimension_numbers<[1], [0], [0], [1], [0, 0, 1, 1], [], []>} : vector<256x128xbf16>, vector<128x128xbf16>, vector<256x128xf32> -> vector<256x128xf32>
    %c0_81 = arith.constant 0 : index
    %c0_82 = arith.constant 0 : index
    %93 = vector.load %arg8[%c0_81, %c0_82] : memref<2x128xf32, #tpu.memory_space<vmem>>, vector<1x128xf32>
    %94 = vector.shape_cast %93 : vector<1x128xf32> to vector<128xf32>
    %95 = vector.shape_cast %94 : vector<128xf32> to vector<1x128xf32>
    %96 = vector.broadcast %95 : vector<1x128xf32> to vector<256x128xf32>
    %97 = arith.mulf %92, %96 : vector<256x128xf32>
    %c1_83 = arith.constant 1 : index
    %c0_84 = arith.constant 0 : index
    %98 = vector.load %arg8[%c1_83, %c0_84] : memref<2x128xf32, #tpu.memory_space<vmem>>, vector<1x128xf32>
    %99 = vector.shape_cast %98 : vector<1x128xf32> to vector<128xf32>
    %100 = vector.shape_cast %99 : vector<128xf32> to vector<1x128xf32>
    %101 = vector.broadcast %100 : vector<1x128xf32> to vector<256x128xf32>
    %102 = arith.addf %97, %101 : vector<256x128xf32>
    %103 = arith.addf %88, %102 : vector<256x128xf32>
    %cst_85 = arith.constant 0.000000e+00 : f32
    %104 = vector.broadcast %cst_85 : f32 to vector<256x128xf32>
    %105 = arith.maximumf %103, %104 : vector<256x128xf32>
    %106 = vector.shape_cast %105 : vector<256x128xf32> to vector<16x16x128xf32>
    %c0_86 = arith.constant 0 : index
    %c0_87 = arith.constant 0 : index
    %c0_88 = arith.constant 0 : index
    %c0_89 = arith.constant 0 : index
    %107 = vector.load %arg9[%c0_86, %c0_87, %c0_88, %c0_89] : memref<1x16x16x128xf32, #tpu.memory_space<vmem>>, vector<1x16x16x128xf32>
    %108 = vector.shape_cast %107 : vector<1x16x16x128xf32> to vector<16x16x128xf32>
    %109 = vector.shape_cast %106 : vector<16x16x128xf32> to vector<1x16x16x128xf32>
    tpu.vector_store %arg9[%c0_86, %c0_87, %c0_88, %c0_89], %109 {strides = array<i32>} : memref<1x16x16x128xf32, #tpu.memory_space<vmem>>, vector<1x16x16x128xf32>,
    return
  }
  func.func @transform_0(%arg0: i32) -> (i32, i32, i32, i32) {
    %c0_i32 = arith.constant 0 : i32
    %c0_i32_0 = arith.constant 0 : i32
    %c0_i32_1 = arith.constant 0 : i32
    %c0_i32_2 = arith.constant 0 : i32
    return %arg0, %c0_i32, %c0_i32_0, %c0_i32_1 : i32, i32, i32, i32
  }
  func.func @transform_1(%arg0: i32) -> (i32, i32, i32) {
    %c0_i32 = arith.constant 0 : i32
    %c0_i32_0 = arith.constant 0 : i32
    %c0_i32_1 = arith.constant 0 : i32
    %c0_i32_2 = arith.constant 0 : i32
    return %c0_i32, %c0_i32_0, %c0_i32_1 : i32, i32, i32
  }
  func.func @transform_2(%arg0: i32) -> (i32, i32) {
    %c0_i32 = arith.constant 0 : i32
    %c0_i32_0 = arith.constant 0 : i32
    %c0_i32_1 = arith.constant 0 : i32
    return %c0_i32, %c0_i32_0 : i32, i32
  }
  func.func @transform_3(%arg0: i32) -> (i32, i32) {
    %c0_i32 = arith.constant 0 : i32
    %c0_i32_0 = arith.constant 0 : i32
    %c0_i32_1 = arith.constant 0 : i32
    return %c0_i32, %c0_i32_0 : i32, i32
  }
  func.func @transform_4(%arg0: i32) -> (i32, i32) {
    %c0_i32 = arith.constant 0 : i32
    %c0_i32_0 = arith.constant 0 : i32
    %c0_i32_1 = arith.constant 0 : i32
    return %c0_i32, %c0_i32_0 : i32, i32
  }
  func.func @transform_5(%arg0: i32) -> (i32, i32, i32) {
    %c0_i32 = arith.constant 0 : i32
    %c0_i32_0 = arith.constant 0 : i32
    %c0_i32_1 = arith.constant 0 : i32
    return %arg0, %c0_i32, %c0_i32_0 : i32, i32, i32
  }
  func.func @transform_6(%arg0: i32) -> (i32, i32) {
    %c0_i32 = arith.constant 0 : i32
    %c0_i32_0 = arith.constant 0 : i32
    %c0_i32_1 = arith.constant 0 : i32
    return %c0_i32, %c0_i32_0 : i32, i32
  }
  func.func @transform_7(%arg0: i32) -> (i32, i32) {
    %c0_i32 = arith.constant 0 : i32
    %c0_i32_0 = arith.constant 0 : i32
    %c0_i32_1 = arith.constant 0 : i32
    return %c0_i32, %c0_i32_0 : i32, i32
  }
  func.func @transform_8(%arg0: i32) -> (i32, i32, i32, i32) {
    %c0_i32 = arith.constant 0 : i32
    %c0_i32_0 = arith.constant 0 : i32
    %c0_i32_1 = arith.constant 0 : i32
    %c0_i32_2 = arith.constant 0 : i32
    return %arg0, %c0_i32, %c0_i32_0, %c0_i32_1 : i32, i32, i32, i32
  }
}

</mosaic_0001>

<bundles_post_ra>
// kernel: _bottleneck_forward.2
= control target key start
LH: loop header
LB: loop body
LE: loop exit
PB: predicated region body
PF: predicated region fallthrough
CT: control target
= control target key end

     0   :  { %s2061_s1 = inlined_call_operand.vmem [shape: bf16[128,128], index: 1, kind: input, shape index: {}]   ;;  %s2062_s0 = inlined_call_operand.vmem [shape: bf16[512,128], index: 0, kind: input, shape index: {}]   ;;  %s2063_s2 = inlined_call_operand.vmem [shape: f32[2,128], index: 2, kind: input, shape index: {}]   ;;  %s2064_s3 = inlined_call_operand.vmem [shape: bf16[512,128], index: 3, kind: output, shape index: {}]  }
   0x1   :  { %v1647_v0 = vld [vmem:[%s2061_s1 + $0x38] sm:$0xff]   ;;  %v1648_v1 = vld [vmem:[%s2061_s1 + $0x30] sm:$0xff]   ;;  %v1649_v2 = vld [vmem:[%s2061_s1 + $0x28] sm:$0xff]  }
   0x2   :  { %1551 = vmatprep.subr.bf16.mxu0 %v1647_v0  ;;  %1631 = vmatprep.subr.bf16.mxu1 %v1647_v0  ;;  %v1650_v3 = vld [vmem:[%s2061_s1 + $0x20] sm:$0xff]   ;;  %v1651_v6 = vld [vmem:[%s2061_s1 + $0x18] sm:$0xff]   ;;  %v1652_v7 = vld [vmem:[%s2061_s1 + $0x10] sm:$0xff]  }
   0x3   :  { %1552 = vmatpush3.bf16.msra.mxu0 %v1647_v0  ;;  %1639 = vmatpush3.bf16.msra.mxu1 %v1647_v0  ;;  %v1655_v4 = vld [vmem:[%s2062_s0] sm:$0xff]   ;;  %v1653_v8 = vld [vmem:[%s2061_s1 + $0x8] sm:$0xff]   ;;  %v1659_v12 = vld [vmem:[%s2062_s0 + $0x10] sm:$0xff]  }
   0x4   :  { %1553 = vmatprep.subr.bf16.mxu0 %v1648_v1  ;;  %1632 = vmatprep.subr.bf16.mxu1 %v1648_v1  ;;  %v1656_v5 = vld [vmem:[%s2062_s0 + $0x80] sm:$0xff]   ;;  %v1657_v10 = vld [vmem:[%s2062_s0 + $0x8] sm:$0xff]   ;;  %v1660_v13 = vld [vmem:[%s2062_s0 + $0x90] sm:$0xff]  }
   0x5   :  { %1567 = vmatprep.mubr.bf16.mxu0 %v1655_v4  ;;  %1599 = vmatprep.mubr.bf16.mxu1 %v1656_v5  ;;  %v1654_v9 = vld [vmem:[%s2061_s1] sm:$0xff]   ;;  %v1658_v11 = vld [vmem:[%s2062_s0 + $0x88] sm:$0xff]   ;;  %v1661_v14 = vld [vmem:[%s2062_s0 + $0x18] sm:$0xff]  }
   0x6   :  { %v1662_v15 = vld [vmem:[%s2062_s0 + $0x98] sm:$0xff]   ;;  %v1663_v16 = vld [vmem:[%s2062_s0 + $0x20] sm:$0xff]   ;;  %v1665_v18 = vld [vmem:[%s2062_s0 + $0x28] sm:$0xff]  }
   0x7   :  { %1554 = vmatpush3.bf16.msra.mxu0 %v1648_v1  ;;  %1640 = vmatpush3.bf16.msra.mxu1 %v1648_v1  ;;  %v1664_v17 = vld [vmem:[%s2062_s0 + $0xa0] sm:$0xff]   ;;  %v1666_v19 = vld [vmem:[%s2062_s0 + $0xa8] sm:$0xff]   ;;  %v1667_v20 = vld [vmem:[%s2062_s0 + $0x30] sm:$0xff]  }
   0x8   :  { %1555 = vmatprep.subr.bf16.mxu0 %v1649_v2  ;;  %1633 = vmatprep.subr.bf16.mxu1 %v1649_v2  ;;  %v1668_v21 = vld [vmem:[%s2062_s0 + $0xb0] sm:$0xff]   ;;  %v1669_v22 = vld [vmem:[%s2062_s0 + $0x38] sm:$0xff]   ;;  %v1671_v24 = vld [vmem:[%s2062_s0 + $0x40] sm:$0xff]  }
   0x9   :  { %v1670_v23 = vld [vmem:[%s2062_s0 + $0xb8] sm:$0xff]   ;;  %v1672_v25 = vld [vmem:[%s2062_s0 + $0xc0] sm:$0xff]   ;;  %v1673_v26 = vld [vmem:[%s2062_s0 + $0x48] sm:$0xff]  }
   0xa   :  { %v1674_v27 = vld [vmem:[%s2062_s0 + $0xc8] sm:$0xff]   ;;  %v1675_v28 = vld [vmem:[%s2062_s0 + $0x50] sm:$0xff]   ;;  %v1677_v30 = vld [vmem:[%s2062_s0 + $0x58] sm:$0xff]  }
   0xb   :  { %1556 = vmatpush3.bf16.msra.mxu0 %v1649_v2  ;;  %1641 = vmatpush3.bf16.msra.mxu1 %v1649_v2  ;;  %v1676_v29 = vld [vmem:[%s2062_s0 + $0xd0] sm:$0xff]   ;;  %v1678_v31 = vld [vmem:[%s2062_s0 + $0xd8] sm:$0xff]   ;;  %v1679_v32 = vld [vmem:[%s2062_s0 + $0x60] sm:$0xff]  }
   0xc   :  { %1557 = vmatprep.subr.bf16.mxu0 %v1650_v3  ;;  %1634 = vmatprep.subr.bf16.mxu1 %v1650_v3  ;;  %v1680_v33 = vld [vmem:[%s2062_s0 + $0xe0] sm:$0xff]   ;;  %v1681_v34 = vld [vmem:[%s2062_s0 + $0x68] sm:$0xff]   ;;  %v1683_v36 = vld [vmem:[%s2062_s0 + $0x70] sm:$0xff]  }
   0xd   :  { %v1682_v35 = vld [vmem:[%s2062_s0 + $0xe8] sm:$0xff]   ;;  %v1684_v37 = vld [vmem:[%s2062_s0 + $0xf0] sm:$0xff]   ;;  %v1685_v38 = vld [vmem:[%s2062_s0 + $0x78] sm:$0xff]  }
   0xe   :  { %v1686_v39 = vld [vmem:[%s2062_s0 + $0xf8] sm:$0xff]   ;;  %v1830_v40 = vld [vmem:[%s2063_s2] ss:$0 sm:$0xff]  ;;  %v1837_v45 = vld [vmem:[%s2063_s2 + $0x1] ss:$0 sm:$0xff] }
   0xf   :  { %1558 = vmatpush3.bf16.msra.mxu0 %v1650_v3  ;;  %1642 = vmatpush3.bf16.msra.mxu1 %v1650_v3 }
  0x10   :  { %1559 = vmatprep.subr.bf16.mxu0 %v1651_v6  ;;  %1635 = vmatprep.subr.bf16.mxu1 %v1651_v6 }
  0x13   :  { %1560 = vmatpush3.bf16.msra.mxu0 %v1651_v6  ;;  %1643 = vmatpush3.bf16.msra.mxu1 %v1651_v6 }
  0x14   :  { %1561 = vmatprep.subr.bf16.mxu0 %v1652_v7  ;;  %1636 = vmatprep.subr.bf16.mxu1 %v1652_v7 }
  0x17   :  { %1562 = vmatpush3.bf16.msra.mxu0 %v1652_v7  ;;  %1644 = vmatpush3.bf16.msra.mxu1 %v1652_v7 }
  0x18   :  { %1563 = vmatprep.subr.bf16.mxu0 %v1653_v8  ;;  %1637 = vmatprep.subr.bf16.mxu1 %v1653_v8 }
  0x1b   :  { %1564 = vmatpush3.bf16.msra.mxu0 %v1653_v8  ;;  %1645 = vmatpush3.bf16.msra.mxu1 %v1653_v8 }
  0x1c   :  { %1565 = vmatprep.subr.bf16.mxu0 %v1654_v9  ;;  %1638 = vmatprep.subr.bf16.mxu1 %v1654_v9 }
  0x1f   :  { %1566 = vmatpush3.bf16.msra.mxu0 %v1654_v9  ;;  %1646 = vmatpush3.bf16.msra.mxu1 %v1654_v9 }
  0x22   :  { %1568 = vmatmul.mubr.bf16.vlgmr.msra.gmra.mxu0 %v1657_v10  ;;  %1600 = vmatmul.mubr.bf16.vlgmr.msra.gmra.mxu1 %v1658_v11 }
  0x23   :  { %1571 = vmatprep.mubr.bf16.mxu0 %v1659_v12  ;;  %1603 = vmatprep.mubr.bf16.mxu1 %v1660_v13 }
  0x2a   :  { %1572 = vmatmul.mubr.bf16.gmra.mxu0 %v1661_v14  ;;  %1604 = vmatmul.mubr.bf16.gmra.mxu1 %v1662_v15 }
  0x2b   :  { %1575 = vmatprep.mubr.bf16.mxu0 %v1663_v16  ;;  %1607 = vmatprep.mubr.bf16.mxu1 %v1664_v17 }
  0x32   :  { %1576 = vmatmul.mubr.bf16.gmra.mxu0 %v1665_v18  ;;  %1608 = vmatmul.mubr.bf16.gmra.mxu1 %v1666_v19 }
  0x33   :  { %1579 = vmatprep.mubr.bf16.mxu0 %v1667_v20  ;;  %1611 = vmatprep.mubr.bf16.mxu1 %v1668_v21 }
  0x3a   :  { %1580 = vmatmul.mubr.bf16.gmra.mxu0 %v1669_v22  ;;  %1612 = vmatmul.mubr.bf16.gmra.mxu1 %v1670_v23 }
  0x3b   :  { %1583 = vmatprep.mubr.bf16.mxu0 %v1671_v24  ;;  %1615 = vmatprep.mubr.bf16.mxu1 %v1672_v25 }
  0x42   :  { %1584 = vmatmul.mubr.bf16.gmra.mxu0 %v1673_v26  ;;  %1616 = vmatmul.mubr.bf16.gmra.mxu1 %v1674_v27 }
  0x43   :  { %1587 = vmatprep.mubr.bf16.mxu0 %v1675_v28  ;;  %1619 = vmatprep.mubr.bf16.mxu1 %v1676_v29 }
  0x4a   :  { %1588 = vmatmul.mubr.bf16.gmra.mxu0 %v1677_v30  ;;  %1620 = vmatmul.mubr.bf16.gmra.mxu1 %v1678_v31 }
  0x4b   :  { %1591 = vmatprep.mubr.bf16.mxu0 %v1679_v32  ;;  %1623 = vmatprep.mubr.bf16.mxu1 %v1680_v33 }
  0x52   :  { %1592 = vmatmul.mubr.bf16.gmra.mxu0 %v1681_v34  ;;  %1624 = vmatmul.mubr.bf16.gmra.mxu1 %v1682_v35 }
  0x53   :  { %1595 = vmatprep.mubr.bf16.mxu0 %v1683_v36  ;;  %1627 = vmatprep.mubr.bf16.mxu1 %v1684_v37 }
  0x5a   :  { %1596 = vmatmul.mubr.bf16.gmra.mxu0 %v1685_v38  ;;  %1628 = vmatmul.mubr.bf16.gmra.mxu1 %v1686_v39 }
  0xe2   :  { %v1569_v41 = vpop.f32.mrf.mxu0  ;;  %v1601_v42 = vpop.f32.mrf.mxu1 }
  0xe3   :  { %v631_v43 = vmul.f32 %v1569_v41, %v1830_v40  ;;  %v663_v44 = vmul.f32 %v1601_v42, %v1830_v40 }
  0xe4   :  { %v369_v46 = vpop.f32.mrf.mxu0  ;;  %v497_v47 = vpop.f32.mrf.mxu1 }
  0xe5   :  { %v629_v48 = vmul.f32 %v1830_v40, %v369_v46  ;;  %v661_v49 = vmul.f32 %v1830_v40, %v497_v47  ;;  %v700_v52 = vadd.f32 %v1837_v45, %v631_v43  ;;  %v732_v53 = vadd.f32 %v1837_v45, %v663_v44 }
  0xe6   :  { %v1570_v50 = vpop.f32.mrf.mxu0  ;;  %v1602_v51 = vpop.f32.mrf.mxu1 }
  0xe7   :  { %v632_v54 = vmul.f32 %v1570_v50, %v1830_v40  ;;  %v664_v55 = vmul.f32 %v1602_v51, %v1830_v40  ;;  %v698_v58 = vadd.f32 %v1837_v45, %v629_v48  ;;  %v730_v59 = vadd.f32 %v1837_v45, %v661_v49 }
  0xe8   :  { %v372_v56 = vpop.f32.mrf.mxu0  ;;  %v500_v57 = vpop.f32.mrf.mxu1  ;;  %v764_v2 = vmax.f32 %v700_v52, 0.0  ;;  %v796_v3 = vmax.f32 %v732_v53, 0.0 }
  0xe9   :  { %v630_v60 = vmul.f32 %v1830_v40, %v372_v56  ;;  %v662_v61 = vmul.f32 %v1830_v40, %v500_v57  ;;  %v701_v62 = vadd.f32 %v1837_v45, %v632_v54  ;;  %v733_v63 = vadd.f32 %v1837_v45, %v664_v55 }
  0xea   :  { %v1573_v0 = vpop.f32.mrf.mxu0  ;;  %v1605_v1 = vpop.f32.mrf.mxu1  ;;  %v762_v12 = vmax.f32 %v698_v58, 0.0  ;;  %v794_v13 = vmax.f32 %v730_v59, 0.0 }
  0xeb   :  { %v699_v4 = vadd.f32 %v1837_v45, %v630_v60  ;;  %v731_v5 = vadd.f32 %v1837_v45, %v662_v61  ;;  %v765_v6 = vmax.f32 %v701_v62, 0.0  ;;  %v797_v7 = vmax.f32 %v733_v63, 0.0 }
  0xec   :  { %v635_v8 = vmul.f32 %v1573_v0, %v1830_v40  ;;  %v667_v9 = vmul.f32 %v1605_v1, %v1830_v40  ;;  %v385_v10 = vpop.f32.mrf.mxu0  ;;  %v513_v11 = vpop.f32.mrf.mxu1 }
  0xed   :  { %v763_v14 = vmax.f32 %v699_v4, 0.0  ;;  %v795_v15 = vmax.f32 %v731_v5, 0.0  ;;  %v1328_v16 = vpack.c.bf16 %v765_v6, %v764_v2  ;;  %v1408_v17 = vpack.c.bf16 %v797_v7, %v796_v3 }
  0xee   :  { %v633_v18 = vmul.f32 %v1830_v40, %v385_v10  ;;  %v665_v19 = vmul.f32 %v1830_v40, %v513_v11  ;;  %v1574_v20 = vpop.f32.mrf.mxu0  ;;  %v1606_v21 = vpop.f32.mrf.mxu1  ;;  %v704_v24 = vadd.f32 %v1837_v45, %v635_v8  ;;  %v736_v25 = vadd.f32 %v1837_v45, %v667_v9 }
  0xef   :  { %v1323_v22 = vpack.c.bf16 %v763_v14, %v762_v12  ;;  %v1403_v23 = vpack.c.bf16 %v795_v15, %v794_v13  ;;  %1480 = vst [vmem:[%s2064_s3 + $0x8] sm:$0xff] %v1328_v16   ;;  %1496 = vst [vmem:[%s2064_s3 + $0x88] sm:$0xff] %v1408_v17   ;;  %v636_v26 = vmul.f32 %v1574_v20, %v1830_v40 }
  0xf0   :  { %v668_v27 = vmul.f32 %v1606_v21, %v1830_v40  ;;  %v388_v28 = vpop.f32.mrf.mxu0  ;;  %v516_v29 = vpop.f32.mrf.mxu1  ;;  %v702_v30 = vadd.f32 %v1837_v45, %v633_v18  ;;  %v734_v31 = vadd.f32 %v1837_v45, %v665_v19  ;;  %v768_v43 = vmax.f32 %v704_v24, 0.0 }
  0xf1   :  { %1324 = vst [vmem:[%s2064_s3] sm:$0xff] %v1323_v22   ;;  %1495 = vst [vmem:[%s2064_s3 + $0x80] sm:$0xff] %v1403_v23   ;;  %v634_v32 = vmul.f32 %v1830_v40, %v388_v28  ;;  %v666_v33 = vmul.f32 %v1830_v40, %v516_v29  ;;  %v705_v34 = vadd.f32 %v1837_v45, %v636_v26  ;;  %v800_v44 = vmax.f32 %v736_v25, 0.0 }
  0xf2   :  { %v737_v35 = vadd.f32 %v1837_v45, %v668_v27  ;;  %v1577_v36 = vpop.f32.mrf.mxu0  ;;  %v1609_v37 = vpop.f32.mrf.mxu1  ;;  %v766_v50 = vmax.f32 %v702_v30, 0.0  ;;  %v798_v51 = vmax.f32 %v734_v31, 0.0 }
  0xf3   :  { %v703_v38 = vadd.f32 %v1837_v45, %v634_v32  ;;  %v735_v39 = vadd.f32 %v1837_v45, %v666_v33  ;;  %v639_v41 = vmul.f32 %v1577_v36, %v1830_v40  ;;  %v671_v42 = vmul.f32 %v1609_v37, %v1830_v40 }
  0xf4   :  { %v769_v46 = vmax.f32 %v705_v34, 0.0  ;;  %v801_v47 = vmax.f32 %v737_v35, 0.0  ;;  %v401_v48 = vpop.f32.mrf.mxu0  ;;  %v529_v49 = vpop.f32.mrf.mxu1 }
  0xf5   :  { %v767_v52 = vmax.f32 %v703_v38, 0.0  ;;  %v799_v53 = vmax.f32 %v735_v39, 0.0  ;;  %v637_v56 = vmul.f32 %v1830_v40, %v401_v48  ;;  %v669_v57 = vmul.f32 %v1830_v40, %v529_v49 }
  0xf6   :  { %v1338_v54 = vpack.c.bf16 %v769_v46, %v768_v43  ;;  %v1418_v55 = vpack.c.bf16 %v801_v47, %v800_v44  ;;  %v1578_v58 = vpop.f32.mrf.mxu0  ;;  %v1610_v59 = vpop.f32.mrf.mxu1  ;;  %v708_v62 = vadd.f32 %v1837_v45, %v639_v41  ;;  %v740_v63 = vadd.f32 %v1837_v45, %v671_v42 }
  0xf7   :  { %v1333_v60 = vpack.c.bf16 %v767_v52, %v766_v50  ;;  %v1413_v61 = vpack.c.bf16 %v799_v53, %v798_v51  ;;  %v640_v0 = vmul.f32 %v1578_v58, %v1830_v40  ;;  %v672_v1 = vmul.f32 %v1610_v59, %v1830_v40 }
  0xf8   :  { %1482 = vst [vmem:[%s2064_s3 + $0x18] sm:$0xff] %v1338_v54   ;;  %1498 = vst [vmem:[%s2064_s3 + $0x98] sm:$0xff] %v1418_v55   ;;  %v404_v2 = vpop.f32.mrf.mxu0  ;;  %v532_v3 = vpop.f32.mrf.mxu1  ;;  %v706_v4 = vadd.f32 %v1837_v45, %v637_v56  ;;  %v738_v5 = vadd.f32 %v1837_v45, %v669_v57  ;;  %v772_v12 = vmax.f32 %v708_v62, 0.0  ;;  %v804_v13 = vmax.f32 %v740_v63, 0.0 }
  0xf9   :  { %1481 = vst [vmem:[%s2064_s3 + $0x10] sm:$0xff] %v1333_v60   ;;  %1497 = vst [vmem:[%s2064_s3 + $0x90] sm:$0xff] %v1413_v61   ;;  %v638_v6 = vmul.f32 %v1830_v40, %v404_v2  ;;  %v670_v7 = vmul.f32 %v1830_v40, %v532_v3  ;;  %v709_v8 = vadd.f32 %v1837_v45, %v640_v0 }
  0xfa   :  { %v741_v9 = vadd.f32 %v1837_v45, %v672_v1  ;;  %v1581_v10 = vpop.f32.mrf.mxu0  ;;  %v1613_v11 = vpop.f32.mrf.mxu1  ;;  %v770_v22 = vmax.f32 %v706_v4, 0.0  ;;  %v802_v23 = vmax.f32 %v738_v5, 0.0 }
  0xfb   :  { %v707_v14 = vadd.f32 %v1837_v45, %v638_v6  ;;  %v739_v15 = vadd.f32 %v1837_v45, %v670_v7  ;;  %v773_v16 = vmax.f32 %v709_v8, 0.0  ;;  %v643_v18 = vmul.f32 %v1581_v10, %v1830_v40 }
  0xfc   :  { %v805_v17 = vmax.f32 %v741_v9, 0.0  ;;  %v675_v19 = vmul.f32 %v1613_v11, %v1830_v40  ;;  %v417_v20 = vpop.f32.mrf.mxu0  ;;  %v545_v21 = vpop.f32.mrf.mxu1 }
  0xfd   :  { %v771_v24 = vmax.f32 %v707_v14, 0.0  ;;  %v803_v25 = vmax.f32 %v739_v15, 0.0  ;;  %v1348_v26 = vpack.c.bf16 %v773_v16, %v772_v12  ;;  %v641_v28 = vmul.f32 %v1830_v40, %v417_v20 }
  0xfe   :  { %v1428_v27 = vpack.c.bf16 %v805_v17, %v804_v13  ;;  %v673_v29 = vmul.f32 %v1830_v40, %v545_v21  ;;  %v1582_v30 = vpop.f32.mrf.mxu0  ;;  %v1614_v31 = vpop.f32.mrf.mxu1  ;;  %v712_v34 = vadd.f32 %v1837_v45, %v643_v18  ;;  %v744_v35 = vadd.f32 %v1837_v45, %v675_v19 }
  0xff   :  { %v1343_v32 = vpack.c.bf16 %v771_v24, %v770_v22  ;;  %v1423_v33 = vpack.c.bf16 %v803_v25, %v802_v23  ;;  %1484 = vst [vmem:[%s2064_s3 + $0x28] sm:$0xff] %v1348_v26   ;;  %v644_v36 = vmul.f32 %v1582_v30, %v1830_v40  ;;  %v676_v37 = vmul.f32 %v1614_v31, %v1830_v40 }
 0x100   :  { %1500 = vst [vmem:[%s2064_s3 + $0xa8] sm:$0xff] %v1428_v27   ;;  %v420_v38 = vpop.f32.mrf.mxu0  ;;  %v548_v39 = vpop.f32.mrf.mxu1  ;;  %v710_v41 = vadd.f32 %v1837_v45, %v641_v28  ;;  %v742_v42 = vadd.f32 %v1837_v45, %v673_v29  ;;  %v776_v54 = vmax.f32 %v712_v34, 0.0  ;;  %v808_v55 = vmax.f32 %v744_v35, 0.0 }
 0x101   :  { %1483 = vst [vmem:[%s2064_s3 + $0x20] sm:$0xff] %v1343_v32   ;;  %1499 = vst [vmem:[%s2064_s3 + $0xa0] sm:$0xff] %v1423_v33   ;;  %v642_v43 = vmul.f32 %v1830_v40, %v420_v38  ;;  %v674_v44 = vmul.f32 %v1830_v40, %v548_v39  ;;  %v713_v46 = vadd.f32 %v1837_v45, %v644_v36 }
 0x102   :  { %v745_v47 = vadd.f32 %v1837_v45, %v676_v37  ;;  %v1585_v48 = vpop.f32.mrf.mxu0  ;;  %v1617_v49 = vpop.f32.mrf.mxu1  ;;  %v774_v60 = vmax.f32 %v710_v41, 0.0  ;;  %v806_v61 = vmax.f32 %v742_v42, 0.0 }
 0x103   :  { %v711_v50 = vadd.f32 %v1837_v45, %v642_v43  ;;  %v743_v51 = vadd.f32 %v1837_v45, %v674_v44  ;;  %v647_v52 = vmul.f32 %v1585_v48, %v1830_v40  ;;  %v679_v53 = vmul.f32 %v1617_v49, %v1830_v40 }
 0x104   :  { %v777_v56 = vmax.f32 %v713_v46, 0.0  ;;  %v809_v57 = vmax.f32 %v745_v47, 0.0  ;;  %v433_v58 = vpop.f32.mrf.mxu0  ;;  %v561_v59 = vpop.f32.mrf.mxu1 }
 0x105   :  { %v775_v62 = vmax.f32 %v711_v50, 0.0  ;;  %v807_v63 = vmax.f32 %v743_v51, 0.0  ;;  %v645_v2 = vmul.f32 %v1830_v40, %v433_v58  ;;  %v677_v3 = vmul.f32 %v1830_v40, %v561_v59 }
 0x106   :  { %v1358_v0 = vpack.c.bf16 %v777_v56, %v776_v54  ;;  %v1438_v1 = vpack.c.bf16 %v809_v57, %v808_v55  ;;  %v1586_v4 = vpop.f32.mrf.mxu0  ;;  %v1618_v5 = vpop.f32.mrf.mxu1  ;;  %v716_v8 = vadd.f32 %v1837_v45, %v647_v52  ;;  %v748_v9 = vadd.f32 %v1837_v45, %v679_v53 }
 0x107   :  { %v1353_v6 = vpack.c.bf16 %v775_v62, %v774_v60  ;;  %v1433_v7 = vpack.c.bf16 %v807_v63, %v806_v61  ;;  %v648_v10 = vmul.f32 %v1586_v4, %v1830_v40  ;;  %v680_v11 = vmul.f32 %v1618_v5, %v1830_v40 }
 0x108   :  { %1486 = vst [vmem:[%s2064_s3 + $0x38] sm:$0xff] %v1358_v0   ;;  %1502 = vst [vmem:[%s2064_s3 + $0xb8] sm:$0xff] %v1438_v1   ;;  %v436_v12 = vpop.f32.mrf.mxu0  ;;  %v564_v13 = vpop.f32.mrf.mxu1  ;;  %v714_v14 = vadd.f32 %v1837_v45, %v645_v2  ;;  %v746_v15 = vadd.f32 %v1837_v45, %v677_v3  ;;  %v780_v22 = vmax.f32 %v716_v8, 0.0  ;;  %v812_v23 = vmax.f32 %v748_v9, 0.0 }
 0x109   :  { %1485 = vst [vmem:[%s2064_s3 + $0x30] sm:$0xff] %v1353_v6   ;;  %1501 = vst [vmem:[%s2064_s3 + $0xb0] sm:$0xff] %v1433_v7   ;;  %v646_v16 = vmul.f32 %v1830_v40, %v436_v12  ;;  %v678_v17 = vmul.f32 %v1830_v40, %v564_v13  ;;  %v717_v18 = vadd.f32 %v1837_v45, %v648_v10 }
 0x10a   :  { %v749_v19 = vadd.f32 %v1837_v45, %v680_v11  ;;  %v1589_v20 = vpop.f32.mrf.mxu0  ;;  %v1621_v21 = vpop.f32.mrf.mxu1  ;;  %v778_v32 = vmax.f32 %v714_v14, 0.0  ;;  %v810_v33 = vmax.f32 %v746_v15, 0.0 }
 0x10b   :  { %v715_v24 = vadd.f32 %v1837_v45, %v646_v16  ;;  %v747_v25 = vadd.f32 %v1837_v45, %v678_v17  ;;  %v781_v26 = vmax.f32 %v717_v18, 0.0  ;;  %v651_v28 = vmul.f32 %v1589_v20, %v1830_v40 }
 0x10c   :  { %v813_v27 = vmax.f32 %v749_v19, 0.0  ;;  %v683_v29 = vmul.f32 %v1621_v21, %v1830_v40  ;;  %v449_v30 = vpop.f32.mrf.mxu0  ;;  %v577_v31 = vpop.f32.mrf.mxu1 }
 0x10d   :  { %v779_v34 = vmax.f32 %v715_v24, 0.0  ;;  %v811_v35 = vmax.f32 %v747_v25, 0.0  ;;  %v1368_v36 = vpack.c.bf16 %v781_v26, %v780_v22  ;;  %v649_v38 = vmul.f32 %v1830_v40, %v449_v30 }
 0x10e   :  { %v1448_v37 = vpack.c.bf16 %v813_v27, %v812_v23  ;;  %v681_v39 = vmul.f32 %v1830_v40, %v577_v31  ;;  %v1590_v41 = vpop.f32.mrf.mxu0  ;;  %v1622_v42 = vpop.f32.mrf.mxu1  ;;  %v720_v46 = vadd.f32 %v1837_v45, %v651_v28  ;;  %v752_v47 = vadd.f32 %v1837_v45, %v683_v29 }
 0x10f   :  { %v1363_v43 = vpack.c.bf16 %v779_v34, %v778_v32  ;;  %v1443_v44 = vpack.c.bf16 %v811_v35, %v810_v33  ;;  %1488 = vst [vmem:[%s2064_s3 + $0x48] sm:$0xff] %v1368_v36   ;;  %v652_v48 = vmul.f32 %v1590_v41, %v1830_v40  ;;  %v684_v49 = vmul.f32 %v1622_v42, %v1830_v40 }
 0x110   :  { %1504 = vst [vmem:[%s2064_s3 + $0xc8] sm:$0xff] %v1448_v37   ;;  %v452_v50 = vpop.f32.mrf.mxu0  ;;  %v580_v51 = vpop.f32.mrf.mxu1  ;;  %v718_v52 = vadd.f32 %v1837_v45, %v649_v38  ;;  %v750_v53 = vadd.f32 %v1837_v45, %v681_v39  ;;  %v784_v0 = vmax.f32 %v720_v46, 0.0  ;;  %v816_v1 = vmax.f32 %v752_v47, 0.0 }
 0x111   :  { %1487 = vst [vmem:[%s2064_s3 + $0x40] sm:$0xff] %v1363_v43   ;;  %1503 = vst [vmem:[%s2064_s3 + $0xc0] sm:$0xff] %v1443_v44   ;;  %v650_v54 = vmul.f32 %v1830_v40, %v452_v50  ;;  %v682_v55 = vmul.f32 %v1830_v40, %v580_v51  ;;  %v721_v56 = vadd.f32 %v1837_v45, %v652_v48 }
 0x112   :  { %v753_v57 = vadd.f32 %v1837_v45, %v684_v49  ;;  %v1593_v58 = vpop.f32.mrf.mxu0  ;;  %v1625_v59 = vpop.f32.mrf.mxu1  ;;  %v782_v6 = vmax.f32 %v718_v52, 0.0  ;;  %v814_v7 = vmax.f32 %v750_v53, 0.0 }
 0x113   :  { %v719_v60 = vadd.f32 %v1837_v45, %v650_v54  ;;  %v751_v61 = vadd.f32 %v1837_v45, %v682_v55  ;;  %v655_v62 = vmul.f32 %v1593_v58, %v1830_v40  ;;  %v687_v63 = vmul.f32 %v1625_v59, %v1830_v40 }
 0x114   :  { %v785_v2 = vmax.f32 %v721_v56, 0.0  ;;  %v817_v3 = vmax.f32 %v753_v57, 0.0  ;;  %v465_v4 = vpop.f32.mrf.mxu0  ;;  %v593_v5 = vpop.f32.mrf.mxu1 }
 0x115   :  { %v783_v8 = vmax.f32 %v719_v60, 0.0  ;;  %v815_v9 = vmax.f32 %v751_v61, 0.0  ;;  %v653_v12 = vmul.f32 %v1830_v40, %v465_v4  ;;  %v685_v13 = vmul.f32 %v1830_v40, %v593_v5 }
 0x116   :  { %v1378_v10 = vpack.c.bf16 %v785_v2, %v784_v0  ;;  %v1458_v11 = vpack.c.bf16 %v817_v3, %v816_v1  ;;  %v1594_v14 = vpop.f32.mrf.mxu0  ;;  %v1626_v15 = vpop.f32.mrf.mxu1  ;;  %v724_v18 = vadd.f32 %v1837_v45, %v655_v62  ;;  %v756_v19 = vadd.f32 %v1837_v45, %v687_v63 }
 0x117   :  { %v1373_v16 = vpack.c.bf16 %v783_v8, %v782_v6  ;;  %v1453_v17 = vpack.c.bf16 %v815_v9, %v814_v7  ;;  %v656_v20 = vmul.f32 %v1594_v14, %v1830_v40  ;;  %v688_v21 = vmul.f32 %v1626_v15, %v1830_v40 }
 0x118   :  { %1490 = vst [vmem:[%s2064_s3 + $0x58] sm:$0xff] %v1378_v10   ;;  %1506 = vst [vmem:[%s2064_s3 + $0xd8] sm:$0xff] %v1458_v11   ;;  %v468_v22 = vpop.f32.mrf.mxu0  ;;  %v596_v23 = vpop.f32.mrf.mxu1  ;;  %v722_v24 = vadd.f32 %v1837_v45, %v653_v12  ;;  %v754_v25 = vadd.f32 %v1837_v45, %v685_v13  ;;  %v788_v32 = vmax.f32 %v724_v18, 0.0  ;;  %v820_v33 = vmax.f32 %v756_v19, 0.0 }
 0x119   :  { %1489 = vst [vmem:[%s2064_s3 + $0x50] sm:$0xff] %v1373_v16   ;;  %1505 = vst [vmem:[%s2064_s3 + $0xd0] sm:$0xff] %v1453_v17   ;;  %v654_v26 = vmul.f32 %v1830_v40, %v468_v22  ;;  %v686_v27 = vmul.f32 %v1830_v40, %v596_v23  ;;  %v725_v28 = vadd.f32 %v1837_v45, %v656_v20 }
 0x11a   :  { %v757_v29 = vadd.f32 %v1837_v45, %v688_v21  ;;  %v1597_v30 = vpop.f32.mrf.mxu0  ;;  %v1629_v31 = vpop.f32.mrf.mxu1  ;;  %v786_v43 = vmax.f32 %v722_v24, 0.0  ;;  %v818_v44 = vmax.f32 %v754_v25, 0.0 }
 0x11b   :  { %v723_v34 = vadd.f32 %v1837_v45, %v654_v26  ;;  %v755_v35 = vadd.f32 %v1837_v45, %v686_v27  ;;  %v789_v36 = vmax.f32 %v725_v28, 0.0  ;;  %v659_v38 = vmul.f32 %v1597_v30, %v1830_v40 }
 0x11c   :  { %v821_v37 = vmax.f32 %v757_v29, 0.0  ;;  %v691_v39 = vmul.f32 %v1629_v31, %v1830_v40  ;;  %v481_v41 = vpop.f32.mrf.mxu0  ;;  %v609_v42 = vpop.f32.mrf.mxu1 }
 0x11d   :  { %v787_v46 = vmax.f32 %v723_v34, 0.0  ;;  %v819_v47 = vmax.f32 %v755_v35, 0.0  ;;  %v1388_v48 = vpack.c.bf16 %v789_v36, %v788_v32  ;;  %v657_v50 = vmul.f32 %v1830_v40, %v481_v41 }
 0x11e   :  { %v1468_v49 = vpack.c.bf16 %v821_v37, %v820_v33  ;;  %v689_v51 = vmul.f32 %v1830_v40, %v609_v42  ;;  %v1598_v52 = vpop.f32.mrf.mxu0  ;;  %v1630_v53 = vpop.f32.mrf.mxu1  ;;  %v728_v56 = vadd.f32 %v1837_v45, %v659_v38  ;;  %v760_v57 = vadd.f32 %v1837_v45, %v691_v39 }
 0x11f   :  { %v1383_v54 = vpack.c.bf16 %v787_v46, %v786_v43  ;;  %v1463_v55 = vpack.c.bf16 %v819_v47, %v818_v44  ;;  %1492 = vst [vmem:[%s2064_s3 + $0x68] sm:$0xff] %v1388_v48   ;;  %v660_v58 = vmul.f32 %v1598_v52, %v1830_v40  ;;  %v692_v59 = vmul.f32 %v1630_v53, %v1830_v40 }
 0x120   :  { %1508 = vst [vmem:[%s2064_s3 + $0xe8] sm:$0xff] %v1468_v49   ;;  %v484_v60 = vpop.f32.mrf.mxu0  ;;  %v612_v61 = vpop.f32.mrf.mxu1  ;;  %v726_v62 = vadd.f32 %v1837_v45, %v657_v50  ;;  %v758_v63 = vadd.f32 %v1837_v45, %v689_v51  ;;  %v792_v6 = vmax.f32 %v728_v56, 0.0  ;;  %v824_v7 = vmax.f32 %v760_v57, 0.0 }
 0x121   :  { %1491 = vst [vmem:[%s2064_s3 + $0x60] sm:$0xff] %v1383_v54   ;;  %1507 = vst [vmem:[%s2064_s3 + $0xe0] sm:$0xff] %v1463_v55   ;;  %v658_v0 = vmul.f32 %v1830_v40, %v484_v60  ;;  %v690_v1 = vmul.f32 %v1830_v40, %v612_v61  ;;  %v729_v2 = vadd.f32 %v1837_v45, %v660_v58 }
 0x122   :  { %v761_v3 = vadd.f32 %v1837_v45, %v692_v59  ;;  %v790_v10 = vmax.f32 %v726_v62, 0.0  ;;  %v822_v11 = vmax.f32 %v758_v63, 0.0 }
 0x123   :  { %v727_v4 = vadd.f32 %v1837_v45, %v658_v0  ;;  %v759_v5 = vadd.f32 %v1837_v45, %v690_v1  ;;  %v793_v8 = vmax.f32 %v729_v2, 0.0 }
 0x124   :  { %v825_v9 = vmax.f32 %v761_v3, 0.0 }
 0x125   :  { %v791_v12 = vmax.f32 %v727_v4, 0.0  ;;  %v823_v13 = vmax.f32 %v759_v5, 0.0  ;;  %v1398_v14 = vpack.c.bf16 %v793_v8, %v792_v6 }
 0x126   :  { %v1478_v15 = vpack.c.bf16 %v825_v9, %v824_v7 }
 0x127   :  { %v1393_v16 = vpack.c.bf16 %v791_v12, %v790_v10  ;;  %v1473_v40 = vpack.c.bf16 %v823_v13, %v822_v11  ;;  %1494 = vst [vmem:[%s2064_s3 + $0x78] sm:$0xff] %v1398_v14  }
 0x128   :  { %1510 = vst [vmem:[%s2064_s3 + $0xf8] sm:$0xff] %v1478_v15  }
 0x129   :  { %1493 = vst [vmem:[%s2064_s3 + $0x70] sm:$0xff] %v1393_v16   ;;  %1509 = vst [vmem:[%s2064_s3 + $0xf0] sm:$0xff] %v1473_v40  }

// kernel: _bottleneck_forward.3
= control target key start
LH: loop header
LB: loop body
LE: loop exit
PB: predicated region body
PF: predicated region fallthrough
CT: control target
= control target key end

     0   :  { %s7814_s27 = smov 0   ;;  %s10830_s0 = inlined_call_operand.vmem [shape: bf16[2,18,18,128], index: 0, kind: input, shape index: {}]   ;;  %s10831_s1 = inlined_call_operand.vmem [shape: bf16[9,128,128], index: 1, kind: input, shape index: {}]   ;;  %s10832_s2 = inlined_call_operand.vmem [shape: f32[2,128], index: 2, kind: input, shape index: {}]   ;;  %s10833_s3 = inlined_call_operand.vmem [shape: bf16[128,128], index: 3, kind: input, shape index: {}]   ;;  %s10834_s4 = inlined_call_operand.vmem [shape: f32[2,128], index: 4, kind: input, shape index: {}]   ;;  %s10835_s5 = inlined_call_operand.vmem [shape: bf16[2,256,128], index: 5, kind: input, shape index: {}]   ;;  %s10836_s6 = inlined_call_operand.vmem [shape: bf16[128,128], index: 6, kind: input, shape index: {}]   ;;  %s10837_s7 = inlined_call_operand.vmem [shape: f32[2,128], index: 7, kind: input, shape index: {}]   ;;  %s10838_s8 = inlined_call_operand.vmem [shape: f32[2,16,16,128], index: 8, kind: output, shape index: {}]  }
   0x1 LB: > { %s6147_s28 = sadd.s32 4294967295, %s7767_s27   ;;  %p6151_p0 = scmp.ge.s32.totalorder %s7767_s27, 1  ;;  %s7767_s27 = sphi %s7814_s27, %s18_s27  }
   0x2   : > { %p272_p1 = scmp.lt.s32.totalorder %s7767_s27, 3 }
   0x4   : > { %p273_p2 = pnand %p6151_p0, %p272_p1 }
   0x6   : > { %276 = sbr.rel (%p273_p2) target bundleno = 769 (0x301), region = 52 }
   0xb   : > { %v7600_v0 = vld [vmem:[%s10831_s1 + $0x78] sm:$0xff]   ;;  %p311_p3 = scmp.lt.s32.totalorder %s6147_s28, 1  ;;  %v7601_v1 = vld [vmem:[%s10831_s1 + $0x70] sm:$0xff]   ;;  %v7602_v2 = vld [vmem:[%s10831_s1 + $0x68] sm:$0xff]   ;;  %vm391_vm0 = vsmask.f32 3328 }
   0xc   : > { %7047 = vmatprep.subr.bf16.mxu0 %v7600_v0  ;;  %7575 = vmatprep.subr.bf16.mxu1 %v7600_v0  ;;  %v7603_v3 = vld [vmem:[%s10831_s1 + $0x60] sm:$0xff]   ;;  %vm392_vm1 = vsmask.f32 7440  ;;  %v7604_v17 = vld [vmem:[%s10831_s1 + $0x58] sm:$0xff]   ;;  %v7605_v33 = vld [vmem:[%s10831_s1 + $0x50] sm:$0xff]   ;;  %vm1421_vm3 = vcmask 1042432  }
   0xd   : > { %s11025_s28 = smov (!%p311_p3, %s6147_s28), 1  ;;  %7048 = vmatpush3.bf16.msra.mxu0 %v7600_v0  ;;  %7583 = vmatpush3.bf16.msra.mxu1 %v7600_v0  ;;  %vm7868_vm2 = vmor %vm391_vm0, %vm392_vm1  ;;  %v7606_v58 = vld [vmem:[%s10831_s1 + $0x48] sm:$0xff]   ;;  %vm1422_vm4 = vcmask 1046532  }
   0xe   : > { %7049 = vmatprep.subr.bf16.mxu0 %v7601_v1  ;;  %7576 = vmatprep.subr.bf16.mxu1 %v7601_v1  ;;  %s7591_s13 = smul.u32 216, %s11025_s28  ;;  %vm8179_vm5 = vmor %vm1421_vm3, %vm1422_vm4  ;;  %s6781_s12 = sshll.u32 %s11025_s28, 7 }
   0xf   : > { %s10262_s14 = scalar_lea.vmem %s10835_s5, %s6781_s12  ;;  %s6782_s10 = sshll.u32 %s11025_s28, 8 }
  0x10   : > { %s7837_s16 = scalar_lea.vmem %s10830_s0, %s7591_s13  ;;  %s10650_s28 = scalar_lea.vmem %s10838_s8, %s6782_s10 }
  0x11   : > { %7050 = vmatpush3.bf16.msra.mxu0 %v7601_v1  ;;  %7584 = vmatpush3.bf16.msra.mxu1 %v7601_v1  ;;  %v7843_v4 = vld [vmem:[%s7837_s16] sm:$0xf]  ;;  %v7846_v5 = vld [vmem:[%s7837_s16 + $0x4] sm:$0xf]  ;;  %v7849_v6 = vld [vmem:[%s7837_s16 + $0x8] sm:$0x1] }
  0x12   : > { %7051 = vmatprep.subr.bf16.mxu0 %v7602_v2  ;;  %7577 = vmatprep.subr.bf16.mxu1 %v7602_v2  ;;  %v395_v7 = vshrl.u32 %v7843_v4, 16  ;;  %v398_v8 = vshll.u32 %v7843_v4, 16  ;;  %v404_v9 = vshll.u32 %v7846_v5, 16  ;;  %v408_v10 = vshrl.u32 %v7846_v5, 16  ;;  %v343_v12 = vld [vmem:[%s7837_s16 + $0x60] sm:$0xf] }
  0x13   : > { %v414_v11 = vshll.u32 %v7849_v6, 16  ;;  %v344_v15 = vld [vmem:[%s7837_s16 + $0x64] sm:$0xf]  ;;  %v383_v16 = vld [vmem:[%s7837_s16 + $0x68] sm:$0x1]  ;;  %v587_v21 = vshrl.u32 %v343_v12, 16 }
  0x14   : > { %v397_v13 = vrot.slane %v395_v7, 4  ;;  %v400_v14 = vrot.slane %v398_v8, 5  ;;  %v406_v18 = vrot.slane %v404_v9, 5  ;;  %v410_v19 = vrot.slane %v408_v10, 4  ;;  %v7864_v26 = vld [vmem:[%s7837_s16 + $0xc] sm:$0xf] }
  0x15   : > { %7052 = vmatpush3.bf16.msra.mxu0 %v7602_v2  ;;  %7585 = vmatpush3.bf16.msra.mxu1 %v7602_v2  ;;  %v590_v23 = vshll.u32 %v343_v12, 16  ;;  %v596_v24 = vshll.u32 %v344_v15, 16  ;;  %v600_v25 = vshrl.u32 %v344_v15, 16  ;;  %v416_v29 = vrot.slane %v414_v11, 5  ;;  %v7873_v32 = vld [vmem:[%s7837_s16 + $0x10] sm:$0xf] }
  0x16   : > { %7053 = vmatprep.subr.bf16.mxu0 %v7603_v3  ;;  %7578 = vmatprep.subr.bf16.mxu1 %v7603_v3  ;;  %v401_v22 = vor.u32 %v400_v14, %v397_v13  ;;  %v411_v28 = vor.u32 %v410_v19, %v406_v18  ;;  %v589_v30 = vrot.slane %v587_v21, 4  ;;  %v606_v31 = vshll.u32 %v383_v16, 16  ;;  %v7879_v40 = vld [vmem:[%s7837_s16 + $0x14] sm:$0x1]  ;;  %v345_v47 = vld [vmem:[%s7837_s16 + $0x6c] sm:$0xf] }
  0x17   : > { %v592_v35 = vrot.slane %v590_v23, 5  ;;  %v598_v36 = vrot.slane %v596_v24, 5  ;;  %v602_v37 = vrot.slane %v600_v25, 4  ;;  %v419_v41 = vshrl.u32 %v7864_v26, 16  ;;  %v346_v52 = vld [vmem:[%s7837_s16 + $0x70] sm:$0xf] }
  0x18   : > { %v402_v34 = vrot.slane %v401_v22, 4  ;;  %v412_v38 = vrot.slane %v411_v28, 4  ;;  %v608_v39 = vrot.slane %v606_v31, 5  ;;  %v422_v42 = vshll.u32 %v7864_v26, 16  ;;  %v384_v57 = vld [vmem:[%s7837_s16 + $0x74] sm:$0x1] }
  0x19   : > { %7054 = vmatpush3.bf16.msra.mxu0 %v7603_v3  ;;  %7586 = vmatpush3.bf16.msra.mxu1 %v7603_v3  ;;  %v593_v44 = vor.u32 %v592_v35, %v589_v30  ;;  %v603_v45 = vor.u32 %v602_v37, %v598_v36  ;;  %v428_v46 = vshll.u32 %v7873_v32, 16  ;;  %v421_v49 = vrot.slane %v419_v41, 4  ;;  %v7902_v14 = vld [vmem:[%s7837_s16 + $0x18] sm:$0xf]  ;;  %v7607_v15 = vld [vmem:[%s10831_s1 + $0x40] sm:$0xff]  }
  0x1a   : > { %7055 = vmatprep.subr.bf16.mxu0 %v7604_v17  ;;  %7579 = vmatprep.subr.bf16.mxu1 %v7604_v17  ;;  %v407_v43 = vsel %vm7868_vm2, %v402_v34, %v406_v18  ;;  %v417_v48 = vsel %vm7868_vm2, %v412_v38, %v416_v29  ;;  %v424_v50 = vrot.slane %v422_v42, 5  ;;  %v432_v51 = vshrl.u32 %v7873_v32, 16  ;;  %v7910_v19 = vld [vmem:[%s7837_s16 + $0x1c] sm:$0xf]  ;;  %v7915_v25 = vld [vmem:[%s7837_s16 + $0x20] sm:$0x1] }
  0x1b   : > { %v6173_v53 = vcombine.low %v407_v43, %v417_v48  ;;  %v594_v54 = vrot.slane %v593_v44, 4  ;;  %v604_v55 = vrot.slane %v603_v45, 4  ;;  %v430_v56 = vrot.slane %v428_v46, 5  ;;  %v347_v34 = vld [vmem:[%s7837_s16 + $0x78] sm:$0xf] }
  0x1c   : > { %v425_v59 = vor.u32 %v424_v50, %v421_v49  ;;  %v434_v60 = vrot.slane %v432_v51, 4  ;;  %v438_v61 = vshll.u32 %v7879_v40, 16  ;;  %v611_v1 = vshrl.u32 %v345_v47, 16  ;;  %v7608_v41 = vld [vmem:[%s10831_s1 + $0x38] sm:$0xff]   ;;  %v385_v49 = vld [vmem:[%s7837_s16 + $0x80] sm:$0x1] }
  0x1d   : > { %7056 = vmatpush3.bf16.msra.mxu0 %v7604_v17  ;;  %7587 = vmatpush3.bf16.msra.mxu1 %v7604_v17  ;;  %v599_v63 = vsel %vm7868_vm2, %v594_v54, %v598_v36  ;;  %v609_v0 = vsel %vm7868_vm2, %v604_v55, %v608_v39  ;;  %v614_v2 = vshll.u32 %v345_v47, 16  ;;  %v620_v12 = vshll.u32 %v346_v52, 16  ;;  %v7924_v39 = vld [vmem:[%s7837_s16 + $0x7c] sm:$0xf] }
  0x1e   : > { %7057 = vmatprep.subr.bf16.mxu0 %v7605_v33  ;;  %7580 = vmatprep.subr.bf16.mxu1 %v7605_v33  ;;  %v6181_v3 = vcombine.low %v599_v63, %v609_v0  ;;  %v426_v7 = vrot.slane %v425_v59, 4  ;;  %v435_v8 = vor.u32 %v434_v60, %v430_v56  ;;  %v440_v9 = vrot.slane %v438_v61, 5  ;;  %v7609_v42 = vld [vmem:[%s10831_s1 + $0xb8] sm:$0xff]   ;;  %v7611_v59 = vld [vmem:[%s10831_s1 + $0xb0] sm:$0xff]   ;;  %v7951_v0 = vld [vmem:[%s7837_s16 + $0x28] sm:$0xf] }
  0x1f   : > { %7063 = vmatprep.mubr.bf16.mxu0 %v6173_v53  ;;  %v613_v10 = vrot.slane %v611_v1, 4  ;;  %v616_v11 = vrot.slane %v614_v2, 5  ;;  %v624_v13 = vshrl.u32 %v346_v52, 16  ;;  %v630_v18 = vshll.u32 %v384_v57, 16  ;;  %v7610_v52 = vld [vmem:[%s10831_s1 + $0x30] sm:$0xff]  }
  0x20   : > { %v431_v16 = vsel %vm7868_vm2, %v426_v7, %v430_v56  ;;  %v436_v17 = vrot.slane %v435_v8, 4  ;;  %7079 = vmatprep.mubr.bf16.mxu1 %v6181_v3  ;;  %v622_v23 = vrot.slane %v620_v12, 5  ;;  %v443_v28 = vshrl.u32 %v7902_v14, 16  ;;  %v7942_v57 = vld [vmem:[%s7837_s16 + $0x24] sm:$0xf] }
  0x21   : > { %7058 = vmatpush3.bf16.msra.mxu0 %v7605_v33  ;;  %7588 = vmatpush3.bf16.msra.mxu1 %v7605_v33  ;;  %v617_v22 = vor.u32 %v616_v11, %v613_v10  ;;  %v626_v24 = vrot.slane %v624_v13, 4  ;;  %v632_v30 = vrot.slane %v630_v18, 5  ;;  %v446_v31 = vshll.u32 %v7902_v14, 16  ;;  %v7954_v8 = vld [vmem:[%s7837_s16 + $0x2c] sm:$0x1] }
  0x22   : > { %7059 = vmatprep.subr.bf16.mxu0 %v7606_v58  ;;  %7581 = vmatprep.subr.bf16.mxu1 %v7606_v58  ;;  %v441_v29 = vsel %vm7868_vm2, %v436_v17, %v440_v9  ;;  %v452_v33 = vshll.u32 %v7910_v19, 16  ;;  %v445_v38 = vrot.slane %v443_v28, 4  ;;  %v456_v45 = vshrl.u32 %v7910_v19, 16  ;;  %v7958_v13 = vld [vmem:[%s7837_s16 + $0x84] sm:$0xf] }
  0x23   : > { %v6174_v35 = vcombine.low %v431_v16, %v441_v29  ;;  %v618_v36 = vrot.slane %v617_v22, 4  ;;  %v627_v37 = vor.u32 %v626_v24, %v622_v23  ;;  %v448_v43 = vrot.slane %v446_v31, 5  ;;  %v7965_v22 = vld [vmem:[%s7837_s16 + $0x88] sm:$0xf] }
  0x24   : > { %v454_v44 = vrot.slane %v452_v33, 5  ;;  %v462_v46 = vshll.u32 %v7915_v25, 16  ;;  %v635_v50 = vshrl.u32 %v347_v34, 16  ;;  %v638_v51 = vshll.u32 %v347_v34, 16 }
  0x25   : > { %7060 = vmatpush3.bf16.msra.mxu0 %v7606_v58  ;;  %7589 = vmatpush3.bf16.msra.mxu1 %v7606_v58  ;;  %v623_v47 = vsel %vm7868_vm2, %v618_v36, %v622_v23  ;;  %v628_v48 = vrot.slane %v627_v37, 4  ;;  %v449_v53 = vor.u32 %v448_v43, %v445_v38  ;;  %v458_v54 = vrot.slane %v456_v45, 4  ;;  %v7974_v36 = vld [vmem:[%s7837_s16 + $0x8c] sm:$0x1] }
  0x26   : > { %7061 = vmatprep.subr.bf16.mxu0 %v7607_v15  ;;  %7582 = vmatprep.subr.bf16.mxu1 %v7607_v15  ;;  %v464_v55 = vrot.slane %v462_v46, 5  ;;  %v644_v56 = vshll.u32 %v7924_v39, 16  ;;  %v637_v60 = vrot.slane %v635_v50, 4  ;;  %v640_v61 = vrot.slane %v638_v51, 5  ;;  %v7613_v37 = vld [vmem:[%s10831_s1 + $0xa8] sm:$0xff]  }
  0x27   : > { %v633_v58 = vsel %vm7868_vm2, %v628_v48, %v632_v30  ;;  %v648_v63 = vshrl.u32 %v7924_v39, 16  ;;  %v450_v2 = vrot.slane %v449_v53, 4  ;;  %v459_v3 = vor.u32 %v458_v54, %v454_v44  ;;  %v7612_v30 = vld [vmem:[%s10831_s1 + $0x28] sm:$0xff]   ;;  %v7989_v53 = vld [vmem:[%s7837_s16 + $0x30] sm:$0xf] }
  0x28   : > { %v6182_v1 = vcombine.low %v623_v47, %v633_v58  ;;  %v646_v7 = vrot.slane %v644_v56, 5  ;;  %v641_v9 = vor.u32 %v640_v61, %v637_v60  ;;  %v654_v11 = vshll.u32 %v385_v49, 16  ;;  %v7998_v60 = vld [vmem:[%s7837_s16 + $0x34] sm:$0xf] }
  0x29   : > { %7062 = vmatpush3.bf16.msra.mxu0 %v7607_v15  ;;  %7590 = vmatpush3.bf16.msra.mxu1 %v7607_v15  ;;  %v650_v10 = vrot.slane %v648_v63, 4  ;;  %v467_v12 = vshrl.u32 %v7942_v57, 16  ;;  %v455_v15 = vsel %vm7868_vm2, %v450_v2, %v454_v44  ;;  %v460_v16 = vrot.slane %v459_v3, 4 }
  0x2a   : > { %7095 = vmatprep.subr.bf16.mxu1 %v7608_v41  ;;  %7143 = vmatprep.subr.bf16.mxu0 %v7609_v42  ;;  %v470_v17 = vshll.u32 %v7942_v57, 16  ;;  %v476_v18 = vshll.u32 %v7951_v0, 16  ;;  %v642_v23 = vrot.slane %v641_v9, 4  ;;  %v656_v28 = vrot.slane %v654_v11, 5 }
  0x2b   : > { %v651_v24 = vor.u32 %v650_v10, %v646_v7  ;;  %v469_v29 = vrot.slane %v467_v12, 4  ;;  %v465_v31 = vsel %vm7868_vm2, %v460_v16, %v464_v55  ;;  %v486_v43 = vshll.u32 %v7954_v8, 16  ;;  %v8006_v16 = vld [vmem:[%s7837_s16 + $0x38] sm:$0x1] }
  0x2c   : > { %7064 = vmatmul.mubr.bf16.vlgmr.msra.gmra.mxu0 %v6174_v35  ;;  %7080 = vmatmul.mubr.bf16.vlgmr.msra.gmra.mxu1 %v6182_v1  ;;  %v472_v33 = vrot.slane %v470_v17, 5  ;;  %v478_v34 = vrot.slane %v476_v18, 5  ;;  %v480_v35 = vshrl.u32 %v7951_v0, 16  ;;  %v6175_v38 = vcombine.low %v455_v15, %v465_v31  ;;  %v8010_v18 = vld [vmem:[%s7837_s16 + $0x90] sm:$0xf] }
  0x2d   : > { %7096 = vmatpush3.bf16.msra.mxu1 %v7608_v41  ;;  %7144 = vmatpush3.bf16.msra.mxu0 %v7609_v42  ;;  %v647_v41 = vsel %vm7868_vm2, %v642_v23, %v646_v7  ;;  %v652_v42 = vrot.slane %v651_v24, 4  ;;  %v659_v46 = vshrl.u32 %v7958_v13, 16  ;;  %v662_v47 = vshll.u32 %v7958_v13, 16  ;;  %v8016_v31 = vld [vmem:[%s7837_s16 + $0x94] sm:$0xf] }
  0x2e   : > { %7097 = vmatprep.subr.bf16.mxu1 %v7610_v52  ;;  %7145 = vmatprep.subr.bf16.mxu0 %v7611_v59  ;;  %v473_v44 = vor.u32 %v472_v33, %v469_v29  ;;  %v482_v45 = vrot.slane %v480_v35, 4  ;;  %v488_v49 = vrot.slane %v486_v43, 5  ;;  %v668_v50 = vshll.u32 %v7965_v22, 16 }
  0x2f   : > { %v657_v48 = vsel %vm7868_vm2, %v652_v42, %v656_v28  ;;  %v672_v51 = vshrl.u32 %v7965_v22, 16  ;;  %7067 = vmatprep.mubr.bf16.mxu0 %v6175_v38  ;;  %v661_v58 = vrot.slane %v659_v46, 4  ;;  %v664_v61 = vrot.slane %v662_v47, 5  ;;  %v7617_v38 = vld [vmem:[%s10831_s1 + $0x98] sm:$0xff]   ;;  %v7618_v46 = vld [vmem:[%s10831_s1 + $0x10] sm:$0xff]  }
  0x30   : > { %v6183_v54 = vcombine.low %v647_v41, %v657_v48  ;;  %v474_v55 = vrot.slane %v473_v44, 4  ;;  %v483_v56 = vor.u32 %v482_v45, %v478_v34  ;;  %v670_v63 = vrot.slane %v668_v50, 5  ;;  %v8026_v44 = vld [vmem:[%s7837_s16 + $0x98] sm:$0x1] }
  0x31   : > { %7098 = vmatpush3.bf16.msra.mxu1 %v7610_v52  ;;  %7146 = vmatpush3.bf16.msra.mxu0 %v7611_v59  ;;  %v7614_v52 = vld [vmem:[%s10831_s1 + $0x20] sm:$0xff]   ;;  %v674_v1 = vrot.slane %v672_v51, 4  ;;  %v678_v2 = vshll.u32 %v7974_v36, 16  ;;  %v491_v9 = vshrl.u32 %v7989_v53, 16  ;;  %v494_v10 = vshll.u32 %v7989_v53, 16 }
  0x32   : > { %7099 = vmatprep.subr.bf16.mxu1 %v7612_v30  ;;  %v7615_v59 = vld [vmem:[%s10831_s1 + $0xa0] sm:$0xff]   ;;  %7147 = vmatprep.subr.bf16.mxu0 %v7613_v37  ;;  %v479_v3 = vsel %vm7868_vm2, %v474_v55, %v478_v34  ;;  %v484_v7 = vrot.slane %v483_v56, 4  ;;  %v665_v11 = vor.u32 %v664_v61, %v661_v58  ;;  %v500_v17 = vshll.u32 %v7998_v60, 16  ;;  %v8039_v51 = vld [vmem:[%s7837_s16 + $0x3c] sm:$0xf]  ;;  %v7619_v55 = vld [vmem:[%s10831_s1 + $0x90] sm:$0xff]  }
  0x33   : > { %7083 = vmatprep.mubr.bf16.mxu1 %v6183_v54  ;;  %v675_v12 = vor.u32 %v674_v1, %v670_v63  ;;  %v680_v15 = vrot.slane %v678_v2, 5  ;;  %v493_v24 = vrot.slane %v491_v9, 4  ;;  %v496_v28 = vrot.slane %v494_v10, 5  ;;  %v8042_v54 = vld [vmem:[%s7837_s16 + $0x40] sm:$0xf] }
  0x34   : > { %v489_v23 = vsel %vm7868_vm2, %v484_v7, %v488_v49  ;;  %v504_v29 = vshrl.u32 %v7998_v60, 16  ;;  %v666_v34 = vrot.slane %v665_v11, 4  ;;  %v510_v43 = vshll.u32 %v8006_v16, 16  ;;  %v8049_v7 = vld [vmem:[%s7837_s16 + $0x44] sm:$0x1] }
  0x35   : > { %7100 = vmatpush3.bf16.msra.mxu1 %v7612_v30  ;;  %7148 = vmatpush3.bf16.msra.mxu0 %v7613_v37  ;;  %v7616_v30 = vld [vmem:[%s10831_s1 + $0x18] sm:$0xff]   ;;  %v6176_v33 = vcombine.low %v479_v3, %v489_v23  ;;  %v676_v35 = vrot.slane %v675_v12, 4  ;;  %v502_v37 = vrot.slane %v500_v17, 5  ;;  %v497_v41 = vor.u32 %v496_v28, %v493_v24  ;;  %v8061_v28 = vld [vmem:[%s7837_s16 + $0xa0] sm:$0xf] }
  0x36   : > { %7101 = vmatprep.subr.bf16.mxu1 %v7614_v52  ;;  %7149 = vmatprep.subr.bf16.mxu0 %v7615_v59  ;;  %v506_v42 = vrot.slane %v504_v29, 4  ;;  %v683_v45 = vshrl.u32 %v8010_v18, 16  ;;  %v671_v47 = vsel %vm7868_vm2, %v666_v34, %v670_v63  ;;  %v686_v49 = vshll.u32 %v8010_v18, 16  ;;  %v8052_v9 = vld [vmem:[%s7837_s16 + $0x9c] sm:$0xf]  ;;  %v7620_v29 = vld [vmem:[%s10831_s1 + $0x8] sm:$0xff]  }
  0x37   : > { %7068 = vmatmul.mubr.bf16.gmra.mxu0 %v6176_v33  ;;  %v681_v48 = vsel %vm7868_vm2, %v676_v35, %v680_v15  ;;  %v692_v50 = vshll.u32 %v8016_v31, 16  ;;  %v498_v58 = vrot.slane %v497_v41, 4  ;;  %v512_v63 = vrot.slane %v510_v43, 5  ;;  %v7621_v41 = vld [vmem:[%s10831_s1 + $0x88] sm:$0xff]  }
  0x38   : > { %v6184_v56 = vcombine.low %v671_v47, %v681_v48  ;;  %v507_v61 = vor.u32 %v506_v42, %v502_v37  ;;  %v688_v1 = vrot.slane %v686_v49, 5  ;;  %v696_v3 = vshrl.u32 %v8016_v31, 16 }
  0x39   : > { %7102 = vmatpush3.bf16.msra.mxu1 %v7614_v52  ;;  %7150 = vmatpush3.bf16.msra.mxu0 %v7615_v59  ;;  %v685_v52 = vrot.slane %v683_v45, 4  ;;  %v694_v2 = vrot.slane %v692_v50, 5  ;;  %v503_v10 = vsel %vm7868_vm2, %v498_v58, %v502_v37  ;;  %v702_v11 = vshll.u32 %v8026_v44, 16 }
  0x3a   : > { %7103 = vmatprep.subr.bf16.mxu1 %v7616_v30  ;;  %7151 = vmatprep.subr.bf16.mxu0 %v7617_v38  ;;  %v508_v59 = vrot.slane %v507_v61, 4  ;;  %v515_v12 = vshrl.u32 %v8039_v51, 16  ;;  %v698_v17 = vrot.slane %v696_v3, 4  ;;  %v518_v23 = vshll.u32 %v8039_v51, 16  ;;  %v8077_v61 = vld [vmem:[%s7837_s16 + $0xa4] sm:$0x1] }
  0x3b   : > { %7084 = vmatmul.mubr.bf16.gmra.mxu1 %v6184_v56  ;;  %v689_v15 = vor.u32 %v688_v1, %v685_v52  ;;  %v524_v24 = vshll.u32 %v8042_v54, 16  ;;  %v704_v34 = vrot.slane %v702_v11, 5  ;;  %v528_v37 = vshrl.u32 %v8042_v54, 16 }
  0x3c   : > { %v513_v33 = vsel %vm7868_vm2, %v508_v59, %v512_v63  ;;  %v517_v35 = vrot.slane %v515_v12, 4  ;;  %v699_v43 = vor.u32 %v698_v17, %v694_v2  ;;  %v520_v45 = vrot.slane %v518_v23, 5  ;;  %v8082_v59 = vld [vmem:[%s7837_s16 + $0x48] sm:$0xf]  ;;  %v8091_v17 = vld [vmem:[%s7837_s16 + $0x4c] sm:$0xf] }
  0x3d   : > { %7104 = vmatpush3.bf16.msra.mxu1 %v7616_v30  ;;  %7152 = vmatpush3.bf16.msra.mxu0 %v7617_v38  ;;  %v6177_v42 = vcombine.low %v503_v10, %v513_v33  ;;  %v690_v30 = vrot.slane %v689_v15, 4  ;;  %v526_v47 = vrot.slane %v524_v24, 5  ;;  %v530_v48 = vrot.slane %v528_v37, 4 }
  0x3e   : > { %7105 = vmatprep.subr.bf16.mxu1 %v7618_v46  ;;  %7153 = vmatprep.subr.bf16.mxu0 %v7619_v55  ;;  %v534_v49 = vshll.u32 %v8049_v7, 16  ;;  %v707_v50 = vshrl.u32 %v8052_v9, 16  ;;  %v700_v56 = vrot.slane %v699_v43, 4  ;;  %v521_v58 = vor.u32 %v520_v45, %v517_v35 }
  0x3f   : > { %7071 = vmatprep.mubr.bf16.mxu0 %v6177_v42  ;;  %v695_v38 = vsel %vm7868_vm2, %v690_v30, %v694_v2  ;;  %v710_v63 = vshll.u32 %v8052_v9, 16  ;;  %v531_v52 = vor.u32 %v530_v48, %v526_v47  ;;  %v716_v10 = vshll.u32 %v8061_v28, 16  ;;  %v7622_v2 = vld [vmem:[%s10831_s1] sm:$0xff]   ;;  %v8100_v30 = vld [vmem:[%s7837_s16 + $0x50] sm:$0x1] }
  0x40   : > { %v536_v1 = vrot.slane %v534_v49, 5  ;;  %v709_v3 = vrot.slane %v707_v50, 4  ;;  %v705_v11 = vsel %vm7868_vm2, %v700_v56, %v704_v34  ;;  %v522_v12 = vrot.slane %v521_v58, 4 }
  0x41   : > { %7106 = vmatpush3.bf16.msra.mxu1 %v7618_v46  ;;  %7154 = vmatpush3.bf16.msra.mxu0 %v7619_v55  ;;  %v712_v15 = vrot.slane %v710_v63, 5  ;;  %v720_v46 = vshrl.u32 %v8061_v28, 16  ;;  %v7623_v55 = vld [vmem:[%s10831_s1 + $0x80] sm:$0xff]   ;;  %v6185_v23 = vcombine.low %v695_v38, %v705_v11  ;;  %v532_v24 = vrot.slane %v531_v52, 4  ;;  %v8108_v38 = vld [vmem:[%s7837_s16 + $0xa8] sm:$0xf] }
  0x42   : > { %7107 = vmatprep.subr.bf16.mxu1 %v7620_v29  ;;  %7155 = vmatprep.subr.bf16.mxu0 %v7621_v41  ;;  %v718_v33 = vrot.slane %v716_v10, 5  ;;  %v726_v35 = vshll.u32 %v8077_v61, 16  ;;  %v527_v34 = vsel %vm7868_vm2, %v522_v12, %v526_v47  ;;  %v539_v43 = vshrl.u32 %v8082_v59, 16  ;;  %10869 = vst [vmem:[#allocation2_spill] sm:$0xff] %v8108_v38  ;;  %v8113_v47 = vld [vmem:[%s10831_s1 + $0xf8] sm:$0xff]  }
  0x43   : > { %v713_v37 = vor.u32 %v712_v15, %v709_v3  ;;  %v722_v42 = vrot.slane %v720_v46, 4  ;;  %7087 = vmatprep.mubr.bf16.mxu1 %v6185_v23  ;;  %v537_v45 = vsel %vm7868_vm2, %v532_v24, %v536_v1  ;;  %v542_v49 = vshll.u32 %v8082_v59, 16  ;;  %v8116_v52 = vld [vmem:[%s7837_s16 + $0xac] sm:$0xf]  ;;  %v8121_v1 = vld [vmem:[%s10831_s1 + $0x138] sm:$0xff]  }
  0x44   : > { %v728_v48 = vrot.slane %v726_v35, 5  ;;  %v548_v50 = vshll.u32 %v8091_v17, 16  ;;  %v541_v63 = vrot.slane %v539_v43, 4  ;;  %v552_v10 = vshrl.u32 %v8091_v17, 16  ;;  %v8126_v12 = vld [vmem:[%s7837_s16 + $0xb0] sm:$0x1] }
  0x45   : > { %7108 = vmatpush3.bf16.msra.mxu1 %v7620_v29  ;;  %7156 = vmatpush3.bf16.msra.mxu0 %v7621_v41  ;;  %v6178_v29 = vcombine.low %v527_v34, %v537_v45  ;;  %v714_v56 = vrot.slane %v713_v37, 4  ;;  %v723_v58 = vor.u32 %v722_v42, %v718_v33  ;;  %v544_v41 = vrot.slane %v542_v49, 5  ;;  %10870 = vst [vmem:[#allocation3_spill] sm:$0xff] %v8126_v12  ;;  %v8129_v15 = vld [vmem:[%s7837_s16 + $0x54] sm:$0xf] }
  0x46   : > { %7109 = vmatprep.subr.bf16.mxu1 %v7622_v2  ;;  %7157 = vmatprep.subr.bf16.mxu0 %v7623_v55  ;;  %v550_v3 = vrot.slane %v548_v50, 5  ;;  %v558_v11 = vshll.u32 %v8100_v30, 16  ;;  %v731_v24 = vshrl.u32 %v8108_v38, 16  ;;  %v734_v35 = vshll.u32 %v8108_v38, 16  ;;  %v8136_v34 = vld [vmem:[%s7837_s16 + $0x58] sm:$0xf] }
  0x47   : > { %7072 = vmatmul.mubr.bf16.gmra.mxu0 %v6178_v29  ;;  %v719_v46 = vsel %vm7868_vm2, %v714_v56, %v718_v33  ;;  %v724_v23 = vrot.slane %v723_v58, 4  ;;  %v545_v37 = vor.u32 %v544_v41, %v541_v63  ;;  %v554_v42 = vrot.slane %v552_v10, 4 }
  0x48   : > { %v560_v43 = vrot.slane %v558_v11, 5  ;;  %v740_v45 = vshll.u32 %v8116_v52, 16  ;;  %v733_v49 = vrot.slane %v731_v24, 4  ;;  %v736_v50 = vrot.slane %v734_v35, 5 }
  0x49   : > { %7110 = vmatpush3.bf16.msra.mxu1 %v7622_v2  ;;  %7158 = vmatpush3.bf16.msra.mxu0 %v7623_v55  ;;  %v729_v33 = vsel %vm7868_vm2, %v724_v23, %v728_v48  ;;  %v744_v29 = vshrl.u32 %v8116_v52, 16  ;;  %v546_v56 = vrot.slane %v545_v37, 4  ;;  %v555_v58 = vor.u32 %v554_v42, %v550_v3  ;;  %v8145_v55 = vld [vmem:[%s7837_s16 + $0x5c] sm:$0x1]  ;;  %v8150_v48 = vld [vmem:[%s7837_s16 + $0xb4] sm:$0xf] }
  0x4a   : > { %7191 = vmatprep.subr.bf16.mxu1 %v8113_v47  ;;  %7239 = vmatprep.subr.bf16.mxu0 %v8121_v1  ;;  %v6186_v2 = vcombine.low %v719_v46, %v729_v33  ;;  %v742_v63 = vrot.slane %v740_v45, 5  ;;  %v737_v41 = vor.u32 %v736_v50, %v733_v49  ;;  %v750_v11 = vshll.u32 %v8126_v12, 16  ;;  %10871 = vst [vmem:[#allocation4_spill] sm:$0xff] %v8150_v48  ;;  %v8157_v37 = vld [vmem:[%s7837_s16 + $0xb8] sm:$0xf] }
  0x4b   : > { %v746_v10 = vrot.slane %v744_v29, 4  ;;  %v563_v21 = vshrl.u32 %v8129_v15, 16  ;;  %v551_v23 = vsel %vm7868_vm2, %v546_v56, %v550_v3  ;;  %v556_v24 = vrot.slane %v555_v58, 4  ;;  %10872 = vst [vmem:[#allocation5_spill] sm:$0xff] %v8157_v37  ;;  %v8163_v3 = vld [vmem:[%s7837_s16 + $0xbc] sm:$0x1] }
  0x4c   : > { %7088 = vmatmul.mubr.bf16.gmra.mxu1 %v6186_v2  ;;  %v566_v46 = vshll.u32 %v8129_v15, 16  ;;  %v572_v35 = vshll.u32 %v8136_v34, 16  ;;  %v738_v42 = vrot.slane %v737_v41, 4  ;;  %v752_v33 = vrot.slane %v750_v11, 5  ;;  %10873 = vst [vmem:[#allocation6_spill] sm:$0xff] %v8163_v3 }
  0x4d   : > { %v747_v45 = vor.u32 %v746_v10, %v742_v63  ;;  %v565_v49 = vrot.slane %v563_v21, 4  ;;  %v561_v50 = vsel %vm7868_vm2, %v556_v24, %v560_v43  ;;  %v576_v62 = vshrl.u32 %v8136_v34, 16  ;;  %v1373_v10 = vld [vmem:[%s7837_s16] sm:$0xe] }
  0x4e   : > { %v568_v29 = vrot.slane %v566_v46, 5  ;;  %v574_v2 = vrot.slane %v572_v35, 5  ;;  %v6179_v56 = vcombine.low %v551_v23, %v561_v50  ;;  %v743_v58 = vsel %vm7868_vm2, %v738_v42, %v742_v63 }
  0x4f   : > { %v748_v20 = vrot.slane %v747_v45, 4  ;;  %v582_v41 = vshll.u32 %v8145_v55, 16  ;;  %v578_v21 = vrot.slane %v576_v62, 4  ;;  %v755_v12 = vshrl.u32 %v8150_v48, 16 }
  0x50   : > { %v569_v11 = vor.u32 %v568_v29, %v565_v49  ;;  %v758_v43 = vshll.u32 %v8150_v48, 16  ;;  %7075 = vmatprep.mubr.bf16.mxu0 %v6179_v56  ;;  %v764_v46 = vshll.u32 %v8157_v37, 16  ;;  %v768_v63 = vshrl.u32 %v8157_v37, 16  ;;  %v1374_v49 = vld [vmem:[%s7837_s16 + $0xc] sm:$0xe] }
  0x51   : > { %v753_v24 = vsel %vm7868_vm2, %v748_v20, %v752_v33  ;;  %v584_v23 = vrot.slane %v582_v41, 5  ;;  %v579_v45 = vor.u32 %v578_v21, %v574_v2  ;;  %v757_v50 = vrot.slane %v755_v12, 4  ;;  %v1375_v20 = vld [vmem:[%s7837_s16 + $0x18] sm:$0xe] }
  0x52   : > { %v6187_v35 = vcombine.low %v743_v58, %v753_v24  ;;  %v570_v42 = vrot.slane %v569_v11, 4  ;;  %v760_v62 = vrot.slane %v758_v43, 5  ;;  %v766_v29 = vrot.slane %v764_v46, 5 }
  0x53   : > { %v770_v38 = vrot.slane %v768_v63, 4  ;;  %v774_v48 = vshll.u32 %v8163_v3, 16  ;;  %v580_v58 = vrot.slane %v579_v45, 4  ;;  %v6221_v41 = vrot.slane %v1373_v10, 9 }
  0x54   : > { %7091 = vmatprep.mubr.bf16.mxu1 %v6187_v35  ;;  %v575_v33 = vsel %vm7868_vm2, %v570_v42, %v574_v2  ;;  %v1426_v12 = vrot.slane %v7846_v5, 5  ;;  %v761_v11 = vor.u32 %v760_v62, %v757_v50  ;;  %v6222_v24 = vrot.slane %v1374_v49, 9 }
  0x55   : > { %v771_v21 = vor.u32 %v770_v38, %v766_v29  ;;  %v776_v43 = vrot.slane %v774_v48, 5  ;;  %v585_v46 = vsel %vm7868_vm2, %v580_v58, %v584_v23  ;;  %v1433_v35 = vrot.slane %v7873_v32, 5 }
  0x56   : > { %v1427_v63 = vsel %vm8179_vm5, %v6221_v41, %v1426_v12  ;;  %v1428_v3 = vrot.slane %v1426_v12, 4  ;;  %v6180_v37 = vcombine.low %v575_v33, %v585_v46  ;;  %v762_v2 = vrot.slane %v761_v11, 4  ;;  %v1377_v12 = vld [vmem:[%s7837_s16 + $0x30] sm:$0xe]  ;;  %v1379_v46 = vld [vmem:[%s7837_s16 + $0x48] sm:$0xe] }
  0x57   : > { %v772_v42 = vrot.slane %v771_v21, 4  ;;  %v6197_v10 = vcombine.low %v7843_v4, %v7846_v5  ;;  %v10876_v38 = vrot.slane %v7849_v6, 5  ;;  %v1435_v45 = vrot.slane %v1433_v35, 4 }
  0x58   : > { %v6223_v23 = vrot.slane %v1375_v20, 9  ;;  %7076 = vmatmul.mubr.bf16.gmra.mxu0 %v6180_v37  ;;  %v767_v50 = vsel %vm7868_vm2, %v762_v2, %v766_v29  ;;  %v1440_v33 = vrot.slane %v7910_v19, 5  ;;  %v1434_v4 = vsel %vm8179_vm5, %v6222_v24, %v1433_v35  ;;  %v1378_v24 = vld [vmem:[%s7837_s16 + $0x3c] sm:$0xe] }
  0x59   : > { %v1430_v48 = vsel %vm8179_vm5, %v1428_v3, %v10876_v38  ;;  %v777_v49 = vsel %vm7868_vm2, %v772_v42, %v776_v43  ;;  %v10877_v5 = vrot.slane %v7879_v40, 5  ;;  %v1443_v37 = vrot.slane %v7915_v25, 5  ;;  %v1376_v3 = vld [vmem:[%s7837_s16 + $0x24] sm:$0xe]  ;;  %v7631_v25 = vld [vmem:[%s10831_s1 + $0x130] sm:$0xff]  }
  0x5a   : > { %v6253_v62 = vcombine.low %v1427_v63, %v1430_v48  ;;  %v6188_v58 = vcombine.low %v767_v50, %v777_v49  ;;  %v1441_v29 = vsel %vm8179_vm5, %v6223_v23, %v1440_v33  ;;  %v1442_v20 = vrot.slane %v1440_v33, 4  ;;  %v7630_v23 = vld [vmem:[%s10831_s1 + $0xf0] sm:$0xff]  }
  0x5b   : > { %v1437_v6 = vsel %vm8179_vm5, %v1435_v45, %v10877_v5  ;;  %v1447_v41 = vrot.slane %v7951_v0, 5  ;;  %v6224_v21 = vrot.slane %v1376_v3, 9  ;;  %v1454_v43 = vrot.slane %v7998_v60, 5  ;;  %v8254_v3 = vld [vmem:[%s7837_s16 + $0x68] sm:$0x1] }
  0x5c   : > { %7159 = vmatprep.mubr.bf16.mxu0 %v6253_v62  ;;  %7092 = vmatmul.mubr.bf16.gmra.mxu1 %v6188_v58  ;;  %v6254_v11 = vcombine.low %v1434_v4, %v1437_v6  ;;  %v1444_v40 = vsel %vm8179_vm5, %v1442_v20, %v1443_v37  ;;  %v1450_v2 = vrot.slane %v7954_v8, 5  ;;  %v6225_v42 = vrot.slane %v1377_v12, 9  ;;  %v1380_v37 = vld [vmem:[%s7837_s16 + $0x54] sm:$0xe]  ;;  %v8278_v12 = vld [vmem:[%s7837_s16 + $0x60] sm:$0xe] }
  0x5d   : > { %7111 = vmatprep.mubr.bf16.mxu1 %v6197_v10  ;;  %v6255_v63 = vcombine.low %v1441_v29, %v1444_v40  ;;  %v1449_v35 = vrot.slane %v1447_v41, 4  ;;  %v1456_v38 = vrot.slane %v1454_v43, 4  ;;  %v1457_v10 = vrot.slane %v8006_v16, 5 }
  0x5e   : > { %v1461_v48 = vrot.slane %v8042_v54, 5  ;;  %v6199_v45 = vcombine.low %v7902_v14, %v7910_v19  ;;  %v1468_v50 = vrot.slane %v8091_v17, 5  ;;  %v6226_v49 = vrot.slane %v1378_v24, 9  ;;  %v7639_v24 = vld [vmem:[%s10831_s1 + $0x120] sm:$0xff]  }
  0x5f   : > { %v1464_v8 = vrot.slane %v8049_v7, 5  ;;  %v6227_v33 = vrot.slane %v1379_v46, 9  ;;  %v1448_v14 = vsel %vm8179_vm5, %v6224_v21, %v1447_v41  ;;  %v1451_v19 = vsel %vm8179_vm5, %v1449_v35, %v1450_v2  ;;  %v8290_v46 = vld [vmem:[%s7837_s16 + $0x78] sm:$0xe]  ;;  %v7638_v2 = vld [vmem:[%s10831_s1 + $0xe0] sm:$0xff]  }
  0x60   : > { %7160 = vmatmul.mubr.bf16.vlgmr.msra.gmra.mxu0 %v6254_v11  ;;  %v1463_v62 = vrot.slane %v1461_v48, 4  ;;  %v1470_v16 = vrot.slane %v1468_v50, 4  ;;  %v1471_v58 = vrot.slane %v8100_v30, 5  ;;  %v1455_v4 = vsel %vm8179_vm5, %v6225_v42, %v1454_v43  ;;  %v8281_v11 = vld [vmem:[%s7837_s16 + $0x6c] sm:$0xe] }
  0x61   : > { %7240 = vmatpush3.bf16.msra.mxu0 %v8121_v1  ;;  %7163 = vmatprep.mubr.bf16.mxu0 %v6255_v63  ;;  %v1458_v7 = vsel %vm8179_vm5, %v1456_v38, %v1457_v10  ;;  %v7635_v1 = vld [vmem:[%s10831_s1 + $0x128] sm:$0xff]   ;;  %v1475_v5 = vrot.slane %v8136_v34, 5  ;;  %v10878_v6 = vcombine.low %v7864_v26, %v7873_v32  ;;  %v6200_v30 = vcombine.low %v7942_v57, %v7951_v0  ;;  %v1384_v63 = vld [vmem:[%s7837_s16 + $0x84] sm:$0xe]  ;;  %v1385_v42 = vld [vmem:[%s7837_s16 + $0x90] sm:$0xe] }
  0x62   : > { %7241 = vmatprep.subr.bf16.mxu0 %v7631_v25  ;;  %v1485_v29 = vrot.slane %v8254_v3, 5  ;;  %v6256_v20 = vcombine.low %v1448_v14, %v1451_v19  ;;  %v8260_v41 = vsel %vm8179_vm5, %v6226_v49, %v1461_v48  ;;  %v8264_v26 = vsel %vm8179_vm5, %v1463_v62, %v1464_v8  ;;  %v7634_v32 = vld [vmem:[%s10831_s1 + $0xe8] sm:$0xff]   ;;  %v8309_v48 = vld [vmem:[%s7837_s16 + $0x64] sm:$0xf]  ;;  %v1386_v49 = vld [vmem:[%s7837_s16 + $0x9c] sm:$0xe] }
  0x63   : > { %v6257_v57 = vcombine.low %v1455_v4, %v1458_v7  ;;  %v8271_v0 = vsel %vm8179_vm5, %v6227_v33, %v1468_v50  ;;  %v6201_v40 = vcombine.low %v7989_v53, %v7998_v60  ;;  %v6228_v21 = vrot.slane %v1380_v37, 9  ;;  %v8331_v4 = vld [vmem:[%s7837_s16 + $0x74] sm:$0x1] }
  0x64   : > { %7112 = vmatmul.mubr.bf16.vlgmr.msra.gmra.mxu1 %v10878_v6  ;;  %v1478_v43 = vrot.slane %v8145_v55, 5  ;;  %v6202_v35 = vcombine.low %v8039_v51, %v8042_v54  ;;  %v6258_v53 = vcombine.low %v8260_v41, %v8264_v26  ;;  %v6203_v60 = vcombine.low %v8082_v59, %v8091_v17  ;;  %v7756_v54 = vld [vmem:[%s7837_s16 + $0x80] sm:$0x1] }
  0x65   : > { %7192 = vmatpush3.bf16.msra.mxu1 %v8113_v47  ;;  %7115 = vmatprep.mubr.bf16.mxu1 %v6199_v45  ;;  %v8275_v47 = vsel %vm8179_vm5, %v1470_v16, %v1471_v58  ;;  %v6204_v55 = vcombine.low %v8129_v15, %v8136_v34  ;;  %v6229_v10 = vrot.slane %v8278_v12, 9  ;;  %v1482_v45 = vrot.slane %v8309_v48, 5  ;;  %v8327_v16 = vld [vmem:[%s7837_s16 + $0x70] sm:$0xf]  ;;  %v7757_v17 = vld [vmem:[%s7837_s16 + $0x60] sm:$0xf] }
  0x66   : > { %7193 = vmatprep.subr.bf16.mxu1 %v7630_v23  ;;  %7242 = vmatpush3.bf16.msra.mxu0 %v7631_v25  ;;  %v1477_v25 = vrot.slane %v1475_v5, 4  ;;  %v6259_v38 = vcombine.low %v8271_v0, %v8275_v47  ;;  %v6230_v62 = vrot.slane %v8281_v11, 9  ;;  %v1503_v8 = vrot.slane %v7965_v22, 5  ;;  %v1387_v0 = vld [vmem:[%s7837_s16 + $0xa8] sm:$0xe]  ;;  %v8511_v15 = vld [vmem:[%s10831_s1 + $0x1b8] sm:$0xff]  }
  0x67   : > { %7243 = vmatprep.subr.bf16.mxu0 %v7635_v1  ;;  %v1506_v33 = vrot.slane %v7974_v36, 5  ;;  %v8320_v14 = vsel %vm8179_vm5, %v6228_v21, %v1475_v5  ;;  %v1489_v58 = vrot.slane %v8327_v16, 5  ;;  %v1492_v7 = vrot.slane %v8331_v4, 5  ;;  %v7642_v36 = vld [vmem:[%s10831_s1 + $0xd8] sm:$0xff]  }
  0x68   : > { %7164 = vmatmul.mubr.bf16.gmra.mxu0 %v6256_v20  ;;  %v8324_v19 = vsel %vm8179_vm5, %v1477_v25, %v1478_v43  ;;  %v6231_v5 = vrot.slane %v8290_v46, 9  ;;  %v1505_v37 = vrot.slane %v1503_v8, 4  ;;  %v6233_v41 = vrot.slane %v1385_v42, 9  ;;  %v6349_v42 = vld [vmem:[%s7837_s16 + $0xc] sm:$0xf] }
  0x69   : > { %7194 = vmatpush3.bf16.msra.mxu1 %v7630_v23  ;;  %7167 = vmatprep.mubr.bf16.mxu0 %v6257_v57  ;;  %v6232_v23 = vrot.slane %v1384_v63, 9  ;;  %v1510_v26 = vrot.slane %v8016_v31, 5  ;;  %v1513_v57 = vrot.slane %v8026_v44, 5  ;;  %v1496_v47 = vrot.slane %v7924_v39, 5 }
  0x6a   : > { %7195 = vmatprep.subr.bf16.mxu1 %v7634_v32  ;;  %7244 = vmatpush3.bf16.msra.mxu0 %v7635_v1  ;;  %v7643_v1 = vld [vmem:[%s10831_s1 + $0x118] sm:$0xff]   ;;  %v8355_v21 = vsel %vm8179_vm5, %v1505_v37, %v1506_v33  ;;  %v1517_v63 = vrot.slane %v8061_v28, 5  ;;  %v6235_v33 = vrot.slane %v1387_v0, 9  ;;  %v1524_v37 = vrot.slane %v8116_v52, 5  ;;  %v7646_v0 = vld [vmem:[%s10831_s1 + $0xd0] sm:$0xff]  }
  0x6b   : > { %7245 = vmatprep.subr.bf16.mxu0 %v7639_v24  ;;  %v8343_v6 = vsel %vm8179_vm5, %v6232_v23, %v1503_v8  ;;  %v8363_v44 = vsel %vm8179_vm5, %v6233_v41, %v1510_v26  ;;  %v1512_v43 = vrot.slane %v1510_v26, 4  ;;  %v7647_v23 = vld [vmem:[%s10831_s1 + $0x110] sm:$0xff]   ;;  %v1520_v8 = vrot.slane %v8077_v61, 5  ;;  %v10880_v61 = vld [vmem:[#allocation3_spill] sm:$0xff] }
  0x6c   : > { %7116 = vmatmul.mubr.bf16.gmra.mxu1 %v6200_v30  ;;  %v1484_v30 = vrot.slane %v1482_v45, 4  ;;  %v1519_v20 = vrot.slane %v1517_v63, 4  ;;  %v1527_v50 = vrot.slane %v10880_v61, 5  ;;  %v1483_v61 = vsel %vm8179_vm5, %v6229_v10, %v1482_v45  ;;  %v6352_v45 = vld [vmem:[%s7837_s16 + $0x18] sm:$0xf] }
  0x6d   : > { %7119 = vmatprep.mubr.bf16.mxu1 %v6201_v40  ;;  %7196 = vmatpush3.bf16.msra.mxu1 %v7634_v32  ;;  %v6234_v40 = vrot.slane %v1386_v49, 9  ;;  %v8375_v32 = vld [vmem:[%s7837_s16 + $0x10] sm:$0xf]  ;;  %v8379_v41 = vsel %vm8179_vm5, %v1512_v43, %v1513_v57  ;;  %v1526_v57 = vrot.slane %v1524_v37, 4  ;;  %v2294_v12 = vshrl.u32 %v6349_v42, 16 }
  0x6e   : > { %7197 = vmatprep.subr.bf16.mxu1 %v7638_v2  ;;  %7246 = vmatpush3.bf16.msra.mxu0 %v7639_v24  ;;  %v10879_v24 = vld [vmem:[#allocation2_spill] sm:$0xff]  ;;  %v10882_v43 = vld [vmem:[#allocation4_spill] sm:$0xff]  ;;  %v2297_v10 = vshll.u32 %v6349_v42, 16  ;;  %v1491_v51 = vrot.slane %v1489_v58, 4  ;;  %v2303_v59 = vshll.u32 %v8375_v32, 16  ;;  %v1497_v4 = vsel %vm8179_vm5, %v6231_v5, %v1496_v47 }
  0x6f   : > { %7247 = vmatprep.subr.bf16.mxu0 %v7643_v1  ;;  %v8383_v26 = vsel %vm8179_vm5, %v6234_v40, %v1517_v63  ;;  %v10881_v40 = vld [vmem:[#allocation5_spill] sm:$0xff]  ;;  %v8449_v42 = vld [vmem:[%s7837_s16 + $0x14] sm:$0x1]  ;;  %v2296_v63 = vrot.slane %v2294_v12, 4  ;;  %v10884_v5 = vld [vmem:[#allocation6_spill] sm:$0xff] }
  0x70   : > { %7168 = vmatmul.mubr.bf16.gmra.mxu0 %v6258_v53  ;;  %v2299_v49 = vrot.slane %v2297_v10, 5  ;;  %v6355_v53 = vld [vmem:[%s7837_s16 + $0x24] sm:$0xf]  ;;  %v1493_v11 = vsel %vm8179_vm5, %v1491_v51, %v1492_v7 }
  0x71   : > { %7198 = vmatpush3.bf16.msra.mxu1 %v7638_v2  ;;  %7171 = vmatprep.mubr.bf16.mxu0 %v6259_v38  ;;  %v8393_v2 = vsel %vm8179_vm5, %v6235_v33, %v1524_v37  ;;  %v6260_v38 = vcombine.low %v8320_v14, %v8324_v19  ;;  %v1486_v33 = vsel %vm8179_vm5, %v1484_v30, %v1485_v29  ;;  %v7651_v14 = vld [vmem:[%s10831_s1 + $0x108] sm:$0xff]   ;;  %v7655_v30 = vld [vmem:[%s10831_s1 + $0x100] sm:$0xff]   ;;  %v8468_v19 = vrot.slane %v2303_v59, 5 }
  0x72   : > { %7199 = vmatprep.subr.bf16.mxu1 %v7642_v36  ;;  %7248 = vmatpush3.bf16.msra.mxu0 %v7643_v1  ;;  %v8411_v37 = vsel %vm8179_vm5, %v1519_v20, %v1520_v8  ;;  %v8423_v29 = vsel %vm8179_vm5, %v1526_v57, %v1527_v50  ;;  %v7650_v50 = vld [vmem:[%s10831_s1 + $0xc8] sm:$0xff]   ;;  %v8438_v1 = vld [vmem:[%s7837_s16 + $0xb4] sm:$0xe]  ;;  %v6261_v20 = vcombine.low %v1483_v61, %v1486_v33  ;;  %v2307_v8 = vshrl.u32 %v8375_v32, 16  ;;  %v8466_v61 = vld [vmem:[%s7837_s16 + $0x1c] sm:$0xf] }
  0x73   : > { %7249 = vmatprep.subr.bf16.mxu0 %v7647_v23  ;;  %v8453_v57 = vld [vmem:[%s7837_s16 + $0x6c] sm:$0xf]  ;;  %v2318_v33 = vshrl.u32 %v6352_v45, 16  ;;  %v2327_v51 = vshll.u32 %v8466_v61, 16  ;;  %v2331_v39 = vshrl.u32 %v8466_v61, 16  ;;  %v2342_v59 = vshrl.u32 %v6355_v53, 16 }
  0x74   : > { %7120 = vmatmul.mubr.bf16.gmra.mxu1 %v6202_v35  ;;  %v1499_v35 = vrot.slane %v7756_v54, 5  ;;  %v6206_v54 = vcombine.low %v8453_v57, %v8327_v16  ;;  %v2309_v3 = vrot.slane %v2307_v8, 4  ;;  %v2345_v46 = vshll.u32 %v6355_v53, 16  ;;  %v7760_v8 = vld [vmem:[%s7837_s16 + $0x7c] sm:$0xf] }
  0x75   : > { %7123 = vmatprep.mubr.bf16.mxu1 %v6203_v60  ;;  %7200 = vmatpush3.bf16.msra.mxu1 %v7642_v36  ;;  %v6205_v60 = vcombine.low %v7757_v17, %v8309_v48  ;;  %v1498_v36 = vrot.slane %v1496_v47, 4  ;;  %v8463_v48 = vsel %vm8179_vm5, %v6230_v62, %v1489_v58  ;;  %v2321_v17 = vshll.u32 %v6352_v45, 16  ;;  %v7654_v58 = vld [vmem:[%s10831_s1 + $0xc0] sm:$0xff]   ;;  %v8493_v45 = vld [vmem:[%s7837_s16 + $0x28] sm:$0xf] }
  0x76   : > { %7201 = vmatprep.subr.bf16.mxu1 %v7646_v0  ;;  %7250 = vmatpush3.bf16.msra.mxu0 %v7647_v23  ;;  %v10848_v62 = vrot.slane %v10881_v40, 5  ;;  %v8480_v23 = vld [vmem:[%s7837_s16 + $0x20] sm:$0x1]  ;;  %v2320_v12 = vrot.slane %v2318_v33, 4  ;;  %10883 = vst [vmem:[#allocation2_spill] sm:$0xff] %v8493_v45  ;;  %v6262_v34 = vcombine.low %v8463_v48, %v1493_v11  ;;  %v2351_v53 = vshll.u32 %v8493_v45, 16 }
  0x77   : > { %7251 = vmatprep.subr.bf16.mxu0 %v7651_v14  ;;  %v2323_v10 = vrot.slane %v2321_v17, 5  ;;  %v1500_v7 = vsel %vm8179_vm5, %v1498_v36, %v1499_v35  ;;  %v2300_v35 = vor.u32 %v2299_v49, %v2296_v63  ;;  %v8506_v36 = vld [vmem:[%s10831_s1 + $0x178] sm:$0xff]   ;;  %v6358_v63 = vld [vmem:[%s7837_s16 + $0x30] sm:$0xf]  ;;  %v8527_v48 = vld [vmem:[%s7837_s16 + $0x34] sm:$0xf] }
  0x78   : > { %7172 = vmatmul.mubr.bf16.gmra.mxu0 %v6260_v38  ;;  %v2313_v38 = vshll.u32 %v8449_v42, 16  ;;  %v6263_v17 = vcombine.low %v1497_v4, %v1500_v7  ;;  %10886 = vst [vmem:[#allocation5_spill] sm:$0xff] %v8527_v48  ;;  %v8529_v11 = vrot.slane %v2327_v51, 5  ;;  %v2347_v47 = vrot.slane %v2345_v46, 5  ;;  %v8548_v46 = vld [vmem:[%s7837_s16 + $0x40] sm:$0xf] }
  0x79   : > { %7202 = vmatpush3.bf16.msra.mxu1 %v7646_v0  ;;  %7175 = vmatprep.mubr.bf16.mxu0 %v6261_v20  ;;  %v2310_v20 = vor.u32 %v2309_v3, %v8468_v19  ;;  %v2324_v49 = vor.u32 %v2323_v10, %v2320_v12  ;;  %v7759_v3 = vld [vmem:[%s7837_s16 + $0x78] sm:$0xf]  ;;  %v2333_v12 = vrot.slane %v2331_v39, 4  ;;  %v2344_v10 = vrot.slane %v2342_v59, 4  ;;  %10887 = vst [vmem:[#allocation4_spill] sm:$0xff] %v8548_v46 }
  0x7a   : > { %7203 = vmatprep.subr.bf16.mxu1 %v7650_v50  ;;  %7252 = vmatpush3.bf16.msra.mxu0 %v7651_v14  ;;  %v2337_v14 = vshll.u32 %v8480_v23, 16  ;;  %v6207_v33 = vcombine.low %v7759_v3, %v7760_v8  ;;  %v8520_v25 = vrot.slane %v2313_v38, 5  ;;  %v8532_v0 = vld [vmem:[%s7837_s16 + $0x38] sm:$0x1]  ;;  %v8534_v4 = vrot.slane %v2300_v35, 4 }
  0x7b   : > { %7253 = vmatprep.subr.bf16.mxu0 %v7655_v30  ;;  %v8536_v7 = vrot.slane %v2310_v20, 4  ;;  %v2366_v3 = vshrl.u32 %v6358_v63, 16  ;;  %v6361_v8 = vld [vmem:[%s7837_s16 + $0x3c] sm:$0xf]  ;;  %v8544_v51 = vrot.slane %v2351_v53, 5  ;;  %v2369_v39 = vshll.u32 %v6358_v63, 16 }
  0x7c   : > { %7124 = vmatmul.mubr.bf16.gmra.mxu1 %v6204_v55  ;;  %v1533_v55 = vrot.slane %v10848_v62, 4  ;;  %v8538_v38 = vrot.slane %v2337_v14, 5  ;;  %v2375_v59 = vshll.u32 %v8527_v48, 16  ;;  %v2379_v20 = vshrl.u32 %v8527_v48, 16 }
  0x7d   : > { %7127 = vmatprep.mubr.bf16.mxu1 %v6205_v60  ;;  %7204 = vmatpush3.bf16.msra.mxu1 %v7650_v50  ;;  %v8523_v60 = vld [vmem:[%s7837_s16 + $0x2c] sm:$0x1]  ;;  %v2355_v50 = vshrl.u32 %v8493_v45, 16  ;;  %v2334_v14 = vor.u32 %v2333_v12, %v8529_v11  ;;  %v2368_v53 = vrot.slane %v2366_v3, 4  ;;  %v2371_v63 = vrot.slane %v2369_v39, 5 }
  0x7e   : > { %7205 = vmatprep.subr.bf16.mxu1 %v7654_v58  ;;  %10885 = vst [vmem:[#allocation3_spill] sm:$0xff] %v8523_v60  ;;  %7254 = vmatpush3.bf16.msra.mxu0 %v7655_v30  ;;  %v8542_v30 = vrot.slane %v2324_v49, 4  ;;  %v2390_v49 = vshrl.u32 %v6361_v8, 16  ;;  %v2393_v62 = vshll.u32 %v6361_v8, 16  ;;  %v2381_v48 = vrot.slane %v2379_v20, 4 }
  0x7f   : > { %7335 = vmatprep.subr.bf16.mxu0 %v8511_v15  ;;  %v2357_v35 = vrot.slane %v2355_v50, 4  ;;  %v8558_v50 = vrot.slane %v2375_v59, 5  ;;  %v8561_v45 = vld [vmem:[%s7837_s16 + $0x44] sm:$0x1]  ;;  %v2403_v12 = vshrl.u32 %v8548_v46, 16  ;;  %v10888_v16 = vrot.slane %v10881_v40, 5 }
  0x80   : > { %7176 = vmatmul.mubr.bf16.gmra.mxu0 %v6262_v34  ;;  %v2361_v34 = vshll.u32 %v8523_v60, 16  ;;  %v10889_v57 = vrot.slane %v8438_v1, 9  ;;  %v8582_v39 = vld [vmem:[%s7837_s16 + $0x4c] sm:$0xf]  ;;  %v2392_v59 = vrot.slane %v2390_v49, 4  ;;  %v2395_v20 = vrot.slane %v2393_v62, 5 }
  0x81   : > { %7206 = vmatpush3.bf16.msra.mxu1 %v7654_v58  ;;  %7179 = vmatprep.mubr.bf16.mxu0 %v6263_v17  ;;  %v2348_v58 = vor.u32 %v2347_v47, %v2344_v10  ;;  %v2385_v17 = vshll.u32 %v8532_v0, 16  ;;  %v2399_v47 = vshll.u32 %v8548_v46, 16  ;;  %v6364_v10 = vld [vmem:[%s7837_s16 + $0x48] sm:$0xf]  ;;  %v2358_v8 = vor.u32 %v2357_v35, %v8544_v51 }
  0x82   : > { %7287 = vmatprep.subr.bf16.mxu1 %v8506_v36  ;;  %v2405_v1 = vrot.slane %v2403_v12, 4  ;;  %v8586_v46 = vrot.slane %v2334_v14, 4  ;;  %v2306_v62 = vsel %vm7868_vm2, %v8534_v4, %v8468_v19  ;;  %v2316_v35 = vsel %vm7868_vm2, %v8536_v7, %v8520_v25  ;;  %v6367_v4 = vld [vmem:[%s7837_s16 + $0x54] sm:$0xf] }
  0x83   : > { %v8584_v60 = vrot.slane %v2399_v47, 5  ;;  %v2417_v14 = vshll.u32 %v6364_v10, 16  ;;  %v2409_v49 = vshll.u32 %v8561_v45, 16  ;;  %v2427_v19 = vshrl.u32 %v8582_v39, 16 }
  0x84   : > { %7128 = vmatmul.mubr.bf16.gmra.mxu1 %v6206_v54  ;;  %v8572_v54 = vsel %vm8179_vm5, %v10889_v57, %v10888_v16  ;;  %v8588_v16 = vrot.slane %v2348_v58, 4  ;;  %v8590_v57 = vrot.slane %v2361_v34, 5  ;;  %v2423_v58 = vshll.u32 %v8582_v39, 16 }
  0x85   : > { %7131 = vmatprep.mubr.bf16.mxu1 %v6207_v33  ;;  %v10890_v33 = vrot.slane %v10884_v5, 5  ;;  %v2414_v5 = vshrl.u32 %v6364_v10, 16  ;;  %v10892_v34 = vcombine.low %v8363_v44, %v8379_v41  ;;  %v8611_v47 = vrot.slane %v2358_v8, 4  ;;  %v8617_v10 = vld [vmem:[%s7837_s16 + $0x58] sm:$0xf] }
  0x86   : > { %v8613_v12 = vrot.slane %v2385_v17, 5  ;;  %v2396_v25 = vor.u32 %v2395_v20, %v2392_v59  ;;  %v2406_v7 = vor.u32 %v2405_v1, %v8584_v60  ;;  %v10893_v44 = vcombine.low %v7958_v13, %v7965_v22  ;;  %v8623_v41 = vld [vmem:[%s7837_s16 + $0x50] sm:$0x1] }
  0x87   : > { %v8578_v3 = vsel %vm8179_vm5, %v1533_v55, %v10890_v33  ;;  %v10891_v55 = vcombine.low %v8343_v6, %v8355_v21  ;;  %v2372_v6 = vor.u32 %v2371_v63, %v2368_v53  ;;  %v2382_v21 = vor.u32 %v2381_v48, %v8558_v50 }
  0x88   : > { %v2416_v48 = vrot.slane %v2414_v5, 4  ;;  %v2419_v53 = vrot.slane %v2417_v14, 5  ;;  %v8625_v63 = vrot.slane %v2423_v58, 5  ;;  %v2429_v17 = vrot.slane %v2427_v19, 4  ;;  %v6370_v5 = vld [vmem:[%s7837_s16 + $0x60] sm:$0xf] }
  0x89   : > { %7180 = vmatmul.mubr.bf16.gmra.mxu0 %v10891_v55  ;;  %v10894_v33 = vcombine.low %v8010_v18, %v8016_v31  ;;  %v2438_v8 = vshrl.u32 %v6367_v4, 16  ;;  %v2441_v59 = vshll.u32 %v6367_v4, 16  ;;  %v8630_v20 = vrot.slane %v2372_v6, 4  ;;  %v8647_v31 = vld [vmem:[%s7837_s16 + $0x64] sm:$0xf] }
  0x8a   : > { %7183 = vmatprep.mubr.bf16.mxu0 %v10892_v34  ;;  %v8632_v1 = vrot.slane %v2382_v21, 4  ;;  %v8634_v13 = vrot.slane %v2409_v49, 5  ;;  %v2447_v22 = vshll.u32 %v8617_v10, 16  ;;  %v6268_v55 = vcombine.low %v8572_v54, %v8578_v3  ;;  %v8643_v34 = vld [vmem:[%s7837_s16 + $0x5c] sm:$0x1] }
  0x8b   : > { %v6413_v14 = vcombine.low %v2306_v62, %v2316_v35  ;;  %v8640_v58 = vrot.slane %v2396_v25, 4  ;;  %v2451_v18 = vshrl.u32 %v8617_v10, 16  ;;  %v8649_v6 = vrot.slane %v2406_v7, 4 }
  0x8c   : > { %7132 = vmatmul.mubr.bf16.gmra.mxu1 %v10893_v44  ;;  %v2433_v21 = vshll.u32 %v8623_v41, 16  ;;  %v2462_v49 = vshrl.u32 %v6370_v5, 16  ;;  %v2465_v19 = vshll.u32 %v6370_v5, 16  ;;  %v10895_v4 = vcombine.low %v8383_v26, %v8411_v37 }
  0x8d   : > { %7135 = vmatprep.mubr.bf16.mxu1 %v10894_v33  ;;  %v2420_v54 = vor.u32 %v2419_v53, %v2416_v48  ;;  %v2430_v3 = vor.u32 %v2429_v17, %v8625_v63  ;;  %v2440_v62 = vrot.slane %v2438_v8, 4  ;;  %v2443_v35 = vrot.slane %v2441_v59, 5  ;;  %v8687_v8 = vld [vmem:[%s7837_s16 + $0x70] sm:$0xf] }
  0x8e   : > { %v10896_v25 = vcombine.low %v8393_v2, %v8423_v29  ;;  %v8659_v7 = vrot.slane %v2447_v22, 5  ;;  %v2453_v44 = vrot.slane %v2451_v18, 4  ;;  %v2457_v33 = vshll.u32 %v8643_v34, 16 }
  0x8f   : > { %v2471_v26 = vshll.u32 %v8647_v31, 16  ;;  %v2330_v37 = vsel %vm7868_vm2, %v8542_v30, %v8529_v11  ;;  %v2340_v2 = vsel %vm7868_vm2, %v8586_v46, %v8538_v38  ;;  %v2464_v29 = vrot.slane %v2462_v49, 4  ;;  %v6373_v46 = vld [vmem:[%s7837_s16 + $0x6c] sm:$0xf] }
  0x90   : > { %v2467_v48 = vrot.slane %v2465_v19, 5  ;;  %v10897_v53 = vcombine.low %v8052_v9, %v8061_v28  ;;  %v2354_v17 = vsel %vm7868_vm2, %v8588_v16, %v8544_v51  ;;  %v2364_v11 = vsel %vm7868_vm2, %v8611_v47, %v8590_v57  ;;  %v8695_v16 = vld [vmem:[%s7837_s16 + $0x68] sm:$0x1] }
  0x91   : > { %7184 = vmatmul.mubr.bf16.gmra.mxu0 %v10895_v4  ;;  %v8682_v30 = vrot.slane %v2433_v21, 5  ;;  %v2475_v38 = vshrl.u32 %v8647_v31, 16  ;;  %v10898_v9 = vcombine.low %v10879_v24, %v8116_v52  ;;  %v8692_v28 = vrot.slane %v2420_v54, 4  ;;  %v7656_v52 = vld [vmem:[%s7837_s16 + $0xc] sm:$0xff]  }
  0x92   : > { %7187 = vmatprep.mubr.bf16.mxu0 %v10896_v25  ;;  %v2444_v51 = vor.u32 %v2443_v35, %v2440_v62  ;;  %v2486_v59 = vshrl.u32 %v6373_v46, 16  ;;  %v2489_v57 = vshll.u32 %v6373_v46, 16  ;;  %v8697_v47 = vrot.slane %v2430_v3, 4  ;;  %v8708_v62 = vld [vmem:[%s7837_s16 + $0x74] sm:$0x1] }
  0x93   : > { %v2454_v22 = vor.u32 %v2453_v44, %v8659_v7  ;;  %v8700_v5 = vrot.slane %v2457_v33, 5  ;;  %v2495_v18 = vshll.u32 %v8687_v8, 16  ;;  %v2468_v24 = vor.u32 %v2467_v48, %v2464_v29  ;;  %v6376_v25 = vld [vmem:[%s7837_s16 + $0x78] sm:$0xf]  ;;  %v8712_v44 = vld [vmem:[%s7837_s16 + $0x7c] sm:$0xf] }
  0x94   : > { %7136 = vmatmul.mubr.bf16.gmra.mxu1 %v10897_v53  ;;  %v8704_v21 = vrot.slane %v2471_v26, 5  ;;  %v2477_v49 = vrot.slane %v2475_v38, 4  ;;  %v2499_v19 = vshrl.u32 %v8687_v8, 16  ;;  %v6414_v4 = vcombine.low %v2330_v37, %v2340_v2  ;;  %v8719_v26 = vld [vmem:[%s7837_s16 + $0x80] sm:$0x1] }
  0x95   : > { %7139 = vmatprep.mubr.bf16.mxu1 %v10898_v9  ;;  %v6415_v54 = vcombine.low %v2354_v17, %v2364_v11  ;;  %v2488_v3 = vrot.slane %v2486_v59, 4  ;;  %v2491_v35 = vrot.slane %v2489_v57, 5  ;;  %v8714_v33 = vrot.slane %v2444_v51, 4 }
  0x96   : > { %v8716_v53 = vrot.slane %v2495_v18, 5  ;;  %v2501_v29 = vrot.slane %v2499_v19, 4  ;;  %v2510_v48 = vshrl.u32 %v6376_v25, 16  ;;  %v2481_v37 = vshll.u32 %v8695_v16, 16  ;;  %v6379_v19 = vld [vmem:[%s7837_s16 + $0x84] sm:$0xf] }
  0x97   : > { %v2513_v2 = vshll.u32 %v6376_v25, 16  ;;  %v2519_v17 = vshll.u32 %v8712_v44, 16  ;;  %v2523_v11 = vshrl.u32 %v8712_v44, 16  ;;  %v8724_v38 = vrot.slane %v2454_v22, 4  ;;  %v7660_v25 = vld [vmem:[%s7837_s16 + $0x24] sm:$0xff]  }
  0x98   : > { %v8726_v46 = vrot.slane %v2468_v24, 4  ;;  %v2512_v9 = vrot.slane %v2510_v48, 4  ;;  %v10899_v51 = vcombine.low %v10882_v43, %v10881_v40  ;;  %v2378_v22 = vsel %vm7868_vm2, %v8630_v20, %v8558_v50 }
  0x99   : > { %7188 = vmatmul.mubr.bf16.gmra.mxu0 %v6268_v55  ;;  %v2478_v55 = vor.u32 %v2477_v49, %v8704_v21  ;;  %v2515_v59 = vrot.slane %v2513_v2, 5  ;;  %v8732_v57 = vrot.slane %v2519_v17, 5  ;;  %v2525_v18 = vrot.slane %v2523_v11, 4  ;;  %v8781_v17 = vld [vmem:[%s7837_s16 + $0x8c] sm:$0x1] }
  0x9a   : > { %7255 = vmatprep.mubr.bf16.mxu0 %v6413_v14  ;;  %v2492_v14 = vor.u32 %v2491_v35, %v2488_v3  ;;  %v2502_v24 = vor.u32 %v2501_v29, %v8716_v53  ;;  %v2505_v49 = vshll.u32 %v8708_v62, 16  ;;  %v2529_v40 = vshll.u32 %v8719_v26, 16  ;;  %v8755_v3 = vld [vmem:[%s7837_s16 + $0x88] sm:$0xf]  ;;  %v7657_v35 = vld [vmem:[%s7837_s16 + $0x18] sm:$0xff]  }
  0x9b   : > { %v2388_v43 = vsel %vm7868_vm2, %v8632_v1, %v8613_v12  ;;  %v2412_v50 = vsel %vm7868_vm2, %v8649_v6, %v8634_v13  ;;  %v2516_v20 = vor.u32 %v2515_v59, %v2512_v9  ;;  %v7663_v12 = vld [vmem:[%s10831_s1 + $0x1b0] sm:$0xff]   ;;  %v8762_v1 = vrot.slane %v2481_v37, 5  ;;  %v8786_v11 = vld [vmem:[%s10831_s1 + $0x1a8] sm:$0xff]  }
  0x9c   : > { %7140 = vmatmul.mubr.bf16.gmra.mxu1 %v10899_v51  ;;  %v2537_v29 = vshll.u32 %v6379_v19, 16  ;;  %v7662_v13 = vld [vmem:[%s10831_s1 + $0x170] sm:$0xff]   ;;  %v2426_v6 = vsel %vm7868_vm2, %v8692_v28, %v8625_v63  ;;  %v2436_v48 = vsel %vm7868_vm2, %v8697_v47, %v8682_v30  ;;  %v8776_v37 = vrot.slane %v2478_v55, 4 }
  0x9d   : > { %7207 = vmatprep.mubr.bf16.mxu1 %v7656_v52  ;;  %v2402_v52 = vsel %vm7868_vm2, %v8640_v58, %v8584_v60  ;;  %v2526_v60 = vor.u32 %v2525_v18, %v8732_v57  ;;  %v2534_v58 = vshrl.u32 %v6379_v19, 16  ;;  %v8778_v2 = vrot.slane %v2492_v14, 4  ;;  %v6382_v14 = vld [vmem:[%s7837_s16 + $0x90] sm:$0xf]  ;;  %v8809_v59 = vld [vmem:[%s7837_s16 + $0x94] sm:$0xf] }
  0x9e   : > { %v8788_v63 = vrot.slane %v2502_v24, 4  ;;  %v8790_v28 = vrot.slane %v2505_v49, 5  ;;  %v2543_v30 = vshll.u32 %v8755_v3, 16  ;;  %v2547_v47 = vshrl.u32 %v8755_v3, 16  ;;  %10900 = vst [vmem:[#allocation6_spill] sm:$0xff] %v8809_v59 }
  0x9f   : > { %v2460_v55 = vsel %vm7868_vm2, %v8724_v38, %v8700_v5  ;;  %v8803_v9 = vrot.slane %v2516_v20, 4  ;;  %v8805_v51 = vrot.slane %v2529_v40, 5  ;;  %v2539_v18 = vrot.slane %v2537_v29, 5  ;;  %v7666_v5 = vld [vmem:[%s10831_s1 + $0x168] sm:$0xff]  }
  0xa0   : > { %v2561_v38 = vshll.u32 %v6382_v14, 16  ;;  %v2567_v24 = vshll.u32 %v8809_v59, 16  ;;  %v2571_v49 = vshrl.u32 %v8809_v59, 16  ;;  %v6416_v40 = vcombine.low %v2378_v22, %v2388_v43 }
  0xa1   : > { %7256 = vmatmul.mubr.bf16.vlgmr.msra.gmra.mxu0 %v6414_v4  ;;  %v2450_v4 = vsel %vm7868_vm2, %v8714_v33, %v8659_v7  ;;  %v2553_v7 = vshll.u32 %v8781_v17, 16  ;;  %v2558_v33 = vshrl.u32 %v6382_v14, 16  ;;  %v6417_v20 = vcombine.low %v2402_v52, %v2412_v50 }
  0xa2   : > { %7336 = vmatpush3.bf16.msra.mxu0 %v8511_v15  ;;  %7259 = vmatprep.mubr.bf16.mxu0 %v6415_v54  ;;  %v8811_v15 = vrot.slane %v2526_v60, 4  ;;  %v2536_v54 = vrot.slane %v2534_v58, 4  ;;  %v8820_v19 = vrot.slane %v2543_v30, 5  ;;  %v7661_v60 = vld [vmem:[%s7837_s16 + $0x30] sm:$0xff]   ;;  %v7671_v58 = vld [vmem:[%s10831_s1 + $0x1a0] sm:$0xff]   ;;  %v2563_v14 = vrot.slane %v2561_v38, 5 }
  0xa3   : > { %7337 = vmatprep.subr.bf16.mxu0 %v7663_v12  ;;  %v2560_v29 = vrot.slane %v2558_v33, 4  ;;  %v2573_v22 = vrot.slane %v2571_v49, 4  ;;  %v8828_v43 = vcombine.low %v2426_v6, %v2436_v48  ;;  %v8831_v52 = vcombine.low %v2450_v4, %v2460_v55  ;;  %v6385_v30 = vld [vmem:[%s7837_s16 + $0x9c] sm:$0xf]  ;;  %v8853_v4 = vld [vmem:[%s7837_s16 + $0xa4] sm:$0x1] }
  0xa4   : > { %7208 = vmatmul.mubr.bf16.vlgmr.msra.gmra.mxu1 %v7657_v35  ;;  %v2549_v35 = vrot.slane %v2547_v47, 4  ;;  %v2540_v48 = vor.u32 %v2539_v18, %v2536_v54  ;;  %v8850_v47 = vld [vmem:[%s7837_s16 + $0xa0] sm:$0xf]  ;;  %10903 = vst [vmem:[#allocation9_spill] sm:$0xff] %v8853_v4  ;;  %v2582_v55 = vshrl.u32 %v6385_v30, 16  ;;  %v2585_v33 = vshll.u32 %v6385_v30, 16 }
  0xa5   : > { %7288 = vmatpush3.bf16.msra.mxu1 %v8506_v36  ;;  %7211 = vmatprep.mubr.bf16.mxu1 %v7660_v25  ;;  %v8826_v36 = vrot.slane %v2567_v24, 5  ;;  %v2484_v25 = vsel %vm7868_vm2, %v8776_v37, %v8762_v1  ;;  %10902 = vst [vmem:[#allocation8_spill] sm:$0xff] %v8850_v47  ;;  %v7664_v38 = vld [vmem:[%s7837_s16 + $0x3c] sm:$0xff]   ;;  %v2591_v37 = vshll.u32 %v8850_v47, 16  ;;  %v2595_v24 = vshrl.u32 %v8850_v47, 16 }
  0xa6   : > { %7289 = vmatprep.subr.bf16.mxu1 %v7662_v13  ;;  %7338 = vmatpush3.bf16.msra.mxu0 %v7663_v12  ;;  %v8842_v12 = vld [vmem:[%s7837_s16 + $0x98] sm:$0x1]  ;;  %v2550_v1 = vor.u32 %v2549_v35, %v8820_v19  ;;  %v7670_v54 = vld [vmem:[%s10831_s1 + $0x160] sm:$0xff]   ;;  %v2564_v18 = vor.u32 %v2563_v14, %v2560_v29  ;;  %v2584_v30 = vrot.slane %v2582_v55, 4  ;;  %v2587_v49 = vrot.slane %v2585_v33, 5 }
  0xa7   : > { %7339 = vmatprep.subr.bf16.mxu0 %v8786_v11  ;;  %10901 = vst [vmem:[#allocation7_spill] sm:$0xff] %v8842_v12  ;;  %v2577_v35 = vshll.u32 %v8842_v12, 16  ;;  %v2597_v6 = vrot.slane %v2595_v24, 4  ;;  %v2601_v50 = vshll.u32 %v8853_v4, 16  ;;  %v6388_v47 = vld [vmem:[%s7837_s16 + $0xa8] sm:$0xf] }
  0xa8   : > { %v7674_v29 = vld [vmem:[%s10831_s1 + $0x158] sm:$0xff]   ;;  %v8876_v14 = vrot.slane %v2540_v48, 4  ;;  %v2606_v55 = vshrl.u32 %v6388_v47, 16  ;;  %v2609_v33 = vshll.u32 %v6388_v47, 16  ;;  %v8889_v4 = vld [vmem:[%s7837_s16 + $0xb0] sm:$0x1] }
  0xa9   : > { %7260 = vmatmul.mubr.bf16.gmra.mxu0 %v6416_v40  ;;  %7290 = vmatpush3.bf16.msra.mxu1 %v7662_v13  ;;  %v7675_v13 = vld [vmem:[%s10831_s1 + $0x198] sm:$0xff]   ;;  %v2574_v40 = vor.u32 %v2573_v22, %v8826_v36  ;;  %v8878_v22 = vrot.slane %v2553_v7, 5  ;;  %v7665_v48 = vld [vmem:[%s7837_s16 + $0x48] sm:$0xff]   ;;  %v8892_v7 = vrot.slane %v2550_v1, 4  ;;  %v8894_v12 = vrot.slane %v2564_v18, 4 }
  0xaa   : > { %7263 = vmatprep.mubr.bf16.mxu0 %v6417_v20  ;;  %7291 = vmatprep.subr.bf16.mxu1 %v7666_v5  ;;  %v8869_v20 = vrot.slane %v2591_v37, 5  ;;  %v2588_v37 = vor.u32 %v2587_v49, %v2584_v30  ;;  %v8896_v59 = vrot.slane %v2577_v35, 5  ;;  %v7678_v49 = vld [vmem:[%s10831_s1 + $0x150] sm:$0xff]   ;;  %v8913_v18 = vrot.slane %v2609_v33, 5 }
  0xab   : > { %7340 = vmatpush3.bf16.msra.mxu0 %v8786_v11  ;;  %v8881_v11 = vld [vmem:[%s7837_s16 + $0xac] sm:$0xf]  ;;  %v2625_v35 = vshll.u32 %v8889_v4, 16 }
  0xac   : > { %7212 = vmatmul.mubr.bf16.gmra.mxu1 %v7661_v60  ;;  %7341 = vmatprep.subr.bf16.mxu0 %v7671_v58  ;;  %10904 = vst [vmem:[#allocation10_spill] sm:$0xff] %v8881_v11  ;;  %v2508_v60 = vsel %vm7868_vm2, %v8788_v63, %v8790_v28  ;;  %v2598_v24 = vor.u32 %v2597_v6, %v8869_v20  ;;  %v2615_v47 = vshll.u32 %v8881_v11, 16  ;;  %v7668_v63 = vld [vmem:[%s7837_s16 + $0x54] sm:$0xff]   ;;  %v8903_v28 = vrot.slane %v2574_v40, 4 }
  0xad   : > { %7215 = vmatprep.mubr.bf16.mxu1 %v7664_v38  ;;  %7292 = vmatpush3.bf16.msra.mxu1 %v7666_v5  ;;  %v7679_v5 = vld [vmem:[%s10831_s1 + $0x190] sm:$0xff]   ;;  %v8905_v6 = vrot.slane %v2601_v50, 5  ;;  %v8907_v38 = vrot.slane %v2606_v55, 4  ;;  %v2619_v1 = vshrl.u32 %v8881_v11, 16  ;;  %v8922_v40 = vrot.slane %v2588_v37, 4 }
  0xae   : > { %7293 = vmatprep.subr.bf16.mxu1 %v7670_v54  ;;  %v8924_v30 = vrot.slane %v2598_v24, 4  ;;  %v6391_v55 = vld [vmem:[%s7837_s16 + $0xb4] sm:$0xf]  ;;  %v8928_v11 = vld [vmem:[%s7837_s16 + $0xb8] sm:$0xf]  ;;  %v7682_v24 = vld [vmem:[%s10831_s1 + $0x148] sm:$0xff]  }
  0xaf   : > { %7342 = vmatpush3.bf16.msra.mxu0 %v7671_v58  ;;  %v10905_v58 = vsel %vm7868_vm2, %v8726_v46, %v8704_v21  ;;  %10906 = vst [vmem:[#allocation11_spill] sm:$0xff] %v8928_v11  ;;  %v2522_v21 = vsel %vm7868_vm2, %v8803_v9, %v8732_v57  ;;  %v8940_v46 = vrot.slane %v2615_v47, 5  ;;  %v6394_v37 = vld [vmem:[%s7837_s16 + $0xc0] sm:$0xf]  ;;  %v2532_v57 = vsel %vm7868_vm2, %v8811_v15, %v8805_v51  ;;  %v8967_v47 = vld [vmem:[%s7837_s16 + $0xc4] sm:$0xf] }
  0xb0   : > { %7343 = vmatprep.subr.bf16.mxu0 %v7675_v13  ;;  %v6420_v50 = vcombine.low %v10905_v58, %v2484_v25  ;;  %v2630_v25 = vshrl.u32 %v6391_v55, 16  ;;  %v2546_v9 = vsel %vm7868_vm2, %v8876_v14, %v8820_v19  ;;  %10909 = vst [vmem:[#allocation13_spill] sm:$0xff] %v8967_v47  ;;  %v8970_v51 = vld [vmem:[%s7837_s16 + $0xc8] sm:$0x1]  ;;  %v2663_v58 = vshll.u32 %v8967_v47, 16 }
  0xb1   : > { %7264 = vmatmul.mubr.bf16.gmra.mxu0 %v8828_v43  ;;  %7294 = vmatpush3.bf16.msra.mxu1 %v7670_v54  ;;  %v10907_v43 = vsel %vm7868_vm2, %v8778_v2, %v8716_v53  ;;  %v2621_v54 = vrot.slane %v2619_v1, 4  ;;  %v2633_v53 = vshll.u32 %v6391_v55, 16  ;;  %v2639_v2 = vshll.u32 %v8928_v11, 16 }
  0xb2   : > { %7267 = vmatprep.mubr.bf16.mxu0 %v8831_v52  ;;  %v6421_v33 = vcombine.low %v10907_v43, %v2508_v60  ;;  %7295 = vmatprep.subr.bf16.mxu1 %v7674_v29  ;;  %v7683_v52 = vld [vmem:[%s10831_s1 + $0x188] sm:$0xff]   ;;  %v2643_v60 = vshrl.u32 %v8928_v11, 16  ;;  %v2632_v15 = vrot.slane %v2630_v25, 4  ;;  %v10910_v55 = vrot.slane %v8375_v32, 5 }
  0xb3   : > { %7344 = vmatpush3.bf16.msra.mxu0 %v7675_v13  ;;  %v2556_v13 = vsel %vm7868_vm2, %v8892_v7, %v8878_v22  ;;  %v2635_v19 = vrot.slane %v2633_v53, 5  ;;  %v8972_v14 = vrot.slane %v2639_v2, 5  ;;  %v2654_v22 = vshrl.u32 %v6394_v37, 16  ;;  %v7669_v2 = vld [vmem:[%s7837_s16 + $0x60] sm:$0xff]  }
  0xb4   : > { %7216 = vmatmul.mubr.bf16.gmra.mxu1 %v7665_v48  ;;  %7345 = vmatprep.subr.bf16.mxu0 %v7679_v5  ;;  %v8964_v48 = vld [vmem:[%s7837_s16 + $0xbc] sm:$0x1]  ;;  %v2645_v1 = vrot.slane %v2643_v60, 4  ;;  %v2657_v7 = vshll.u32 %v6394_v37, 16  ;;  %v8977_v43 = vrot.slane %v10910_v55, 4  ;;  %v8982_v25 = vrot.slane %v2625_v35, 5 }
  0xb5   : > { %10908 = vst [vmem:[#allocation12_spill] sm:$0xff] %v8964_v48  ;;  %7219 = vmatprep.mubr.bf16.mxu1 %v7668_v63  ;;  %7296 = vmatpush3.bf16.msra.mxu1 %v7674_v29  ;;  %v2612_v63 = vor.u32 %v8913_v18, %v8907_v38  ;;  %v2622_v29 = vor.u32 %v2621_v54, %v8940_v46  ;;  %v2667_v53 = vshrl.u32 %v8967_v47, 16  ;;  %v2649_v60 = vshll.u32 %v8964_v48, 16  ;;  %v7672_v38 = vld [vmem:[%s7837_s16 + $0x6c] sm:$0xff]   ;;  %v9002_v48 = vld [vmem:[%s7837_s16 + $0x18] sm:$0xe] }
  0xb6   : > { %7297 = vmatprep.subr.bf16.mxu1 %v7678_v49  ;;  %v2656_v37 = vrot.slane %v2654_v22, 4  ;;  %v2659_v11 = vrot.slane %v2657_v7, 5  ;;  %v8987_v55 = vrot.slane %v2663_v58, 5  ;;  %v2636_v18 = vor.u32 %v2635_v19, %v2632_v15  ;;  %v7686_v22 = vld [vmem:[%s10831_s1 + $0x140] sm:$0xff]   ;;  %v8999_v58 = vld [vmem:[%s7837_s16 + $0xc] sm:$0xe] }
  0xb7   : > { %7346 = vmatpush3.bf16.msra.mxu0 %v7679_v5  ;;  %v7687_v5 = vld [vmem:[%s10831_s1 + $0x180] sm:$0xff]   ;;  %v2646_v35 = vor.u32 %v2645_v1, %v8972_v14  ;;  %v2669_v54 = vrot.slane %v2667_v53, 4  ;;  %v2673_v47 = vshll.u32 %v8970_v51, 16  ;;  %v6422_v15 = vcombine.low %v2522_v21, %v2532_v57 }
  0xb8   : > { %7347 = vmatprep.subr.bf16.mxu0 %v7683_v52  ;;  %v2660_v7 = vor.u32 %v2659_v11, %v2656_v37  ;;  %v6423_v19 = vcombine.low %v2546_v9, %v2556_v13  ;;  %v9010_v1 = vrot.slane %v2612_v63, 4  ;;  %v9012_v11 = vrot.slane %v2622_v29, 4  ;;  %v7673_v9 = vld [vmem:[%s7837_s16 + $0x78] sm:$0xff]   ;;  %v7676_v37 = vld [vmem:[%s7837_s16 + $0x84] sm:$0xff]  }
  0xb9   : > { %7268 = vmatmul.mubr.bf16.gmra.mxu0 %v6420_v50  ;;  %7298 = vmatpush3.bf16.msra.mxu1 %v7678_v49  ;;  %v9007_v49 = vld [vmem:[%s10831_s1 + $0x238] sm:$0xff]   ;;  %v2670_v50 = vor.u32 %v2669_v54, %v8987_v55  ;;  %v9021_v53 = vrot.slane %v2646_v35, 4  ;;  %v9023_v21 = vrot.slane %v2649_v60, 5  ;;  %v9029_v63 = vrot.slane %v2673_v47, 5  ;;  %v6440_v60 = vld [vmem:[%s7837_s16 + $0x30] sm:$0xe] }
  0xba   : > { %7271 = vmatprep.mubr.bf16.mxu0 %v6421_v33  ;;  %7299 = vmatprep.subr.bf16.mxu1 %v7682_v24  ;;  %v9017_v33 = vld [vmem:[%s10831_s1 + $0x1f8] sm:$0xff]   ;;  %v9027_v13 = vrot.slane %v2660_v7, 4  ;;  %v3068_v29 = vrot.slane %v8449_v42, 5  ;;  %v10911_v35 = vld [vmem:[#allocation2_spill] sm:$0xff]  ;;  %v6456_v47 = vrot.slane %v6440_v60, 9  ;;  %v10914_v60 = vld [vmem:[#allocation3_spill] sm:$0xff] }
  0xbb   : > { %7348 = vmatpush3.bf16.msra.mxu0 %v7683_v52  ;;  %v9019_v52 = vrot.slane %v2636_v18, 4  ;;  %v10912_v7 = vld [vmem:[#allocation5_spill] sm:$0xff]  ;;  %v3089_v18 = vrot.slane %v8532_v0, 5  ;;  %v2604_v0 = vsel %vm7868_vm2, %v8924_v30, %v8905_v6  ;;  %v3103_v30 = vrot.slane %v8623_v41, 5 }
  0xbc   : > { %7220 = vmatmul.mubr.bf16.gmra.mxu1 %v7669_v2  ;;  %7349 = vmatprep.subr.bf16.mxu0 %v7687_v5  ;;  %v3086_v57 = vrot.slane %v10912_v7, 5  ;;  %v10913_v2 = vld [vmem:[#allocation4_spill] sm:$0xff] }
  0xbd   : > { %7223 = vmatprep.mubr.bf16.mxu1 %v7672_v38  ;;  %7300 = vmatpush3.bf16.msra.mxu1 %v7682_v24  ;;  %v9034_v24 = vrot.slane %v2670_v50, 4  ;;  %v3072_v38 = vrot.slane %v8466_v61, 5  ;;  %v2570_v50 = vsel %vm7868_vm2, %v8894_v12, %v8826_v36  ;;  %v3093_v54 = vrot.slane %v10913_v2, 5  ;;  %v6441_v12 = vld [vmem:[%s7837_s16 + $0x3c] sm:$0xe] }
  0xbe   : > { %7301 = vmatprep.subr.bf16.mxu1 %v7686_v22  ;;  %v9056_v7 = vsel %vm8179_vm5, %v6456_v47, %v3086_v57  ;;  %v3088_v36 = vrot.slane %v3086_v57, 4  ;;  %v6457_v2 = vrot.slane %v6441_v12, 9  ;;  %v7677_v47 = vld [vmem:[%s7837_s16 + $0x90] sm:$0xff]   ;;  %v3110_v12 = vrot.slane %v8643_v34, 5 }
  0xbf   : > { %7350 = vmatpush3.bf16.msra.mxu0 %v7687_v5  ;;  %v2580_v5 = vsel %vm7868_vm2, %v8903_v28, %v8896_v59  ;;  %v2594_v59 = vsel %vm7868_vm2, %v8922_v40, %v8869_v20  ;;  %v3095_v28 = vrot.slane %v3093_v54, 4  ;;  %v3100_v20 = vrot.slane %v8582_v39, 5 }
  0xc0   : > { %7431 = vmatprep.subr.bf16.mxu0 %v9007_v49  ;;  %v9070_v57 = vsel %vm8179_vm5, %v3088_v36, %v3089_v18  ;;  %v6425_v18 = vcombine.low %v2594_v59, %v2604_v0  ;;  %v9085_v39 = vsel %vm8179_vm5, %v6457_v2, %v3093_v54  ;;  %v2618_v36 = vsel %vm7868_vm2, %v9010_v1, %v8940_v46  ;;  %v6443_v54 = vld [vmem:[%s7837_s16 + $0x54] sm:$0xe] }
  0xc1   : > { %7272 = vmatmul.mubr.bf16.gmra.mxu0 %v6422_v15  ;;  %7302 = vmatpush3.bf16.msra.mxu1 %v7686_v22  ;;  %v3082_v15 = vrot.slane %v10914_v60, 5  ;;  %v3096_v22 = vrot.slane %v8561_v45, 5  ;;  %v6488_v40 = vcombine.low %v9056_v7, %v9070_v57  ;;  %v6442_v45 = vld [vmem:[%s7837_s16 + $0x48] sm:$0xe]  ;;  %v2628_v46 = vsel %vm7868_vm2, %v9012_v11, %v8982_v25  ;;  %v6670_v57 = vld [vmem:[%s7837_s16 + $0x24] sm:$0xe] }
  0xc2   : > { %7275 = vmatprep.mubr.bf16.mxu0 %v6423_v19  ;;  %7383 = vmatprep.subr.bf16.mxu1 %v9017_v33  ;;  %v6424_v19 = vcombine.low %v2570_v50, %v2580_v5  ;;  %v3102_v50 = vrot.slane %v3100_v20, 4  ;;  %v7680_v5 = vld [vmem:[%s7837_s16 + $0x9c] sm:$0xff]   ;;  %v3114_v2 = vrot.slane %v8647_v31, 5  ;;  %v2642_v34 = vsel %vm7868_vm2, %v9019_v52, %v8972_v14 }
  0xc3   : > { %v9077_v6 = vsel %vm8179_vm5, %v3095_v28, %v3096_v22  ;;  %v6459_v28 = vrot.slane %v6443_v54, 9  ;;  %v6444_v22 = vld [vmem:[%s7837_s16 + $0x60] sm:$0xe]  ;;  %v3117_v25 = vrot.slane %v8695_v16, 5  ;;  %v2652_v11 = vsel %vm7868_vm2, %v9021_v53, %v9023_v21 }
  0xc4   : > { %7224 = vmatmul.mubr.bf16.gmra.mxu1 %v7673_v9  ;;  %v3107_v9 = vrot.slane %v8617_v10, 5  ;;  %v6489_v41 = vcombine.low %v9085_v39, %v9077_v6  ;;  %v9100_v59 = vsel %vm8179_vm5, %v3102_v50, %v3103_v30  ;;  %v3121_v14 = vrot.slane %v8687_v8, 5 }
  0xc5   : > { %7227 = vmatprep.mubr.bf16.mxu1 %v7676_v37  ;;  %v6458_v37 = vrot.slane %v6442_v45, 9  ;;  %v3116_v45 = vrot.slane %v3114_v2, 4  ;;  %v6426_v52 = vcombine.low %v2618_v36, %v2628_v46  ;;  %v3124_v8 = vrot.slane %v8708_v62, 5  ;;  %v6446_v36 = vld [vmem:[%s7837_s16 + $0x78] sm:$0xe] }
  0xc6   : > { %v3109_v0 = vrot.slane %v3107_v9, 4  ;;  %v9127_v31 = vsel %vm8179_vm5, %v6459_v28, %v3107_v9  ;;  %v3123_v9 = vrot.slane %v3121_v14, 4  ;;  %v3128_v54 = vrot.slane %v8712_v44, 5 }
  0xc7   : > { %v9096_v10 = vsel %vm8179_vm5, %v6458_v37, %v3100_v20  ;;  %v6460_v20 = vrot.slane %v6444_v22, 9  ;;  %v9139_v53 = vsel %vm8179_vm5, %v3116_v45, %v3117_v25  ;;  %v6427_v37 = vcombine.low %v2642_v34, %v2652_v11 }
  0xc8   : > { %v6490_v1 = vcombine.low %v9096_v10, %v9100_v59  ;;  %v9155_v46 = vsel %vm8179_vm5, %v3123_v9, %v3124_v8  ;;  %v6462_v62 = vrot.slane %v6446_v36, 9  ;;  %v3135_v28 = vrot.slane %v8755_v3, 5  ;;  %v7688_v8 = vld [vmem:[%s7837_s16 + $0x18] sm:$0xff]   ;;  %v10919_v36 = vld [vmem:[#allocation8_spill] sm:$0xff] }
  0xc9   : > { %7276 = vmatmul.mubr.bf16.gmra.mxu0 %v6424_v19  ;;  %v9118_v19 = vsel %vm8179_vm5, %v3109_v0, %v3110_v12  ;;  %v9134_v16 = vsel %vm8179_vm5, %v6460_v20, %v3114_v2  ;;  %v3131_v0 = vrot.slane %v8719_v26, 5  ;;  %v3130_v44 = vrot.slane %v3128_v54, 4  ;;  %v6447_v20 = vld [vmem:[%s7837_s16 + $0x84] sm:$0xe] }
  0xca   : > { %7279 = vmatprep.mubr.bf16.mxu0 %v6425_v18  ;;  %v6445_v18 = vld [vmem:[%s7837_s16 + $0x6c] sm:$0xe]  ;;  %v3138_v26 = vrot.slane %v8781_v17, 5  ;;  %v2666_v2 = vsel %vm7868_vm2, %v9027_v13, %v8987_v55  ;;  %v9167_v34 = vsel %vm8179_vm5, %v6462_v62, %v3128_v54  ;;  %v2676_v3 = vsel %vm7868_vm2, %v9034_v24, %v9029_v63  ;;  %v10917_v63 = vld [vmem:[#allocation6_spill] sm:$0xff] }
  0xcb   : > { %v6461_v21 = vrot.slane %v6445_v18, 9  ;;  %v9176_v17 = vsel %vm8179_vm5, %v3130_v44, %v3131_v0  ;;  %v6463_v25 = vrot.slane %v6447_v20, 9  ;;  %v3137_v11 = vrot.slane %v3135_v28, 4  ;;  %v6448_v18 = vld [vmem:[%s7837_s16 + $0x90] sm:$0xe] }
  0xcc   : > { %7228 = vmatmul.mubr.bf16.gmra.mxu1 %v7677_v47  ;;  %v7681_v47 = vld [vmem:[%s7837_s16 + $0xa8] sm:$0xff]   ;;  %v10915_v45 = vrot.slane %v8375_v32, 5  ;;  %v10916_v55 = vrot.slane %v8999_v58, 9  ;;  %v3142_v24 = vrot.slane %v10917_v63, 5  ;;  %v3149_v54 = vrot.slane %v10919_v36, 5 }
  0xcd   : > { %7231 = vmatprep.mubr.bf16.mxu1 %v7680_v5  ;;  %v7684_v5 = vld [vmem:[%s7837_s16 + $0xb4] sm:$0xff]   ;;  %v9151_v12 = vsel %vm8179_vm5, %v6461_v21, %v3121_v14  ;;  %v6439_v14 = vld [vmem:[%s7837_s16 + $0x24] sm:$0xe]  ;;  %v10918_v21 = vld [vmem:[#allocation7_spill] sm:$0xff]  ;;  %v9193_v32 = vsel %vm8179_vm5, %v6463_v25, %v3135_v28  ;;  %v9197_v58 = vsel %vm8179_vm5, %v3137_v11, %v3138_v26  ;;  %v6428_v0 = vcombine.low %v2666_v2, %v2676_v3 }
  0xce   : > { %v3066_v13 = vsel %vm8179_vm5, %v10916_v55, %v10915_v45  ;;  %v3145_v9 = vrot.slane %v10918_v21, 5  ;;  %v3144_v44 = vrot.slane %v3142_v24, 4  ;;  %v7685_v45 = vld [vmem:[%s7837_s16 + $0xc0] sm:$0xff]   ;;  %v3069_v28 = vsel %vm8179_vm5, %v8977_v43, %v3068_v29  ;;  %v6449_v2 = vld [vmem:[%s7837_s16 + $0x9c] sm:$0xe] }
  0xcf   : > { %v3074_v26 = vrot.slane %v3072_v38, 4  ;;  %v3151_v3 = vrot.slane %v3149_v54, 4  ;;  %v6465_v11 = vrot.slane %v6449_v2, 9  ;;  %v10921_v55 = vld [vmem:[#allocation10_spill] sm:$0xff]  ;;  %v6450_v63 = vld [vmem:[%s7837_s16 + $0xa8] sm:$0xe]  ;;  %v6485_v21 = vcombine.low %v3066_v13, %v3069_v28 }
  0xd0   : > { %v9218_v25 = vsel %vm8179_vm5, %v3144_v44, %v3145_v9  ;;  %v3156_v42 = vrot.slane %v10921_v55, 5  ;;  %v10925_v28 = vrot.slane %v9002_v48, 9  ;;  %v10933_v59 = vcombine.low %v9127_v31, %v9118_v19  ;;  %v7714_v19 = vld [vmem:[%s10831_s1 + $0x1c8] sm:$0xff]  }
  0xd1   : > { %7280 = vmatmul.mubr.bf16.gmra.mxu0 %v6426_v52  ;;  %v9231_v9 = vsel %vm8179_vm5, %v6465_v11, %v3149_v54  ;;  %v6451_v54 = vld [vmem:[%s7837_s16 + $0xb4] sm:$0xe]  ;;  %v7700_v52 = vld [vmem:[%s7837_s16 + $0x60] sm:$0xff]  }
  0xd2   : > { %7283 = vmatprep.mubr.bf16.mxu0 %v6427_v37  ;;  %v6464_v37 = vrot.slane %v6448_v18, 9  ;;  %v6455_v18 = vrot.slane %v6439_v14, 9  ;;  %v3158_v36 = vrot.slane %v3156_v42, 4  ;;  %v10922_v14 = vrot.slane %v10911_v35, 5  ;;  %v9349_v11 = vld [vmem:[%s7837_s16 + $0x34] sm:$0xf] }
  0xd3   : > { %v6467_v55 = vrot.slane %v6451_v54, 9  ;;  %v3990_v6 = vshll.u32 %v9349_v11, 16  ;;  %v3994_v39 = vshrl.u32 %v9349_v11, 16 }
  0xd4   : > { %7232 = vmatmul.mubr.bf16.gmra.mxu1 %v7681_v47  ;;  %v10920_v47 = vld [vmem:[#allocation9_spill] sm:$0xff]  ;;  %v3081_v44 = vrot.slane %v10922_v14, 4  ;;  %v10927_v61 = vmov %v10922_v14  ;;  %v3173_v14 = vrot.slane %v8970_v51, 5 }
  0xd5   : > { %7235 = vmatprep.mubr.bf16.mxu1 %v7684_v5  ;;  %v3152_v20 = vrot.slane %v10920_v47, 5  ;;  %v9213_v5 = vsel %vm8179_vm5, %v6464_v37, %v3142_v24  ;;  %v3159_v24 = vrot.slane %v8889_v4, 5  ;;  %v6466_v37 = vrot.slane %v6450_v63, 9 }
  0xd6   : > { %v10926_v63 = vrot.slane %v8480_v23, 5  ;;  %v3080_v48 = vsel %vm8179_vm5, %v6455_v18, %v10927_v61  ;;  %v3083_v23 = vsel %vm8179_vm5, %v3081_v44, %v3082_v15  ;;  %v6581_v44 = vld [vmem:[%s7837_s16 + $0x18] sm:$0xf] }
  0xd7   : > { %v9225_v29 = vsel %vm8179_vm5, %v3151_v3, %v3152_v20  ;;  %v10923_v20 = vld [vmem:[#allocation11_spill] sm:$0xff]  ;;  %v9240_v4 = vsel %vm8179_vm5, %v6466_v37, %v3156_v42  ;;  %v9244_v13 = vsel %vm8179_vm5, %v3158_v36, %v3159_v24  ;;  %v3073_v3 = vsel %vm8179_vm5, %v10925_v28, %v3072_v38  ;;  %v6452_v37 = vld [vmem:[%s7837_s16 + $0xc0] sm:$0xe]  ;;  %v10928_v38 = vld [vmem:[#allocation13_spill] sm:$0xff] }
  0xd8   : > { %v3163_v2 = vrot.slane %v10923_v20, 5  ;;  %v3076_v24 = vsel %vm8179_vm5, %v3074_v26, %v10926_v63  ;;  %v3170_v36 = vrot.slane %v10928_v38, 5  ;;  %v6468_v18 = vrot.slane %v6452_v37, 9  ;;  %v7695_v20 = vld [vmem:[%s10831_s1 + $0x230] sm:$0xff]  }
  0xd9   : > { %7284 = vmatmul.mubr.bf16.gmra.mxu0 %v6428_v0  ;;  %v6486_v54 = vcombine.low %v3073_v3, %v3076_v24  ;;  %v3933_v28 = vshrl.u32 %v6581_v44, 16  ;;  %v7694_v3 = vld [vmem:[%s10831_s1 + $0x1f0] sm:$0xff]  }
  0xda   : > { %7351 = vmatprep.mubr.bf16.mxu0 %v7688_v8  ;;  %v10924_v8 = vld [vmem:[#allocation12_spill] sm:$0xff]  ;;  %v3165_v42 = vrot.slane %v3163_v2, 4  ;;  %v9275_v26 = vsel %vm8179_vm5, %v6467_v55, %v3163_v2  ;;  %v3172_v60 = vrot.slane %v3170_v36, 4  ;;  %v9288_v15 = vsel %vm8179_vm5, %v6468_v18, %v3170_v36  ;;  %v7693_v36 = vld [vmem:[%s7837_s16 + $0x3c] sm:$0xff]   ;;  %v7698_v18 = vld [vmem:[%s10831_s1 + $0x1e8] sm:$0xff]  }
  0xdb   : > { %v3166_v0 = vrot.slane %v10924_v8, 5  ;;  %v6487_v2 = vcombine.low %v3080_v48, %v3083_v23  ;;  %v3936_v55 = vshll.u32 %v6581_v44, 16  ;;  %v9310_v48 = vld [vmem:[%s7837_s16 + $0x20] sm:$0x1]  ;;  %v9318_v23 = vld [vmem:[%s7837_s16 + $0x28] sm:$0xf] }
  0xdc   : > { %7236 = vmatmul.mubr.bf16.gmra.mxu1 %v7685_v45  ;;  %v7689_v45 = vld [vmem:[%s7837_s16 + $0x24] sm:$0xff]   ;;  %v9293_v8 = vsel %vm8179_vm5, %v3172_v60, %v3173_v14  ;;  %v6669_v44 = vld [vmem:[%s7837_s16 + $0x18] sm:$0xe]  ;;  %v4707_v51 = vrot.slane %v9310_v48, 5 }
  0xdd   : > { %7303 = vmatprep.mubr.bf16.mxu1 %v6485_v21  ;;  %v7692_v21 = vld [vmem:[%s7837_s16 + $0x30] sm:$0xff]   ;;  %v9279_v35 = vsel %vm8179_vm5, %v3165_v42, %v3166_v0  ;;  %v9296_v0 = vld [vmem:[%s7837_s16 + $0x1c] sm:$0xf]  ;;  %v3938_v61 = vrot.slane %v3936_v55, 5  ;;  %v6584_v14 = vld [vmem:[%s7837_s16 + $0x24] sm:$0xf] }
  0xde   : > { %v3942_v63 = vshll.u32 %v9296_v0, 16  ;;  %v3946_v24 = vshrl.u32 %v9296_v0, 16  ;;  %v3960_v55 = vshll.u32 %v6584_v14, 16 }
  0xe0   : > { %v9312_v37 = vrot.slane %v3942_v63, 5  ;;  %v3948_v38 = vrot.slane %v3946_v24, 4  ;;  %v3966_v63 = vshll.u32 %v9318_v23, 16  ;;  %v3970_v24 = vshrl.u32 %v9318_v23, 16 }
  0xe1   : > { %7352 = vmatmul.mubr.bf16.vlgmr.msra.gmra.mxu0 %v7689_v45  ;;  %v3935_v45 = vrot.slane %v3933_v28, 4  ;;  %v3957_v28 = vshrl.u32 %v6584_v14, 16  ;;  %v6587_v14 = vld [vmem:[%s7837_s16 + $0x30] sm:$0xf] }
  0xe2   : > { %7432 = vmatpush3.bf16.msra.mxu0 %v9007_v49  ;;  %7355 = vmatprep.mubr.bf16.mxu0 %v7692_v21  ;;  %v7699_v49 = vld [vmem:[%s10831_s1 + $0x228] sm:$0xff]   ;;  %v9359_v43 = vrot.slane %v3966_v63, 5  ;;  %v3972_v7 = vrot.slane %v3970_v24, 4  ;;  %v3981_v62 = vshrl.u32 %v6587_v14, 16  ;;  %v6590_v63 = vld [vmem:[%s7837_s16 + $0x3c] sm:$0xf] }
  0xe3   : > { %7433 = vmatprep.subr.bf16.mxu0 %v7695_v20  ;;  %v7696_v21 = vld [vmem:[%s7837_s16 + $0x48] sm:$0xff]   ;;  %v3939_v60 = vor.u32 %v3938_v61, %v3935_v45  ;;  %v7707_v61 = vld [vmem:[%s10831_s1 + $0x218] sm:$0xff]  }
  0xe4   : > { %7304 = vmatmul.mubr.bf16.vlgmr.msra.gmra.mxu1 %v6486_v54  ;;  %v3952_v54 = vshll.u32 %v9310_v48, 16  ;;  %v3973_v22 = vor.u32 %v3972_v7, %v9359_v43  ;;  %v3983_v30 = vrot.slane %v3981_v62, 4  ;;  %v4718_v7 = vrot.slane %v9349_v11, 5 }
  0xe5   : > { %7384 = vmatpush3.bf16.msra.mxu1 %v9017_v33  ;;  %7307 = vmatprep.mubr.bf16.mxu1 %v6487_v2  ;;  %v4704_v33 = vrot.slane %v9296_v0, 5  ;;  %v7703_v2 = vld [vmem:[%s10831_s1 + $0x220] sm:$0xff]  }
  0xe6   : > { %7385 = vmatprep.subr.bf16.mxu1 %v7694_v3  ;;  %7434 = vmatpush3.bf16.msra.mxu0 %v7695_v20  ;;  %v3949_v20 = vor.u32 %v3948_v38, %v9312_v37  ;;  %v7702_v0 = vld [vmem:[%s10831_s1 + $0x1e0] sm:$0xff]   ;;  %v6685_v38 = vrot.slane %v6669_v44, 9  ;;  %v9345_v42 = vrot.slane %v3952_v54, 5  ;;  %v3962_v54 = vrot.slane %v3960_v55, 5 }
  0xe7   : > { %7435 = vmatprep.subr.bf16.mxu0 %v7699_v49 }
  0xe8   : > { %v3950_v47 = vrot.slane %v3949_v20, 4  ;;  %v3984_v20 = vshll.u32 %v6587_v14, 16  ;;  %v9398_v14 = vld [vmem:[%s7837_s16 + $0x40] sm:$0xf] }
  0xe9   : > { %7356 = vmatmul.mubr.bf16.gmra.mxu0 %v7693_v36  ;;  %7386 = vmatpush3.bf16.msra.mxu1 %v7694_v3  ;;  %v7697_v36 = vld [vmem:[%s7837_s16 + $0x54] sm:$0xff]   ;;  %v9343_v3 = vrot.slane %v3939_v60, 4  ;;  %v3959_v60 = vrot.slane %v3957_v28, 4  ;;  %v4014_v62 = vshll.u32 %v9398_v14, 16 }
  0xea   : > { %7359 = vmatprep.mubr.bf16.mxu0 %v7696_v21  ;;  %7387 = vmatprep.subr.bf16.mxu1 %v7698_v18  ;;  %v4706_v21 = vrot.slane %v4704_v33, 4  ;;  %v7706_v28 = vld [vmem:[%s10831_s1 + $0x1d8] sm:$0xff]  }
  0xeb   : > { %7436 = vmatpush3.bf16.msra.mxu0 %v7699_v49  ;;  %v9357_v49 = vld [vmem:[%s7837_s16 + $0x2c] sm:$0x1] }
  0xec   : > { %v9336_v45 = vpop.f32.mrf.mxu0  ;;  %7308 = vmatmul.mubr.bf16.gmra.mxu1 %v6488_v40  ;;  %7437 = vmatprep.subr.bf16.mxu0 %v7703_v2  ;;  %v9354_v44 = vpop.f32.mrf.mxu1  ;;  %v4711_v40 = vrot.slane %v9318_v23, 5  ;;  %v9380_v23 = vsel %vm8179_vm5, %v6685_v38, %v4704_v33  ;;  %v3976_v55 = vshll.u32 %v9357_v49, 16  ;;  %v3963_v33 = vor.u32 %v3962_v54, %v3959_v60 }
  0xed   : > { %10929 = vst [vmem:[#allocation2_spill] sm:$0xff] %v9354_v44  ;;  %7311 = vmatprep.mubr.bf16.mxu1 %v6489_v41  ;;  %7388 = vmatpush3.bf16.msra.mxu1 %v7698_v18  ;;  %v3945_v41 = vsel %vm7868_vm2, %v9343_v3, %v9312_v37  ;;  %v9384_v18 = vsel %vm8179_vm5, %v4706_v21, %v4707_v51  ;;  %v6686_v38 = vrot.slane %v6670_v57, 9  ;;  %v4714_v51 = vrot.slane %v9357_v49, 5  ;;  %v7710_v21 = vld [vmem:[%s10831_s1 + $0x1d0] sm:$0xff]   ;;  %v6672_v44 = vld [vmem:[%s7837_s16 + $0x3c] sm:$0xe] }
  0xee   : > { %v9364_v48 = vpop.f32.mrf.mxu0  ;;  %7389 = vmatprep.subr.bf16.mxu1 %v7702_v0  ;;  %v9388_v24 = vpop.f32.mrf.mxu1  ;;  %v3955_v37 = vsel %vm7868_vm2, %v3950_v47, %v9345_v42  ;;  %v4713_v50 = vrot.slane %v4711_v40, 4  ;;  %v3986_v47 = vrot.slane %v3984_v20, 5  ;;  %v9407_v42 = vld [vmem:[%s7837_s16 + $0x38] sm:$0x1]  ;;  %v9409_v49 = vrot.slane %v3990_v6, 5  ;;  %v7701_v20 = vld [vmem:[%s7837_s16 + $0x6c] sm:$0xff]  }
  0xef   : > { %7438 = vmatpush3.bf16.msra.mxu0 %v7703_v2  ;;  %10930 = vst [vmem:[#allocation5_spill] sm:$0xff] %v9388_v24  ;;  %v7711_v2 = vld [vmem:[%s10831_s1 + $0x210] sm:$0xff]   ;;  %v4008_v60 = vshll.u32 %v6590_v63, 16  ;;  %v9428_v11 = vcombine.low %v3945_v41, %v3955_v37  ;;  %v9436_v10 = vsel %vm8179_vm5, %v6686_v38, %v4711_v40  ;;  %v3974_v54 = vrot.slane %v3973_v22, 4  ;;  %v7704_v40 = vld [vmem:[%s7837_s16 + $0x78] sm:$0xff]   ;;  %v7719_v24 = vld [vmem:[%s10831_s1 + $0x200] sm:$0xff]  }
  0xf0   : > { %7439 = vmatprep.subr.bf16.mxu0 %v7707_v61  ;;  %v9400_v3 = vpop.f32.mrf.mxu0  ;;  %v6671_v57 = vld [vmem:[%s7837_s16 + $0x30] sm:$0xe]  ;;  %v9423_v6 = vpop.f32.mrf.mxu1  ;;  %v9445_v41 = vsel %vm8179_vm5, %v4713_v50, %v4714_v51  ;;  %v3987_v37 = vor.u32 %v3986_v47, %v3983_v30  ;;  %v4720_v30 = vrot.slane %v4718_v7, 4  ;;  %v4721_v38 = vrot.slane %v9407_v42, 5 }
  0xf1   : > { %7360 = vmatmul.mubr.bf16.gmra.mxu0 %v7697_v36  ;;  %7390 = vmatpush3.bf16.msra.mxu1 %v7702_v0  ;;  %10931 = vst [vmem:[#allocation4_spill] sm:$0xff] %v9400_v3  ;;  %v9411_v0 = vrot.slane %v3994_v39, 4  ;;  %v4005_v36 = vshrl.u32 %v6590_v63, 16  ;;  %10932 = vst [vmem:[#allocation3_spill] sm:$0xff] %v9423_v6  ;;  %v9430_v39 = vrot.slane %v3963_v33, 4  ;;  %v9432_v63 = vrot.slane %v3976_v55, 5 }
  0xf2   : > { %7363 = vmatprep.mubr.bf16.mxu0 %v7700_v52  ;;  %7391 = vmatprep.subr.bf16.mxu1 %v7706_v28  ;;  %v4018_v52 = vshrl.u32 %v9398_v14, 16  ;;  %v4000_v55 = vshll.u32 %v9407_v42, 16  ;;  %v6593_v33 = vld [vmem:[%s7837_s16 + $0x48] sm:$0xf]  ;;  %v9450_v6 = vld [vmem:[%s7837_s16 + $0x4c] sm:$0xf] }
  0xf3   : > { %7440 = vmatpush3.bf16.msra.mxu0 %v7707_v61  ;;  %v7715_v61 = vld [vmem:[%s10831_s1 + $0x208] sm:$0xff]   ;;  %v3997_v31 = vor.u32 %v9411_v0, %v9409_v49  ;;  %v6687_v22 = vrot.slane %v6671_v57, 9  ;;  %v4010_v50 = vrot.slane %v4008_v60, 5  ;;  %v9459_v51 = vrot.slane %v4014_v62, 5  ;;  %v7718_v62 = vld [vmem:[%s10831_s1 + $0x1c0] sm:$0xff]  }
  0xf4   : > { %7312 = vmatmul.mubr.bf16.gmra.mxu1 %v6490_v1  ;;  %7441 = vmatprep.subr.bf16.mxu0 %v7711_v2  ;;  %v9441_v1 = vpop.f32.mrf.mxu0  ;;  %v4020_v47 = vrot.slane %v4018_v52, 4  ;;  %v3969_v0 = vsel %vm7868_vm2, %v9430_v39, %v9359_v43  ;;  %v4032_v42 = vshll.u32 %v6593_v33, 16  ;;  %v4038_v60 = vshll.u32 %v9450_v6, 16 }
  0xf5   : > { %7315 = vmatprep.mubr.bf16.mxu1 %v10933_v59  ;;  %7392 = vmatpush3.bf16.msra.mxu1 %v7706_v28  ;;  %10934 = vst [vmem:[#allocation6_spill] sm:$0xff] %v9441_v1  ;;  %v4007_v28 = vrot.slane %v4005_v36, 4  ;;  %v9461_v59 = vpop.f32.mrf.mxu1  ;;  %v9471_v36 = vld [vmem:[%s7837_s16 + $0x44] sm:$0x1]  ;;  %v3979_v43 = vsel %vm7868_vm2, %v3974_v54, %v9432_v63  ;;  %v3988_v39 = vrot.slane %v3987_v37, 4  ;;  %v3998_v63 = vrot.slane %v3997_v31, 4 }
  0xf6   : > { %7393 = vmatprep.subr.bf16.mxu1 %v7710_v21  ;;  %10935 = vst [vmem:[#allocation7_spill] sm:$0xff] %v9461_v59  ;;  %v6596_v54 = vld [vmem:[%s7837_s16 + $0x54] sm:$0xf]  ;;  %v9494_v37 = vsel %vm8179_vm5, %v4720_v30, %v4721_v38  ;;  %v7705_v30 = vld [vmem:[%s7837_s16 + $0x84] sm:$0xff]  }
  0xf7   : > { %7442 = vmatpush3.bf16.msra.mxu0 %v7711_v2  ;;  %v4029_v2 = vshrl.u32 %v6593_v33, 16  ;;  %v9474_v57 = vpop.f32.mrf.mxu0  ;;  %v4042_v33 = vshrl.u32 %v9450_v6, 16  ;;  %v4011_v59 = vor.u32 %v4010_v50, %v4007_v28  ;;  %v4034_v28 = vrot.slane %v4032_v42, 5  ;;  %v7708_v38 = vld [vmem:[%s7837_s16 + $0x90] sm:$0xff]  }
  0xf8   : > { %7443 = vmatprep.subr.bf16.mxu0 %v7715_v61  ;;  %10936 = vst [vmem:[#allocation8_spill] sm:$0xff] %v9474_v57  ;;  %v4725_v57 = vrot.slane %v9398_v14, 5  ;;  %v10939_v50 = vcombine.low %v9151_v12, %v9155_v46  ;;  %v9518_v42 = vld [vmem:[%s7837_s16 + $0x50] sm:$0x1]  ;;  %v4728_v46 = vrot.slane %v9471_v36, 5 }
  0xf9   : > { %7364 = vmatmul.mubr.bf16.gmra.mxu0 %v7701_v20  ;;  %7394 = vmatpush3.bf16.msra.mxu1 %v7710_v21  ;;  %v4002_v20 = vrot.slane %v4000_v55, 5  ;;  %v9487_v21 = vsel %vm8179_vm5, %v6687_v22, %v4718_v7  ;;  %v4024_v55 = vshll.u32 %v9471_v36, 16  ;;  %v10937_v7 = vcombine.low %v9134_v16, %v9139_v53  ;;  %v6673_v36 = vld [vmem:[%s7837_s16 + $0x48] sm:$0xe] }
  0xfa   : > { %7367 = vmatprep.mubr.bf16.mxu0 %v7704_v40  ;;  %7395 = vmatprep.subr.bf16.mxu1 %v7714_v19  ;;  %v4021_v40 = vor.u32 %v4020_v47, %v9459_v51  ;;  %v4031_v14 = vrot.slane %v4029_v2, 4  ;;  %v4044_v31 = vrot.slane %v4042_v33, 4  ;;  %v9510_v47 = vpop.f32.mrf.mxu0  ;;  %v9512_v16 = vcombine.low %v3969_v0, %v3979_v43 }
  0xfb   : > { %7444 = vmatpush3.bf16.msra.mxu0 %v7715_v61  ;;  %v9501_v22 = vpop.f32.mrf.mxu1  ;;  %v9503_v61 = vrot.slane %v4038_v60, 5  ;;  %10940 = vst [vmem:[#allocation10_spill] sm:$0xff] %v9510_v47  ;;  %v3993_v53 = vsel %vm7868_vm2, %v3988_v39, %v9409_v49  ;;  %v6688_v2 = vrot.slane %v6672_v44, 9  ;;  %v4053_v60 = vshrl.u32 %v6596_v54, 16 }
  0xfc   : > { %7316 = vmatmul.mubr.bf16.gmra.mxu1 %v10937_v7  ;;  %10938 = vst [vmem:[#allocation9_spill] sm:$0xff] %v9501_v22  ;;  %7445 = vmatprep.subr.bf16.mxu0 %v7719_v24  ;;  %v4012_v33 = vrot.slane %v4011_v59, 4  ;;  %v4727_v12 = vrot.slane %v4725_v57, 4  ;;  %v9522_v7 = vld [vmem:[%s7837_s16 + $0x58] sm:$0xf]  ;;  %v4003_v0 = vsel %vm7868_vm2, %v3998_v63, %v4002_v20  ;;  %v4022_v49 = vrot.slane %v4021_v40, 4 }
  0xfd   : > { %7319 = vmatprep.mubr.bf16.mxu1 %v10939_v50  ;;  %7396 = vmatpush3.bf16.msra.mxu1 %v7714_v19  ;;  %v4056_v19 = vshll.u32 %v6596_v54, 16  ;;  %v4026_v43 = vrot.slane %v4024_v55, 5  ;;  %v9528_v39 = vpop.f32.mrf.mxu1  ;;  %v4035_v50 = vor.u32 %v4034_v28, %v4031_v14  ;;  %v4045_v59 = vor.u32 %v4044_v31, %v9503_v61  ;;  %v9535_v54 = vpop.f32.mrf.mxu0 }
  0xfe   : > { %7397 = vmatprep.subr.bf16.mxu1 %v7718_v62  ;;  %10941 = vst [vmem:[#allocation11_spill] sm:$0xff] %v9528_v39  ;;  %v4048_v52 = vshll.u32 %v9518_v42, 16  ;;  %v4732_v22 = vrot.slane %v9450_v6, 5  ;;  %10942 = vst [vmem:[#allocation12_spill] sm:$0xff] %v9535_v54  ;;  %v4055_v20 = vrot.slane %v4053_v60, 4  ;;  %v4062_v40 = vshll.u32 %v9522_v7, 16 }
  0xff   : > { %7446 = vmatpush3.bf16.msra.mxu0 %v7719_v24  ;;  %v6599_v24 = vld [vmem:[%s7837_s16 + $0x60] sm:$0xf]  ;;  %v4058_v63 = vrot.slane %v4056_v19, 5  ;;  %v4066_v55 = vshrl.u32 %v9522_v7, 16  ;;  %v9539_v14 = vcombine.low %v3993_v53, %v4003_v0  ;;  %v4017_v6 = vsel %vm7868_vm2, %v4012_v33, %v9459_v51  ;;  %v9568_v19 = vld [vmem:[%s7837_s16 + $0x5c] sm:$0x1] }
 0x100   : > { %v9546_v28 = vsel %vm8179_vm5, %v6688_v2, %v4725_v57  ;;  %v4027_v31 = vsel %vm7868_vm2, %v4022_v49, %v4026_v43  ;;  %v4077_v53 = vshrl.u32 %v6599_v24, 16  ;;  %v4080_v60 = vshll.u32 %v6599_v24, 16  ;;  %v9560_v57 = vpop.f32.mrf.mxu1  ;;  %v7709_v49 = vld [vmem:[%s7837_s16 + $0x9c] sm:$0xff]   ;;  %v7712_v24 = vld [vmem:[%s7837_s16 + $0xa8] sm:$0xff]  }
 0x101   : > { %7368 = vmatmul.mubr.bf16.gmra.mxu0 %v7705_v30  ;;  %7398 = vmatpush3.bf16.msra.mxu1 %v7718_v62  ;;  %10943 = vst [vmem:[#allocation13_spill] sm:$0xff] %v9546_v28  ;;  %v9550_v62 = vsel %vm8179_vm5, %v4727_v12, %v4728_v46  ;;  %v6689_v30 = vrot.slane %v6673_v36, 9  ;;  %v10945_v51 = vcombine.low %v9167_v34, %v9176_v17  ;;  %10946 = vst [vmem:[#allocation15_spill] sm:$0xff] %v9560_v57  ;;  %v9574_v34 = vpop.f32.mrf.mxu0  ;;  %v6674_v36 = vld [vmem:[%s7837_s16 + $0x54] sm:$0xe] }
 0x102   : > { %7371 = vmatprep.mubr.bf16.mxu0 %v7708_v38  ;;  %10944 = vst [vmem:[#allocation14_spill] sm:$0xff] %v9550_v62  ;;  %v9555_v38 = vld [vmem:[%s7837_s16 + $0x64] sm:$0xf]  ;;  %v9562_v2 = vrot.slane %v4035_v50, 4  ;;  %v9564_v33 = vrot.slane %v4048_v52, 5  ;;  %v4734_v12 = vrot.slane %v4732_v22, 4  ;;  %v10947_v0 = vcombine.low %v9193_v32, %v9197_v58 }
 0x103   : > { %v4735_v46 = vrot.slane %v9518_v42, 5  ;;  %10948 = vst [vmem:[#allocation16_spill] sm:$0xff] %v9574_v34  ;;  %v9576_v17 = vrot.slane %v4045_v59, 4  ;;  %v4059_v43 = vor.u32 %v4058_v63, %v4055_v20  ;;  %v9578_v50 = vrot.slane %v4062_v40, 5  ;;  %v6675_v39 = vld [vmem:[%s7837_s16 + $0x60] sm:$0xe] }
 0x104   : > { %7320 = vmatmul.mubr.bf16.gmra.mxu1 %v10945_v51  ;;  %v4068_v52 = vrot.slane %v4066_v55, 4  ;;  %v9582_v51 = vcombine.low %v4017_v6, %v4027_v31  ;;  %v4086_v32 = vshll.u32 %v9555_v38, 16  ;;  %v4090_v58 = vshrl.u32 %v9555_v38, 16  ;;  %v9595_v55 = vld [vmem:[%s7837_s16 + $0x70] sm:$0xf]  ;;  %v9597_v6 = vpop.f32.mrf.mxu1 }
 0x105   : > { %7323 = vmatprep.mubr.bf16.mxu1 %v10947_v0  ;;  %v6602_v0 = vld [vmem:[%s7837_s16 + $0x6c] sm:$0xf]  ;;  %v9591_v59 = vsel %vm8179_vm5, %v6689_v30, %v4732_v22  ;;  %v4072_v20 = vshll.u32 %v9568_v19, 16  ;;  %v4079_v63 = vrot.slane %v4077_v53, 4  ;;  %v4082_v40 = vrot.slane %v4080_v60, 5  ;;  %10951 = vst [vmem:[#allocation19_spill] sm:$0xff] %v9597_v6 }
 0x106   : > { %10949 = vst [vmem:[#allocation17_spill] sm:$0xff] %v9582_v51  ;;  %10950 = vst [vmem:[#allocation18_spill] sm:$0xff] %v9591_v59  ;;  %v9605_v42 = vsel %vm8179_vm5, %v4734_v12, %v4735_v46  ;;  %v6690_v22 = vrot.slane %v6674_v36, 9  ;;  %v4739_v30 = vrot.slane %v9522_v7, 5  ;;  %v9614_v44 = vrot.slane %v4059_v43, 4 }
 0x107   : > { %10952 = vst [vmem:[#allocation20_spill] sm:$0xff] %v9605_v42  ;;  %v9608_v53 = vpop.f32.mrf.mxu0  ;;  %v4069_v31 = vor.u32 %v4068_v52, %v9578_v50  ;;  %v4101_v6 = vshrl.u32 %v6602_v0, 16  ;;  %v9618_v12 = vld [vmem:[%s7837_s16 + $0x68] sm:$0x1]  ;;  %v9620_v46 = vrot.slane %v4086_v32, 5  ;;  %v4092_v7 = vrot.slane %v4090_v58, 4 }
 0x108   : > { %10953 = vst [vmem:[#allocation21_spill] sm:$0xff] %v9608_v53  ;;  %v4110_v36 = vshll.u32 %v9595_v55, 16  ;;  %v9625_v60 = vrot.slane %v4072_v20, 5  ;;  %v4083_v43 = vor.u32 %v4082_v40, %v4079_v63  ;;  %v4114_v52 = vshrl.u32 %v9595_v55, 16  ;;  %v7713_v58 = vld [vmem:[%s7837_s16 + $0xb4] sm:$0xff]  }
 0x109   : > { %7372 = vmatmul.mubr.bf16.gmra.mxu0 %v7709_v49  ;;  %v4104_v49 = vshll.u32 %v6602_v0, 16  ;;  %v9637_v0 = vsel %vm8179_vm5, %v6690_v22, %v4739_v30  ;;  %v4741_v20 = vrot.slane %v4739_v30, 4  ;;  %v4742_v63 = vrot.slane %v9568_v19, 5  ;;  %v6605_v57 = vld [vmem:[%s7837_s16 + $0x78] sm:$0xf]  ;;  %v7716_v30 = vld [vmem:[%s7837_s16 + $0xc0] sm:$0xff]  }
 0x10a   : > { %7375 = vmatprep.mubr.bf16.mxu0 %v7712_v24  ;;  %v10954_v24 = vcombine.low %v9213_v5, %v9218_v25  ;;  %v4746_v40 = vrot.slane %v9555_v38, 5  ;;  %v10956_v53 = vcombine.low %v9231_v9, %v9225_v29  ;;  %v9645_v5 = vpop.f32.mrf.mxu0  ;;  %v9647_v25 = vrot.slane %v4069_v31, 4  ;;  %v9651_v34 = vld [vmem:[%s7837_s16 + $0x7c] sm:$0xf]  ;;  %v9660_v9 = vld [vmem:[%s7837_s16 + $0x74] sm:$0x1] }
 0x10b   : > { %10957 = vst [vmem:[#allocation23_spill] sm:$0xff] %v9645_v5  ;;  %v4106_v22 = vrot.slane %v4104_v49, 5  ;;  %v4093_v29 = vor.u32 %v4092_v7, %v9620_v46  ;;  %v9662_v19 = vrot.slane %v4110_v36, 5  ;;  %v4116_v31 = vrot.slane %v4114_v52, 4  ;;  %v6676_v49 = vld [vmem:[%s7837_s16 + $0x6c] sm:$0xe] }
 0x10c   : > { %7324 = vmatmul.mubr.bf16.gmra.mxu1 %v10954_v24  ;;  %v9632_v32 = vpop.f32.mrf.mxu1  ;;  %v4096_v24 = vshll.u32 %v9618_v12, 16  ;;  %v4125_v5 = vshrl.u32 %v6605_v57, 16  ;;  %v4128_v54 = vshll.u32 %v6605_v57, 16  ;;  %v9671_v51 = vsel %vm8179_vm5, %v4741_v20, %v4742_v63  ;;  %v6608_v52 = vld [vmem:[%s7837_s16 + $0x84] sm:$0xf] }
 0x10d   : > { %10955 = vst [vmem:[#allocation22_spill] sm:$0xff] %v9632_v32  ;;  %7327 = vmatprep.mubr.bf16.mxu1 %v10956_v53  ;;  %v4103_v32 = vrot.slane %v4101_v6, 4  ;;  %v9664_v53 = vrot.slane %v4083_v43, 4  ;;  %v6691_v6 = vrot.slane %v6675_v39, 9  ;;  %v4748_v38 = vrot.slane %v4746_v40, 4  ;;  %v9676_v43 = vpop.f32.mrf.mxu0 }
 0x10e   : > { %v9667_v47 = vpop.f32.mrf.mxu1  ;;  %v4749_v7 = vrot.slane %v9618_v12, 5  ;;  %v4134_v36 = vshll.u32 %v9651_v34, 16  ;;  %10959 = vst [vmem:[#allocation25_spill] sm:$0xff] %v9676_v43  ;;  %v9678_v39 = vrot.slane %v4096_v24, 5  ;;  %v4120_v57 = vshll.u32 %v9660_v9, 16 }
 0x10f   : > { %10958 = vst [vmem:[#allocation24_spill] sm:$0xff] %v9667_v47  ;;  %v4107_v1 = vor.u32 %v4106_v22, %v4103_v32  ;;  %v4138_v47 = vshrl.u32 %v9651_v34, 16  ;;  %v9683_v20 = vld [vmem:[%s7837_s16 + $0x88] sm:$0xf]  ;;  %v4117_v63 = vor.u32 %v4116_v31, %v9662_v19  ;;  %v4753_v32 = vrot.slane %v9595_v55, 5  ;;  %v7717_v55 = vld [vmem:[%s7837_s16 + $0xcc] sm:$0xff]  }
 0x110   : > { %v9694_v24 = vld [vmem:[%s7837_s16 + $0x80] sm:$0x1]  ;;  %v4127_v43 = vrot.slane %v4125_v5, 4  ;;  %v4130_v12 = vrot.slane %v4128_v54, 5  ;;  %v9707_v31 = vpop.f32.mrf.mxu1  ;;  %v9712_v42 = vsel %vm8179_vm5, %v4748_v38, %v4749_v7  ;;  %v6692_v59 = vrot.slane %v6676_v49, 9  ;;  %v9719_v5 = vpop.f32.mrf.mxu0 }
 0x111   : > { %7376 = vmatmul.mubr.bf16.gmra.mxu0 %v7713_v58  ;;  %v9689_v58 = vrot.slane %v4093_v29, 4  ;;  %v10960_v29 = vcombine.low %v9240_v4, %v9244_v13  ;;  %10961 = vst [vmem:[#allocation26_spill] sm:$0xff] %v9707_v31  ;;  %v9714_v22 = vrot.slane %v4134_v36, 5  ;;  %v4140_v62 = vrot.slane %v4138_v47, 4  ;;  %10962 = vst [vmem:[#allocation27_spill] sm:$0xff] %v9719_v5 }
 0x112   : > { %7379 = vmatprep.mubr.bf16.mxu0 %v7716_v30  ;;  %v9702_v30 = vsel %vm8179_vm5, %v6691_v6, %v4746_v40  ;;  %v9717_v40 = vld [vmem:[%s7837_s16 + $0x8c] sm:$0x1]  ;;  %v10963_v4 = vcombine.low %v9275_v26, %v9279_v35  ;;  %v4108_v13 = vrot.slane %v4107_v1, 4  ;;  %v4122_v54 = vrot.slane %v4120_v57, 5  ;;  %v6677_v49 = vld [vmem:[%s7837_s16 + $0x78] sm:$0xe]  ;;  %v9729_v26 = vpop.f32.mrf.mxu1 }
 0x113   : > { %v4756_v6 = vrot.slane %v9660_v9, 5  ;;  %v4118_v38 = vrot.slane %v4117_v63, 4  ;;  %v4755_v7 = vrot.slane %v4753_v32, 4  ;;  %v4152_v36 = vshll.u32 %v6608_v52, 16  ;;  %v6678_v63 = vld [vmem:[%s7837_s16 + $0x84] sm:$0xe] }
 0x114   : > { %7328 = vmatmul.mubr.bf16.gmra.mxu1 %v10960_v29  ;;  %v4149_v29 = vshrl.u32 %v6608_v52, 16  ;;  %v4158_v47 = vshll.u32 %v9683_v20, 16  ;;  %v4131_v31 = vor.u32 %v4130_v12, %v4127_v43  ;;  %v4144_v28 = vshll.u32 %v9694_v24, 16 }
 0x115   : > { %7331 = vmatprep.mubr.bf16.mxu1 %v10963_v4  ;;  %v4162_v3 = vshrl.u32 %v9683_v20, 16  ;;  %v4141_v35 = vor.u32 %v4140_v62, %v9714_v22  ;;  %v4760_v1 = vrot.slane %v9651_v34, 5  ;;  %v4154_v9 = vrot.slane %v4152_v36, 5 }
 0x116   : > { %v4151_v5 = vrot.slane %v4149_v29, 4  ;;  %v9733_v57 = vrot.slane %v4158_v47, 5  ;;  %v4099_v43 = vsel %vm7868_vm2, %v9689_v58, %v9678_v39  ;;  %v9744_v12 = vsel %vm8179_vm5, %v6692_v59, %v4753_v32 }
 0x117   : > { %v4164_v62 = vrot.slane %v4162_v3, 4  ;;  %v4168_v4 = vshll.u32 %v9717_v40, 16  ;;  %v10964_v34 = vcombine.low %v9380_v23, %v9384_v18  ;;  %v4123_v29 = vsel %vm7868_vm2, %v4118_v38, %v4122_v54  ;;  %v6611_v3 = vld [vmem:[%s7837_s16 + $0x90] sm:$0xf] }
 0x118   : > { %v9736_v52 = vpop.f32.mrf.mxu0  ;;  %v9757_v39 = vsel %vm8179_vm5, %v4755_v7, %v4756_v6  ;;  %v4155_v59 = vor.u32 %v4154_v9, %v4151_v5  ;;  %v9762_v32 = vrot.slane %v4144_v28, 5  ;;  %v6693_v23 = vrot.slane %v6677_v49, 9  ;;  %v9773_v7 = vld [vmem:[%s7837_s16 + $0x94] sm:$0xf] }
 0x119   : > { %7380 = vmatmul.mubr.bf16.gmra.mxu0 %v7717_v55  ;;  %v4113_v55 = vsel %vm7868_vm2, %v4108_v13, %v9662_v19  ;;  %v4165_v18 = vor.u32 %v4164_v62, %v9733_v57  ;;  %v4767_v36 = vrot.slane %v9683_v20, 5  ;;  %v10965_v13 = vcombine.low %v9288_v15, %v9293_v8 }
 0x11a   : > { %7447 = vmatprep.mubr.bf16.mxu0 %v10964_v34  ;;  %v9760_v58 = vpop.f32.mrf.mxu0  ;;  %v4132_v54 = vrot.slane %v4131_v31, 4  ;;  %v4142_v6 = vrot.slane %v4141_v35, 4  ;;  %v4762_v38 = vrot.slane %v4760_v1, 4  ;;  %v4763_v5 = vrot.slane %v9694_v24, 5 }
 0x11b   : > { %v4170_v49 = vrot.slane %v4168_v4, 5  ;;  %v6694_v47 = vrot.slane %v6678_v63, 9  ;;  %v4770_v20 = vrot.slane %v9717_v40, 5  ;;  %v4173_v9 = vshrl.u32 %v6611_v3, 16 }
 0x11c   : > { %v9766_v19 = vpop.f32.mrf.mxu1  ;;  %7332 = vmatmul.mubr.bf16.gmra.mxu1 %v10965_v13  ;;  %v9775_v28 = vpop.f32.mrf.mxu0  ;;  %v10967_v15 = vsel %vm7868_vm2, %v9576_v17, %v9564_v33  ;;  %v10968_v8 = vsel %vm7868_vm2, %v9562_v2, %v9503_v61  ;;  %v4156_v31 = vrot.slane %v4155_v59, 4  ;;  %v4176_v40 = vshll.u32 %v6611_v3, 16  ;;  %v9829_v3 = vld [vmem:[%s7837_s16 + $0x98] sm:$0x1]  ;;  %v10986_v17 = vld [vmem:[#allocation6_spill] sm:$0xff] }
 0x11d   : > { %7399 = vmatprep.mubr.bf16.mxu1 %v9428_v11  ;;  %v9791_v11 = vcombine.low %v10968_v8, %v10967_v15  ;;  %v10969_v33 = vsel %vm7868_vm2, %v9647_v25, %v9625_v60  ;;  %v10970_v61 = vsel %vm7868_vm2, %v9614_v44, %v9578_v50  ;;  %v4166_v63 = vrot.slane %v4165_v18, 4  ;;  %v6614_v18 = vld [vmem:[%s7837_s16 + $0x9c] sm:$0xf] }
 0x11e   : > { %v9779_v62 = vpop.f32.mrf.mxu1  ;;  %v9795_v35 = vpop.f32.mrf.mxu0  ;;  %v9807_v2 = vcombine.low %v10970_v61, %v10969_v33  ;;  %v4769_v4 = vrot.slane %v4767_v36, 4  ;;  %v10972_v60 = vsel %vm7868_vm2, %v9664_v53, %v9620_v46  ;;  %v9820_v59 = vcombine.low %v4113_v55, %v4123_v29  ;;  %v9847_v55 = vld [vmem:[%s7837_s16 + $0xa0] sm:$0xf] }
 0x11f   : > { %10966 = vst [vmem:[#allocation28_spill] sm:$0xff] %v9779_v62  ;;  %v9818_v25 = vcombine.low %v10972_v60, %v4099_v43  ;;  %v9826_v50 = vsel %vm8179_vm5, %v6693_v23, %v4760_v1  ;;  %v10973_v15 = vcombine.low %v9436_v10, %v9445_v41  ;;  %v4137_v46 = vsel %vm7868_vm2, %v4132_v54, %v9714_v22  ;;  %v9934_v62 = vld [vmem:[%s7837_s16 + $0xb0] sm:$0x1] }
 0x120   : > { %v9811_v34 = vpop.f32.mrf.mxu1  ;;  %v7161_v13 = vpop.f32.mrf.mxu0  ;;  %v4147_v53 = vsel %vm7868_vm2, %v4142_v6, %v9762_v32  ;;  %v9843_v1 = vsel %vm8179_vm5, %v4762_v38, %v4763_v5  ;;  %v4182_v43 = vshll.u32 %v9773_v7, 16  ;;  %v10975_v10 = vcombine.low %v9487_v21, %v9494_v37 }
 0x121   : > { %10971 = vst [vmem:[#allocation29_spill] sm:$0xff] %v9811_v34  ;;  %7448 = vmatmul.mubr.bf16.vlgmr.msra.gmra.mxu0 %v10973_v15  ;;  %v9856_v41 = vsel %vm8179_vm5, %v6694_v47, %v4767_v36  ;;  %v4175_v22 = vrot.slane %v4173_v9, 4  ;;  %v4178_v32 = vrot.slane %v4176_v40, 5  ;;  %v4186_v23 = vshrl.u32 %v9773_v7, 16  ;;  %v9870_v36 = vld [vmem:[%s7837_s16 + $0x90] sm:$0xe] }
 0x122   : > { %v9849_v29 = vpop.f32.mrf.mxu1  ;;  %7451 = vmatprep.mubr.bf16.mxu0 %v10975_v10  ;;  %v1699_v54 = vpop.f32.mrf.mxu0  ;;  %v4161_v6 = vsel %vm7868_vm2, %v4156_v31, %v9733_v57  ;;  %v4171_v38 = vsel %vm7868_vm2, %v4166_v63, %v4170_v49  ;;  %v9866_v21 = vsel %vm8179_vm5, %v4769_v4, %v4770_v20  ;;  %v4192_v37 = vshll.u32 %v9829_v3, 16  ;;  %v6617_v31 = vld [vmem:[%s7837_s16 + $0xa8] sm:$0xf]  ;;  %v9900_v4 = vld [vmem:[%s7837_s16 + $0xac] sm:$0xf] }
 0x123   : > { %10974 = vst [vmem:[#allocation30_spill] sm:$0xff] %v9849_v29  ;;  %v4197_v47 = vshrl.u32 %v6614_v18, 16  ;;  %v4200_v9 = vshll.u32 %v6614_v18, 16  ;;  %v4206_v8 = vshll.u32 %v9847_v55, 16  ;;  %v4210_v57 = vshrl.u32 %v9847_v55, 16 }
 0x124   : > { %v7113_v5 = vpop.f32.mrf.mxu1  ;;  %7400 = vmatmul.mubr.bf16.vlgmr.msra.gmra.mxu1 %v9512_v16  ;;  %v7162_v40 = vpop.f32.mrf.mxu0  ;;  %v9878_v20 = vcombine.low %v4137_v46, %v4147_v53  ;;  %v9882_v61 = vrot.slane %v4182_v43, 5  ;;  %v9884_v63 = vcombine.low %v4161_v6, %v4171_v38  ;;  %v4179_v60 = vor.u32 %v4178_v32, %v4175_v22  ;;  %v9895_v43 = vld [vmem:[%s7837_s16 + $0xa4] sm:$0x1] }
 0x125   : > { %v1255_v49 = vadd.f32 %v7113_v5, %v9336_v45  ;;  %7403 = vmatprep.mubr.bf16.mxu1 %v9539_v14  ;;  %v4188_v45 = vrot.slane %v4186_v23, 4  ;;  %v9891_v46 = vrot.slane %v4192_v37, 5  ;;  %v6695_v53 = vrot.slane %v9870_v36, 9  ;;  %v10979_v23 = vld [vmem:[#allocation13_spill] sm:$0xff]  ;;  %v10980_v37 = vld [vmem:[#allocation14_spill] sm:$0xff] }
 0x126   : > { %v1246_v16 = vpop.f32.mrf.mxu1  ;;  %v1702_v15 = vpop.f32.mrf.mxu0  ;;  %v4199_v5 = vrot.slane %v4197_v47, 4  ;;  %v4202_v6 = vrot.slane %v4200_v9, 5  ;;  %v9897_v38 = vrot.slane %v4206_v8, 5  ;;  %v4212_v33 = vrot.slane %v4210_v57, 4  ;;  %v10982_v47 = vld [vmem:[#allocation18_spill] sm:$0xff]  ;;  %v10983_v9 = vld [vmem:[#allocation20_spill] sm:$0xff] }
 0x127   : > { %v9888_v18 = vadd.f32 %v7161_v13, %v1255_v49  ;;  %v1247_v14 = vadd.f32 %v1246_v16, %v9364_v48  ;;  %v10978_v13 = vld [vmem:[#allocation4_spill] sm:$0xff]  ;;  %v10981_v49 = vcombine.low %v10979_v23, %v10980_v37  ;;  %v4221_v36 = vshrl.u32 %v6617_v31, 16 }
 0x128   : > { %v7114_v10 = vpop.f32.mrf.mxu1  ;;  %v7165_v32 = vpop.f32.mrf.mxu0  ;;  %v4224_v16 = vshll.u32 %v6617_v31, 16  ;;  %v10984_v8 = vcombine.low %v10982_v47, %v10983_v9  ;;  %v9911_v57 = vrot.slane %v4179_v60, 4  ;;  %v4777_v31 = vrot.slane %v9829_v3, 5  ;;  %v10987_v9 = vld [vmem:[#allocation17_spill] sm:$0xff] }
 0x129   : > { %10976 = vst [vmem:[#allocation31_spill] sm:$0xff] %v9888_v18  ;;  %v9902_v22 = vadd.f32 %v1699_v54, %v1247_v14  ;;  %v1258_v48 = vadd.f32 %v7114_v10, %v10978_v13  ;;  %7452 = vmatmul.mubr.bf16.gmra.mxu0 %v10981_v49  ;;  %v4189_v54 = vor.u32 %v4188_v45, %v9882_v61  ;;  %v4774_v14 = vrot.slane %v9773_v7, 5  ;;  %v6680_v49 = vld [vmem:[%s7837_s16 + $0x9c] sm:$0xe] }
 0x12a   : > { %v1249_v44 = vpop.f32.mrf.mxu1  ;;  %7455 = vmatprep.mubr.bf16.mxu0 %v10984_v8  ;;  %v4216_v10 = vshll.u32 %v9895_v43, 16  ;;  %v1715_v37 = vpop.f32.mrf.mxu0  ;;  %v4230_v24 = vshll.u32 %v9900_v4, 16  ;;  %v4203_v60 = vor.u32 %v4202_v6, %v4199_v5  ;;  %v4213_v45 = vor.u32 %v4212_v33, %v9897_v38 }
 0x12b   : > { %10977 = vst [vmem:[#allocation32_spill] sm:$0xff] %v9902_v22  ;;  %v9916_v13 = vadd.f32 %v7162_v40, %v1258_v48  ;;  %v1250_v23 = vadd.f32 %v1249_v44, %v10986_v17  ;;  %v4781_v7 = vrot.slane %v9847_v55, 5  ;;  %v4234_v40 = vshrl.u32 %v9900_v4, 16  ;;  %v10988_v17 = vld [vmem:[#allocation8_spill] sm:$0xff]  ;;  %v10989_v55 = vld [vmem:[#allocation10_spill] sm:$0xff] }
 0x12c   : > { %v7117_v47 = vpop.f32.mrf.mxu1  ;;  %7404 = vmatmul.mubr.bf16.gmra.mxu1 %v10987_v9  ;;  %v7166_v8 = vpop.f32.mrf.mxu0  ;;  %v4223_v3 = vrot.slane %v4221_v36, 4  ;;  %v4190_v18 = vrot.slane %v4189_v54, 4  ;;  %v4776_v9 = vrot.slane %v4774_v14, 4  ;;  %v4218_v5 = vrot.slane %v4216_v10, 5  ;;  %v10990_v10 = vld [vmem:[#allocation12_spill] sm:$0xff] }
 0x12d   : > { %10985 = vst [vmem:[#allocation4_spill] sm:$0xff] %v9916_v13  ;;  %v9926_v48 = vadd.f32 %v1702_v15, %v1250_v23  ;;  %v1271_v44 = vadd.f32 %v7117_v47, %v10988_v17  ;;  %7407 = vmatprep.mubr.bf16.mxu1 %v9791_v11  ;;  %v4226_v13 = vrot.slane %v4224_v16, 5  ;;  %v6696_v6 = vrot.slane %v6680_v49, 9 }
 0x12e   : > { %v1262_v22 = vpop.f32.mrf.mxu1  ;;  %v1718_v34 = vpop.f32.mrf.mxu0  ;;  %v9936_v15 = vrot.slane %v4230_v24, 5  ;;  %v4236_v23 = vrot.slane %v4234_v40, 4  ;;  %v4204_v17 = vrot.slane %v4203_v60, 4  ;;  %v4214_v11 = vrot.slane %v4213_v45, 4 }
 0x12f   : > { %v9930_v33 = vadd.f32 %v7165_v32, %v1271_v44  ;;  %v1263_v29 = vadd.f32 %v1262_v22, %v10989_v55  ;;  %v4783_v36 = vrot.slane %v4781_v7, 4  ;;  %v4784_v16 = vrot.slane %v9895_v43, 5  ;;  %v6681_v43 = vld [vmem:[%s7837_s16 + $0xa8] sm:$0xe] }
 0x130   : > { %v7118_v47 = vpop.f32.mrf.mxu1  ;;  %v7169_v49 = vpop.f32.mrf.mxu0  ;;  %v10991_v22 = vcombine.low %v9637_v0, %v9671_v51  ;;  %v9947_v24 = vsel %vm8179_vm5, %v6695_v53, %v4774_v14  ;;  %v4227_v60 = vor.u32 %v4226_v13, %v4223_v3  ;;  %v10992_v45 = vcombine.low %v9702_v30, %v9712_v42  ;;  %v10993_v42 = vld [vmem:[#allocation16_spill] sm:$0xff]  ;;  %v10994_v3 = vld [vmem:[#allocation21_spill] sm:$0xff] }
 0x131   : > { %v9939_v54 = vadd.f32 %v1715_v37, %v1263_v29  ;;  %v1274_v32 = vadd.f32 %v7118_v47, %v10990_v10  ;;  %v4185_v29 = vsel %vm7868_vm2, %v9911_v57, %v9882_v61  ;;  %v4195_v51 = vsel %vm7868_vm2, %v4190_v18, %v9891_v46  ;;  %v6620_v57 = vld [vmem:[%s7837_s16 + $0xb4] sm:$0xf] }
 0x132   : > { %7456 = vmatmul.mubr.bf16.gmra.mxu0 %v10991_v22  ;;  %v1265_v40 = vpop.f32.mrf.mxu1  ;;  %v9961_v0 = vsel %vm8179_vm5, %v4776_v9, %v4777_v31  ;;  %v4240_v53 = vshll.u32 %v9934_v62, 16  ;;  %v1731_v13 = vpop.f32.mrf.mxu0  ;;  %v4237_v37 = vor.u32 %v4236_v23, %v9936_v15  ;;  %v4788_v61 = vrot.slane %v9900_v4, 5  ;;  %v9992_v23 = vld [vmem:[%s7837_s16 + $0xb8] sm:$0xf] }
 0x133   : > { %7459 = vmatprep.mubr.bf16.mxu0 %v10992_v45  ;;  %v9965_v14 = vadd.f32 %v7166_v8, %v1274_v32  ;;  %v1266_v30 = vadd.f32 %v1265_v40, %v10993_v42  ;;  %v4209_v18 = vsel %vm7868_vm2, %v4204_v17, %v9897_v38  ;;  %v4219_v46 = vsel %vm7868_vm2, %v4214_v11, %v4218_v5  ;;  %v10996_v45 = vld [vmem:[#allocation25_spill] sm:$0xff] }
 0x134   : > { %v7121_v44 = vpop.f32.mrf.mxu1  ;;  %7408 = vmatmul.mubr.bf16.gmra.mxu1 %v9807_v2  ;;  %v9979_v31 = vsel %vm8179_vm5, %v6696_v6, %v4781_v7  ;;  %v9983_v8 = vsel %vm8179_vm5, %v4783_v36, %v4784_v16  ;;  %v7170_v2 = vpop.f32.mrf.mxu0  ;;  %v9989_v55 = vrot.slane %v4227_v60, 4  ;;  %v6697_v38 = vrot.slane %v6681_v43, 9 }
 0x135   : > { %v9985_v4 = vadd.f32 %v1718_v34, %v1266_v30  ;;  %v1287_v9 = vadd.f32 %v7121_v44, %v10994_v3  ;;  %7411 = vmatprep.mubr.bf16.mxu1 %v9818_v25  ;;  %v4242_v47 = vrot.slane %v4240_v53, 5  ;;  %v4791_v7 = vrot.slane %v9934_v62, 5  ;;  %v10995_v34 = vld [vmem:[#allocation23_spill] sm:$0xff]  ;;  %v6623_v30 = vld [vmem:[%s7837_s16 + $0xc0] sm:$0xf] }
 0x136   : > { %v1278_v5 = vpop.f32.mrf.mxu1  ;;  %v4245_v6 = vshrl.u32 %v6620_v57, 16  ;;  %v4248_v17 = vshll.u32 %v6620_v57, 16  ;;  %v1734_v16 = vpop.f32.mrf.mxu0  ;;  %v4238_v10 = vrot.slane %v4237_v37, 4  ;;  %v4790_v25 = vrot.slane %v4788_v61, 4  ;;  %v10016_v37 = vld [vmem:[%s7837_s16 + $0xc4] sm:$0xf] }
 0x137   : > { %v9995_v11 = vadd.f32 %v7169_v49, %v1287_v9  ;;  %v1279_v36 = vadd.f32 %v1278_v5, %v10995_v34  ;;  %v9998_v22 = vcombine.low %v4185_v29, %v4195_v51  ;;  %v6727_v60 = vcombine.low %v9947_v24, %v9961_v0  ;;  %v10030_v44 = vld [vmem:[%s7837_s16 + $0xbc] sm:$0x1]  ;;  %v10999_v9 = vld [vmem:[#allocation27_spill] sm:$0xff]  ;;  %v6683_v24 = vld [vmem:[%s7837_s16 + $0xc0] sm:$0xe] }
 0x138   : > { %v7122_v32 = vpop.f32.mrf.mxu1  ;;  %v10002_v40 = vcombine.low %v4209_v18, %v4219_v46  ;;  %v4254_v62 = vshll.u32 %v9992_v23, 16  ;;  %v7173_v43 = vpop.f32.mrf.mxu0  ;;  %v10997_v42 = vcombine.low %v9744_v12, %v9757_v39  ;;  %v6728_v29 = vcombine.low %v9979_v31, %v9983_v8 }
 0x139   : > { %v10005_v49 = vadd.f32 %v1731_v13, %v1279_v36  ;;  %v1290_v53 = vadd.f32 %v7122_v32, %v10996_v45  ;;  %v4258_v51 = vshrl.u32 %v9992_v23, 16  ;;  %v10998_v13 = vcombine.low %v9826_v50, %v9843_v1 }
 0x13a   : > { %7460 = vmatmul.mubr.bf16.gmra.mxu0 %v10997_v42  ;;  %v1281_v57 = vpop.f32.mrf.mxu1  ;;  %v4233_v12 = vsel %vm7868_vm2, %v9989_v55, %v9936_v15  ;;  %v10027_v39 = vsel %vm8179_vm5, %v6697_v38, %v4788_v61  ;;  %v4247_v18 = vrot.slane %v4245_v6, 4  ;;  %v4250_v46 = vrot.slane %v4248_v17, 5  ;;  %v1747_v34 = vpop.f32.mrf.mxu0  ;;  %v6682_v15 = vld [vmem:[%s7837_s16 + $0xb4] sm:$0xe]  ;;  %v7720_v61 = vld [vmem:[%s10833_s3 + $0x38] sm:$0xff]  }
 0x13b   : > { %7463 = vmatprep.mubr.bf16.mxu0 %v10998_v13  ;;  %v10032_v3 = vadd.f32 %v7170_v2, %v1290_v53  ;;  %v1282_v5 = vadd.f32 %v1281_v57, %v10999_v9  ;;  %v4243_v50 = vsel %vm7868_vm2, %v4238_v10, %v4242_v47  ;;  %v10039_v1 = vsel %vm8179_vm5, %v4790_v25, %v4791_v7  ;;  %v7721_v2 = vld [vmem:[%s10836_s6 + $0x38] sm:$0xff]   ;;  %v10067_v13 = vld [vmem:[%s7837_s16 + $0xc8] sm:$0x1] }
 0x13c   : > { %v7125_v55 = vpop.f32.mrf.mxu1  ;;  %7412 = vmatmul.mubr.bf16.gmra.mxu1 %v9820_v59  ;;  %v10049_v38 = vrot.slane %v4254_v62, 5  ;;  %v4269_v6 = vshrl.u32 %v6623_v30, 16  ;;  %v4272_v47 = vshll.u32 %v6623_v30, 16  ;;  %v4278_v17 = vshll.u32 %v10016_v37, 16  ;;  %v7174_v10 = vpop.f32.mrf.mxu0  ;;  %7479 = vmatprep.subr.bf16.mxu1 %v7720_v61 }
 0x13d   : > { %v10052_v7 = vadd.f32 %v1734_v16, %v1282_v5  ;;  %v1303_v36 = vadd.f32 %v7125_v55, %v9736_v52  ;;  %7415 = vmatprep.mubr.bf16.mxu1 %v9878_v20  ;;  %v4260_v25 = vrot.slane %v4258_v51, 4  ;;  %v4282_v32 = vshrl.u32 %v10016_v37, 16  ;;  %7527 = vmatprep.subr.bf16.mxu0 %v7721_v2 }
 0x13e   : > { %v1294_v45 = vpop.f32.mrf.mxu1  ;;  %v4251_v59 = vor.u32 %v4250_v46, %v4247_v18  ;;  %v4264_v62 = vshll.u32 %v10030_v44, 16  ;;  %v6698_v53 = vrot.slane %v6682_v15, 9  ;;  %v4795_v42 = vrot.slane %v9992_v23, 5  ;;  %7480 = vmatpush3.bf16.msra.mxu1 %v7720_v61  ;;  %v1750_v30 = vpop.f32.mrf.mxu0  ;;  %7528 = vmatpush3.bf16.msra.mxu0 %v7721_v2  ;;  %v6626_v61 = vld [vmem:[%s7837_s16 + $0xcc] sm:$0xf] }
 0x13f   : > { %v10059_v16 = vadd.f32 %v7173_v43, %v1303_v36  ;;  %v1295_v52 = vadd.f32 %v1294_v45, %v9760_v58  ;;  %v10062_v20 = vcombine.low %v4233_v12, %v4243_v50  ;;  %v6729_v51 = vcombine.low %v10027_v39, %v10039_v1  ;;  %v7723_v36 = vld [vmem:[%s10836_s6 + $0x30] sm:$0xff]   ;;  %v7724_v39 = vld [vmem:[%s10833_s3 + $0x28] sm:$0xff]  }
 0x140   : > { %v7126_v57 = vpop.f32.mrf.mxu1  ;;  %v4271_v18 = vrot.slane %v4269_v6, 4  ;;  %v4274_v46 = vrot.slane %v4272_v47, 5  ;;  %v10069_v23 = vrot.slane %v4278_v17, 5  ;;  %v4284_v43 = vrot.slane %v4282_v32, 4  ;;  %v7177_v5 = vpop.f32.mrf.mxu0  ;;  %7529 = vmatprep.subr.bf16.mxu0 %v7723_v36  ;;  %v7725_v1 = vld [vmem:[%s10836_s6 + $0x28] sm:$0xff]  }
 0x141   : > { %v10071_v9 = vadd.f32 %v1747_v34, %v1295_v52  ;;  %v1306_v58 = vadd.f32 %v7126_v57, %v9775_v28  ;;  %v11000_v12 = vcombine.low %v9856_v41, %v9866_v21  ;;  %v4261_v50 = vor.u32 %v4260_v25, %v10049_v38  ;;  %v10092_v21 = vld [vmem:[%s7837_s16 + $0xd0] sm:$0xf] }
 0x142   : > { %v4798_v15 = vrot.slane %v10030_v44, 5  ;;  %v1297_v2 = vpop.f32.mrf.mxu1  ;;  %v10083_v34 = vrot.slane %v4251_v59, 4  ;;  %v10085_v55 = vrot.slane %v4264_v62, 5  ;;  %v10089_v28 = vsel %vm8179_vm5, %v6698_v53, %v4795_v42  ;;  %v1763_v47 = vpop.f32.mrf.mxu0  ;;  %v11001_v62 = vld [vmem:[#allocation2_spill] sm:$0xff]  ;;  %7530 = vmatpush3.bf16.msra.mxu0 %v7723_v36  ;;  %v6628_v36 = vld [vmem:[%s7837_s16 + $0xd4] sm:$0x1] }
 0x143   : > { %7464 = vmatmul.mubr.bf16.gmra.mxu0 %v11000_v12  ;;  %v4797_v41 = vrot.slane %v4795_v42, 4  ;;  %v10094_v6 = vadd.f32 %v7174_v10, %v1306_v58  ;;  %v1298_v44 = vadd.f32 %v1297_v2, %v9795_v35  ;;  %v4288_v17 = vshll.u32 %v10067_v13, 16  ;;  %7531 = vmatprep.subr.bf16.mxu0 %v7725_v1 }
 0x144   : > { %7467 = vmatprep.mubr.bf16.mxu0 %v6727_v60  ;;  %v4802_v0 = vrot.slane %v10016_v37, 5  ;;  %v7722_v60 = vld [vmem:[%s10833_s3 + $0x30] sm:$0xff]   ;;  %v7129_v25 = vpop.f32.mrf.mxu1  ;;  %7416 = vmatmul.mubr.bf16.gmra.mxu1 %v9884_v63  ;;  %v4275_v10 = vor.u32 %v4274_v46, %v4271_v18  ;;  %v4285_v35 = vor.u32 %v4284_v43, %v10069_v23  ;;  %v4293_v32 = vshrl.u32 %v6626_v61, 16  ;;  %v7178_v53 = vpop.f32.mrf.mxu0  ;;  %v11002_v43 = vld [vmem:[#allocation5_spill] sm:$0xff] }
 0x145   : > { %v4296_v45 = vshll.u32 %v6626_v61, 16  ;;  %v10108_v59 = vadd.f32 %v1750_v30, %v1298_v44  ;;  %v1319_v37 = vadd.f32 %v7129_v25, %v11001_v62  ;;  %7419 = vmatprep.mubr.bf16.mxu1 %v9998_v22  ;;  %v4302_v42 = vshll.u32 %v10092_v21, 16  ;;  %7481 = vmatprep.subr.bf16.mxu1 %v7722_v60 }
 0x146   : > { %v4306_v52 = vshrl.u32 %v10092_v21, 16  ;;  %v1310_v57 = vpop.f32.mrf.mxu1  ;;  %v4262_v58 = vrot.slane %v4261_v50, 4  ;;  %v10116_v63 = vsel %vm8179_vm5, %v4797_v41, %v4798_v15  ;;  %v6699_v18 = vrot.slane %v6683_v24, 9  ;;  %7482 = vmatpush3.bf16.msra.mxu1 %v7722_v60  ;;  %v10122_v12 = vpop.f32.mrf.mxu0  ;;  %7532 = vmatpush3.bf16.msra.mxu0 %v7725_v1 }
 0x147   : > { %v4805_v30 = vrot.slane %v10067_v13, 5  ;;  %v10119_v46 = vadd.f32 %v7177_v5, %v1319_v37  ;;  %v1311_v22 = vadd.f32 %v1310_v57, %v11002_v43  ;;  %v4290_v61 = vrot.slane %v4288_v17, 5  ;;  %v11003_v13 = vld [vmem:[#allocation3_spill] sm:$0xff]  ;;  %7483 = vmatprep.subr.bf16.mxu1 %v7724_v39 }
 0x148   : > { %v4804_v2 = vrot.slane %v4802_v0, 4  ;;  %v7130_v50 = vpop.f32.mrf.mxu1  ;;  %v4276_v44 = vrot.slane %v4275_v10, 4  ;;  %v4286_v25 = vrot.slane %v4285_v35, 4  ;;  %v4295_v15 = vrot.slane %v4293_v32, 4  ;;  %v6684_v32 = vld [vmem:[%s7837_s16 + $0xcc] sm:$0xe] }
 0x149   : > { %v4298_v41 = vrot.slane %v4296_v45, 5  ;;  %v10124_v24 = vadd.f32 %v1763_v47, %v1311_v22  ;;  %v1322_v60 = vadd.f32 %v7130_v50, %v11003_v13  ;;  %v7181_v5 = vpop.f32.mrf.mxu0  ;;  %v10130_v62 = vrot.slane %v4302_v42, 5  ;;  %v11004_v45 = vld [vmem:[#allocation9_spill] sm:$0xff] }
 0x14a   : > { %v4308_v17 = vrot.slane %v4306_v52, 4  ;;  %v10132_v37 = vpop.f32.mrf.mxu1  ;;  %v4809_v47 = vrot.slane %v10092_v21, 5  ;;  %v4257_v31 = vsel %vm7868_vm2, %v10083_v34, %v10049_v38  ;;  %v4803_v8 = vsel %vm8179_vm5, %v6699_v18, %v4802_v0  ;;  %7484 = vmatpush3.bf16.msra.mxu1 %v7724_v39  ;;  %v11007_v39 = vld [vmem:[#allocation22_spill] sm:$0xff] }
 0x14b   : > { %7468 = vmatmul.mubr.bf16.gmra.mxu0 %v6728_v29  ;;  %v10139_v10 = vadd.f32 %v7178_v53, %v1322_v60  ;;  %v1779_v35 = vpop.f32.mrf.mxu0  ;;  %v4806_v29 = vsel %vm8179_vm5, %v4804_v2, %v4805_v30  ;;  %v4267_v38 = vsel %vm7868_vm2, %v4262_v58, %v10085_v55  ;;  %v6730_v34 = vcombine.low %v10089_v28, %v10116_v63  ;;  %v11005_v30 = vld [vmem:[#allocation11_spill] sm:$0xff] }
 0x14c   : > { %7471 = vmatprep.mubr.bf16.mxu0 %v6729_v51  ;;  %v7133_v51 = vpop.f32.mrf.mxu1  ;;  %7420 = vmatmul.mubr.bf16.gmra.mxu1 %v10002_v40  ;;  %v4281_v21 = vsel %vm7868_vm2, %v4276_v44, %v10069_v23  ;;  %v4299_v0 = vor.u32 %v4298_v41, %v4295_v15  ;;  %v4291_v40 = vsel %vm7868_vm2, %v4286_v25, %v4290_v61  ;;  %v4312_v57 = vshll.u32 %v6628_v36, 16  ;;  %v11006_v25 = vld [vmem:[#allocation15_spill] sm:$0xff] }
 0x14d   : > { %v1335_v53 = vadd.f32 %v7133_v51, %v11004_v45  ;;  %v7182_v42 = vpop.f32.mrf.mxu0  ;;  %7423 = vmatprep.mubr.bf16.mxu1 %v10062_v20  ;;  %v4309_v52 = vor.u32 %v4308_v17, %v10130_v62  ;;  %v6731_v58 = vcombine.low %v4803_v8, %v4806_v29  ;;  %v6700_v28 = vrot.slane %v6684_v32, 9  ;;  %v7727_v29 = vld [vmem:[%s10836_s6 + $0x20] sm:$0xff]  }
 0x14e   : > { %v1326_v55 = vpop.f32.mrf.mxu1  ;;  %v4811_v63 = vrot.slane %v4809_v47, 4  ;;  %v4812_v18 = vrot.slane %v6628_v36, 5  ;;  %v6658_v61 = vcombine.low %v4257_v31, %v4267_v38  ;;  %v6659_v2 = vcombine.low %v4281_v21, %v4291_v40  ;;  %7533 = vmatprep.subr.bf16.mxu0 %v7727_v29 }
 0x14f   : > { %v10170_v23 = vadd.f32 %v7181_v5, %v1335_v53  ;;  %v1327_v43 = vadd.f32 %v1326_v55, %v11005_v30  ;;  %v10173_v22 = vpop.f32.mrf.mxu0  ;;  %v4300_v50 = vrot.slane %v4299_v0, 4  ;;  %v4310_v13 = vrot.slane %v4309_v52, 4  ;;  %v11008_v0 = vld [vmem:[#allocation24_spill] sm:$0xff]  ;;  %7534 = vmatpush3.bf16.msra.mxu0 %v7727_v29  ;;  %v11009_v52 = vld [vmem:[#allocation26_spill] sm:$0xff]  ;;  %v7729_v30 = vld [vmem:[%s10836_s6 + $0x18] sm:$0xff]  }
 0x150   : > { %v7134_v20 = vpop.f32.mrf.mxu1  ;;  %v4314_v60 = vrot.slane %v4312_v57, 5  ;;  %v4810_v5 = vsel %vm8179_vm5, %v6700_v28, %v4809_v47  ;;  %v4813_v36 = vsel %vm8179_vm5, %v4811_v63, %v4812_v18  ;;  %v7728_v18 = vld [vmem:[%s10833_s3 + $0x18] sm:$0xff]   ;;  %7535 = vmatprep.subr.bf16.mxu0 %v7729_v30 }
 0x151   : > { %v10175_v44 = vadd.f32 %v1779_v35, %v1327_v43  ;;  %v1338_v15 = vadd.f32 %v7134_v20, %v11006_v25  ;;  %v7185_v41 = vpop.f32.mrf.mxu0  ;;  %v7726_v35 = vld [vmem:[%s10833_s3 + $0x20] sm:$0xff]   ;;  %v4305_v47 = vsel %vm7868_vm2, %v4300_v50, %v10130_v62  ;;  %v6732_v38 = vcombine.low %v4810_v5, %v4813_v36  ;;  %v11010_v25 = vld [vmem:[#allocation28_spill] sm:$0xff]  ;;  %v11011_v5 = vld [vmem:[#allocation29_spill] sm:$0xff] }
 0x152   : > { %v10178_v17 = vpop.f32.mrf.mxu1  ;;  %v4315_v51 = vsel %vm7868_vm2, %v4310_v13, %v4314_v60  ;;  %7485 = vmatprep.subr.bf16.mxu1 %v7726_v35 }
 0x153   : > { %7472 = vmatmul.mubr.bf16.gmra.mxu0 %v6730_v34  ;;  %v10184_v31 = vadd.f32 %v7182_v42, %v1338_v15  ;;  %v1795_v8 = vpop.f32.mrf.mxu0  ;;  %7486 = vmatpush3.bf16.msra.mxu1 %v7726_v35  ;;  %v6660_v62 = vcombine.low %v4305_v47, %v4315_v51 }
 0x154   : > { %7475 = vmatprep.mubr.bf16.mxu0 %v6731_v58  ;;  %v7137_v32 = vpop.f32.mrf.mxu1  ;;  %7424 = vmatmul.mubr.bf16.gmra.mxu1 %v6658_v61 }
 0x155   : > { %v1351_v56 = vadd.f32 %v7137_v32, %v11007_v39  ;;  %v7186_v1 = vpop.f32.mrf.mxu0  ;;  %7427 = vmatprep.mubr.bf16.mxu1 %v6659_v2  ;;  %7487 = vmatprep.subr.bf16.mxu1 %v7728_v18  ;;  %v7730_v39 = vld [vmem:[%s10833_s3 + $0x10] sm:$0xff]  }
 0x156   : > { %v1342_v34 = vpop.f32.mrf.mxu1  ;;  %7536 = vmatpush3.bf16.msra.mxu0 %v7729_v30 }
 0x157   : > { %v10198_v21 = vadd.f32 %v7185_v41, %v1351_v56  ;;  %v1343_v45 = vadd.f32 %v1342_v34, %v11008_v0  ;;  %v1798_v53 = vpop.f32.mrf.mxu0  ;;  %7488 = vmatpush3.bf16.msra.mxu1 %v7728_v18  ;;  %v7731_v56 = vld [vmem:[%s10836_s6 + $0x10] sm:$0xff]  }
 0x158   : > { %v7138_v42 = vpop.f32.mrf.mxu1  ;;  %7489 = vmatprep.subr.bf16.mxu1 %v7730_v39  ;;  %7537 = vmatprep.subr.bf16.mxu0 %v7731_v56 }
 0x159   : > { %v10201_v40 = vadd.f32 %v1795_v8, %v1343_v45  ;;  %v1354_v57 = vadd.f32 %v7138_v42, %v11009_v52  ;;  %v7189_v55 = vpop.f32.mrf.mxu0  ;;  %v11014_v42 = vld [vmem:[#allocation32_spill] sm:$0xff] }
 0x15a   : > { %v1345_v27 = vpop.f32.mrf.mxu1  ;;  %7538 = vmatpush3.bf16.msra.mxu0 %v7731_v56 }
 0x15b   : > { %7476 = vmatmul.mubr.bf16.gmra.mxu0 %v6732_v38  ;;  %v10204_v58 = vadd.f32 %v7186_v1, %v1354_v57  ;;  %v1346_v28 = vadd.f32 %v1345_v27, %v9729_v26  ;;  %v1811_v63 = vpop.f32.mrf.mxu0  ;;  %v11013_v38 = vld [vmem:[#allocation31_spill] sm:$0xff]  ;;  %7490 = vmatpush3.bf16.msra.mxu1 %v7730_v39 }
 0x15c   : > { %v7141_v43 = vpop.f32.mrf.mxu1  ;;  %7428 = vmatmul.mubr.bf16.gmra.mxu1 %v6660_v62 }
 0x15d   : > { %v10213_v20 = vadd.f32 %v1798_v53, %v1346_v28  ;;  %v1367_v61 = vadd.f32 %v7141_v43, %v9766_v19  ;;  %v7190_v2 = vpop.f32.mrf.mxu0  ;;  %v11012_v19 = vld [vmem:[#allocation30_spill] sm:$0xff]  ;;  %v11015_v28 = vld [vmem:[#allocation4_spill] sm:$0xff] }
 0x15e   : > { %v1358_v50 = vpop.f32.mrf.mxu1 }
 0x15f   : > { %v10216_v26 = vadd.f32 %v7189_v55, %v1367_v61  ;;  %v1359_v15 = vadd.f32 %v1358_v50, %v11010_v25  ;;  %v1814_v41 = vpop.f32.mrf.mxu0  ;;  %v7733_v55 = vld [vmem:[%s10836_s6 + $0x8] sm:$0xff]  }
 0x160   : > { %v7142_v13 = vpop.f32.mrf.mxu1  ;;  %7539 = vmatprep.subr.bf16.mxu0 %v7733_v55 }
 0x161   : > { %v10219_v60 = vadd.f32 %v1811_v63, %v1359_v15  ;;  %v1370_v36 = vadd.f32 %v7142_v13, %v11011_v5  ;;  %v7257_v8 = vpop.f32.mrf.mxu0  ;;  %7540 = vmatpush3.bf16.msra.mxu0 %v7733_v55  ;;  %v7734_v13 = vld [vmem:[%s10836_s6] sm:$0xff]  }
 0x162   : > { %v1361_v35 = vpop.f32.mrf.mxu1  ;;  %7541 = vmatprep.subr.bf16.mxu0 %v7734_v13 }
 0x163   : > { %v10222_v29 = vadd.f32 %v7190_v2, %v1370_v36  ;;  %v1362_v32 = vadd.f32 %v1361_v35, %v11012_v19  ;;  %v2840_v47 = vpop.f32.mrf.mxu0  ;;  %v7732_v36 = vld [vmem:[%s10833_s3 + $0x8] sm:$0xff]   ;;  %v7736_v19 = vld [vmem:[%s10262_s14] sm:$0xff]  }
 0x164   : > { %v7209_v1 = vpop.f32.mrf.mxu1  ;;  %7491 = vmatprep.subr.bf16.mxu1 %v7732_v36  ;;  %7543 = vmatprep.mubr.bf16.mxu0 %v7736_v19 }
 0x165   : > { %v10231_v51 = vadd.f32 %v1814_v41, %v1362_v32  ;;  %v2215_v34 = vadd.f32 %v7209_v1, %v11013_v38  ;;  %v7258_v0 = vpop.f32.mrf.mxu0  ;;  %7542 = vmatpush3.bf16.msra.mxu0 %v7734_v13  ;;  %7492 = vmatpush3.bf16.msra.mxu1 %v7732_v36 }
 0x166   : > { %v2086_v45 = vpop.f32.mrf.mxu1 }
 0x167   : > { %v10234_v53 = vadd.f32 %v7257_v8, %v2215_v34  ;;  %v2213_v62 = vadd.f32 %v2086_v45, %v11014_v42  ;;  %v2843_v52 = vpop.f32.mrf.mxu0 }
 0x168   : > { %v7210_v57 = vpop.f32.mrf.mxu1 }
 0x169   : > { %v10240_v27 = vadd.f32 %v2840_v47, %v2213_v62  ;;  %v2216_v63 = vadd.f32 %v7210_v57, %v11015_v28  ;;  %v7261_v18 = vpop.f32.mrf.mxu0 }
 0x16a   : > { %v2089_v30 = vpop.f32.mrf.mxu1 }
 0x16b   : > { %v10243_v43 = vadd.f32 %v7258_v0, %v2216_v63  ;;  %v2214_v61 = vadd.f32 %v2089_v30, %v9926_v48  ;;  %v2856_v2 = vpop.f32.mrf.mxu0  ;;  %v7735_v0 = vld [vmem:[%s10833_s3] sm:$0xff]   ;;  %v7738_v63 = vld [vmem:[%s10262_s14 + $0x10] sm:$0xff]  }
 0x16c   : > { %v7213_v50 = vpop.f32.mrf.mxu1  ;;  %7493 = vmatprep.subr.bf16.mxu1 %v7735_v0 }
 0x16d   : > { %v10246_v25 = vadd.f32 %v2843_v52, %v2214_v61  ;;  %v2219_v15 = vadd.f32 %v7213_v50, %v9930_v33  ;;  %v7262_v41 = vpop.f32.mrf.mxu0  ;;  %7494 = vmatpush3.bf16.msra.mxu1 %v7735_v0 }
 0x16e   : > { %v2102_v5 = vpop.f32.mrf.mxu1 }
 0x16f   : > { %v10256_v8 = vadd.f32 %v7261_v18, %v2219_v15  ;;  %v2217_v48 = vadd.f32 %v2102_v5, %v9939_v54  ;;  %v2859_v35 = vpop.f32.mrf.mxu0  ;;  %v7737_v54 = vld [vmem:[%s10262_s14 + $0x8] sm:$0xff]  }
 0x170   : > { %v7214_v33 = vpop.f32.mrf.mxu1  ;;  %7544 = vmatmul.mubr.bf16.vlgmr.msra.gmra.mxu0 %v7737_v54 }
 0x171   : > { %v10265_v32 = vadd.f32 %v2856_v2, %v2217_v48  ;;  %v2220_v47 = vadd.f32 %v7214_v33, %v9965_v14  ;;  %v7265_v39 = vpop.f32.mrf.mxu0  ;;  %v7739_v2 = vld [vmem:[%s10262_s14 + $0x18] sm:$0xff]   ;;  %7547 = vmatprep.mubr.bf16.mxu0 %v7738_v63 }
 0x172   : > { %v2105_v56 = vpop.f32.mrf.mxu1 }
 0x173   : > { %v10269_v1 = vadd.f32 %v7262_v41, %v2220_v47  ;;  %v2218_v38 = vadd.f32 %v2105_v56, %v9985_v4  ;;  %v2872_v34 = vpop.f32.mrf.mxu0  ;;  %v7740_v47 = vld [vmem:[%s10262_s14 + $0x20] sm:$0xff]   ;;  %v7741_v56 = vld [vmem:[%s10262_s14 + $0x28] sm:$0xff]  }
 0x174   : > { %v7217_v45 = vpop.f32.mrf.mxu1 }
 0x175   : > { %v10275_v42 = vadd.f32 %v2859_v35, %v2218_v38  ;;  %v2223_v14 = vadd.f32 %v7217_v45, %v9995_v11  ;;  %v7266_v62 = vpop.f32.mrf.mxu0  ;;  %v11016_v45 = vld [vmem:[#allocation7_spill] sm:$0xff] }
 0x176   : > { %v2118_v52 = vpop.f32.mrf.mxu1 }
 0x177   : > { %v10278_v57 = vadd.f32 %v7265_v39, %v2223_v14  ;;  %v2221_v4 = vadd.f32 %v2118_v52, %v10005_v49  ;;  %v2875_v55 = vpop.f32.mrf.mxu0  ;;  %v1314_v14 = vadd.f32 %v10132_v37, %v11016_v45 }
 0x178   : > { %v7218_v28 = vpop.f32.mrf.mxu1  ;;  %7548 = vmatmul.mubr.bf16.gmra.mxu0 %v7739_v2 }
 0x179   : > { %v10282_v18 = vadd.f32 %v2872_v34, %v2221_v4  ;;  %v2224_v30 = vadd.f32 %v7218_v28, %v10032_v3  ;;  %v7269_v61 = vpop.f32.mrf.mxu0  ;;  %7551 = vmatprep.mubr.bf16.mxu0 %v7740_v47 }
 0x17a   : > { %v2121_v50 = vpop.f32.mrf.mxu1 }
 0x17b   : > { %v10286_v11 = vadd.f32 %v7266_v62, %v2224_v30  ;;  %v2222_v15 = vadd.f32 %v2121_v50, %v10052_v7  ;;  %v2888_v41 = vpop.f32.mrf.mxu0 }
 0x17c   : > { %v7221_v49 = vpop.f32.mrf.mxu1 }
 0x17d   : > { %v10289_v13 = vadd.f32 %v2875_v55, %v2222_v15  ;;  %v2227_v5 = vadd.f32 %v7221_v49, %v10059_v16  ;;  %v7270_v36 = vpop.f32.mrf.mxu0  ;;  %v7743_v15 = vld [vmem:[%s10262_s14 + $0x38] sm:$0xff]  }
 0x17e   : > { %v2134_v48 = vpop.f32.mrf.mxu1 }
 0x17f   : > { %v10292_v3 = vadd.f32 %v7269_v61, %v2227_v5  ;;  %v2225_v35 = vadd.f32 %v2134_v48, %v10071_v9  ;;  %v2891_v33 = vpop.f32.mrf.mxu0  ;;  %v1843_v61 = vadd.f32 %v10122_v12, %v1314_v14 }
 0x180   : > { %v7222_v19 = vpop.f32.mrf.mxu1  ;;  %7552 = vmatmul.mubr.bf16.gmra.mxu0 %v7741_v56  ;;  %v7744_v56 = vld [vmem:[%s10262_s14 + $0x40] sm:$0xff]  }
 0x181   : > { %v10296_v39 = vadd.f32 %v2888_v41, %v2225_v35  ;;  %v2228_v7 = vadd.f32 %v7222_v19, %v10094_v6  ;;  %v7273_v54 = vpop.f32.mrf.mxu0 }
 0x182   : > { %v2137_v38 = vpop.f32.mrf.mxu1 }
 0x183   : > { %v10300_v34 = vadd.f32 %v7270_v36, %v2228_v7  ;;  %v2226_v16 = vadd.f32 %v2137_v38, %v10108_v59  ;;  %v2904_v0 = vpop.f32.mrf.mxu0  ;;  %v7742_v59 = vld [vmem:[%s10262_s14 + $0x30] sm:$0xff]   ;;  %v11017_v36 = vld [vmem:[#allocation19_spill] sm:$0xff] }
 0x184   : > { %v7225_v9 = vpop.f32.mrf.mxu1  ;;  %7555 = vmatprep.mubr.bf16.mxu0 %v7742_v59  ;;  %v1330_v48 = vadd.f32 %v10178_v17, %v11017_v36 }
 0x185   : > { %v10305_v62 = vadd.f32 %v2891_v33, %v2226_v16  ;;  %v2231_v6 = vadd.f32 %v7225_v9, %v10119_v46  ;;  %v7274_v52 = vpop.f32.mrf.mxu0  ;;  %v7745_v9 = vld [vmem:[%s10262_s14 + $0x48] sm:$0xff]  }
 0x186   : > { %v2150_v4 = vpop.f32.mrf.mxu1  ;;  %v1847_v38 = vadd.f32 %v10173_v22, %v1330_v48 }
 0x187   : > { %v10308_v55 = vadd.f32 %v7273_v54, %v2231_v6  ;;  %v2229_v28 = vadd.f32 %v2150_v4, %v10124_v24  ;;  %v2907_v63 = vpop.f32.mrf.mxu0 }
 0x188   : > { %v7226_v30 = vpop.f32.mrf.mxu1  ;;  %7556 = vmatmul.mubr.bf16.gmra.mxu0 %v7743_v15 }
 0x189   : > { %v10313_v2 = vadd.f32 %v2904_v0, %v2229_v28  ;;  %v2232_v50 = vadd.f32 %v7226_v30, %v10139_v10  ;;  %v7277_v37 = vpop.f32.mrf.mxu0  ;;  %7559 = vmatprep.mubr.bf16.mxu0 %v7744_v56 }
 0x18a   : > { %v2153_v41 = vpop.f32.mrf.mxu1 }
 0x18b   : > { %v10317_v46 = vadd.f32 %v7274_v52, %v2232_v50  ;;  %v2230_v49 = vadd.f32 %v2153_v41, %v1843_v61  ;;  %v2920_v5 = vpop.f32.mrf.mxu0  ;;  %v7746_v61 = vld [vmem:[%s10262_s14 + $0x50] sm:$0xff]   ;;  %v7747_v41 = vld [vmem:[%s10262_s14 + $0x58] sm:$0xff]  }
 0x18c   : > { %v7229_v24 = vpop.f32.mrf.mxu1 }
 0x18d   : > { %v10321_v12 = vadd.f32 %v2907_v63, %v2230_v49  ;;  %v2235_v35 = vadd.f32 %v7229_v24, %v10170_v23  ;;  %v7278_v10 = vpop.f32.mrf.mxu0 }
 0x18e   : > { %v2166_v33 = vpop.f32.mrf.mxu1 }
 0x18f   : > { %v10324_v19 = vadd.f32 %v7277_v37, %v2235_v35  ;;  %v2233_v47 = vadd.f32 %v2166_v33, %v10175_v44  ;;  %v2923_v7 = vpop.f32.mrf.mxu0 }
 0x190   : > { %v7230_v54 = vpop.f32.mrf.mxu1  ;;  %7560 = vmatmul.mubr.bf16.gmra.mxu0 %v7745_v9 }
 0x191   : > { %v10329_v16 = vadd.f32 %v2920_v5, %v2233_v47  ;;  %v2236_v0 = vadd.f32 %v7230_v54, %v10184_v31  ;;  %v7281_v17 = vpop.f32.mrf.mxu0  ;;  %7563 = vmatprep.mubr.bf16.mxu0 %v7746_v61  ;;  %v7748_v54 = vld [vmem:[%s10262_s14 + $0x60] sm:$0xff]   ;;  %v7751_v61 = vld [vmem:[%s10262_s14 + $0x78] sm:$0xff]  }
 0x192   : > { %v2169_v45 = vpop.f32.mrf.mxu1 }
 0x193   : > { %v10333_v23 = vadd.f32 %v7278_v10, %v2236_v0  ;;  %v2234_v14 = vadd.f32 %v2169_v45, %v1847_v38  ;;  %v2936_v6 = vpop.f32.mrf.mxu0  ;;  %v7749_v0 = vld [vmem:[%s10262_s14 + $0x68] sm:$0xff]  }
 0x194   : > { %v7233_v44 = vpop.f32.mrf.mxu1 }
 0x195   : > { %v10335_v52 = vadd.f32 %v2923_v7, %v2234_v14  ;;  %v2239_v22 = vadd.f32 %v7233_v44, %v10198_v21  ;;  %v7282_v4 = vpop.f32.mrf.mxu0 }
 0x196   : > { %v2182_v28 = vpop.f32.mrf.mxu1 }
 0x197   : > { %v10338_v63 = vadd.f32 %v7281_v17, %v2239_v22  ;;  %v2237_v31 = vadd.f32 %v2182_v28, %v10201_v40  ;;  %v2939_v30 = vpop.f32.mrf.mxu0 }
 0x198   : > { %v7234_v59 = vpop.f32.mrf.mxu1  ;;  %7564 = vmatmul.mubr.bf16.gmra.mxu0 %v7747_v41 }
 0x199   : > { %v10342_v50 = vadd.f32 %v2936_v6, %v2237_v31  ;;  %v2240_v37 = vadd.f32 %v7234_v59, %v10204_v58  ;;  %v7285_v15 = vpop.f32.mrf.mxu0  ;;  %7567 = vmatprep.mubr.bf16.mxu0 %v7748_v54 }
 0x19a   : > { %v2185_v49 = vpop.f32.mrf.mxu1 }
 0x19b   : > { %v10346_v5 = vadd.f32 %v7282_v4, %v2240_v37  ;;  %v2238_v21 = vadd.f32 %v2185_v49, %v10213_v20  ;;  %v2952_v24 = vpop.f32.mrf.mxu0 }
 0x19c   : > { %v7237_v40 = vpop.f32.mrf.mxu1 }
 0x19d   : > { %v10349_v36 = vadd.f32 %v2939_v30, %v2238_v21  ;;  %v2243_v48 = vadd.f32 %v7237_v40, %v10216_v26  ;;  %v7286_v35 = vpop.f32.mrf.mxu0  ;;  %v7750_v30 = vld [vmem:[%s10262_s14 + $0x70] sm:$0xff]  }
 0x19e   : > { %v2198_v10 = vpop.f32.mrf.mxu1 }
 0x19f   : > { %v10352_v58 = vadd.f32 %v7285_v15, %v2243_v48  ;;  %v2241_v33 = vadd.f32 %v2198_v10, %v10219_v60  ;;  %v2955_v47 = vpop.f32.mrf.mxu0 }
 0x1a0   : > { %v7238_v7 = vpop.f32.mrf.mxu1  ;;  %7568 = vmatmul.mubr.bf16.gmra.mxu0 %v7749_v0 }
 0x1a1   : > { %v10356_v56 = vadd.f32 %v2952_v24, %v2241_v33  ;;  %v2244_v20 = vadd.f32 %v7238_v7, %v10222_v29  ;;  %v7353_v38 = vpop.f32.mrf.mxu0  ;;  %7571 = vmatprep.mubr.bf16.mxu0 %v7750_v30 }
 0x1a2   : > { %v2201_v17 = vpop.f32.mrf.mxu1 }
 0x1a3   : > { %v10360_v9 = vadd.f32 %v7286_v35, %v2244_v20  ;;  %v2242_v26 = vadd.f32 %v2201_v17, %v10231_v51  ;;  %v3725_v45 = vpop.f32.mrf.mxu0 }
 0x1a4   : > { %v7305_v60 = vpop.f32.mrf.mxu1 }
 0x1a5   : > { %v10363_v14 = vadd.f32 %v2955_v47, %v2242_v26  ;;  %v3467_v6 = vadd.f32 %v7305_v60, %v10234_v53  ;;  %v10366_v44 = vpop.f32.mrf.mxu0 }
 0x1a6   : > { %v3338_v29 = vpop.f32.mrf.mxu1 }
 0x1a7   : > { %v10368_v22 = vadd.f32 %v7353_v38, %v3467_v6  ;;  %v3465_v4 = vadd.f32 %v3338_v29, %v10240_v27  ;;  %v10371_v28 = vpop.f32.mrf.mxu0 }
 0x1a8   : > { %v10373_v31 = vpop.f32.mrf.mxu1  ;;  %7572 = vmatmul.mubr.bf16.gmra.mxu0 %v7751_v61 }
 0x1a9   : > { %v10376_v51 = vadd.f32 %v3725_v45, %v3465_v4  ;;  %v7357_v59 = vpop.f32.mrf.mxu0 }
 0x1aa   : > { %v10379_v37 = vpop.f32.mrf.mxu1 }
 0x1ab   : > { %v3741_v53 = vpop.f32.mrf.mxu0 }
 0x1ac   : > { %v7309_v15 = vpop.f32.mrf.mxu1 }
 0x1ad   : > { %v3471_v41 = vadd.f32 %v7309_v15, %v10256_v8  ;;  %v7358_v49 = vpop.f32.mrf.mxu0 }
 0x1ae   : > { %v3354_v21 = vpop.f32.mrf.mxu1 }
 0x1af   : > { %v10382_v27 = vadd.f32 %v7357_v59, %v3471_v41  ;;  %v3469_v24 = vadd.f32 %v3354_v21, %v10265_v32  ;;  %v10385_v40 = vpop.f32.mrf.mxu0 }
 0x1b0   : > { %v7310_v48 = vpop.f32.mrf.mxu1 }
 0x1b1   : > { %v10387_v35 = vadd.f32 %v3741_v53, %v3469_v24  ;;  %v3472_v10 = vadd.f32 %v7310_v48, %v10269_v1  ;;  %v7361_v33 = vpop.f32.mrf.mxu0 }
 0x1b2   : > { %v10390_v47 = vpop.f32.mrf.mxu1 }
 0x1b3   : > { %v10392_v7 = vadd.f32 %v7358_v49, %v3472_v10  ;;  %v3757_v54 = vpop.f32.mrf.mxu0 }
 0x1b4   : > { %v7313_v8 = vpop.f32.mrf.mxu1 }
 0x1b5   : > { %v3475_v20 = vadd.f32 %v7313_v8, %v10278_v57  ;;  %v7362_v38 = vpop.f32.mrf.mxu0 }
 0x1b6   : > { %v3370_v0 = vpop.f32.mrf.mxu1 }
 0x1b7   : > { %v10395_v17 = vadd.f32 %v7361_v33, %v3475_v20  ;;  %v3473_v32 = vadd.f32 %v3370_v0, %v10282_v18  ;;  %v10398_v26 = vpop.f32.mrf.mxu0 }
 0x1b8   : > { %v7314_v45 = vpop.f32.mrf.mxu1 }
 0x1b9   : > { %v10400_v60 = vadd.f32 %v3757_v54, %v3473_v32  ;;  %v3476_v1 = vadd.f32 %v7314_v45, %v10286_v11  ;;  %v7365_v6 = vpop.f32.mrf.mxu0 }
 0x1ba   : > { %v10403_v29 = vpop.f32.mrf.mxu1 }
 0x1bb   : > { %v10405_v4 = vadd.f32 %v7362_v38, %v3476_v1  ;;  %v3773_v30 = vpop.f32.mrf.mxu0 }
 0x1bc   : > { %v7317_v57 = vpop.f32.mrf.mxu1 }
 0x1bd   : > { %v3479_v59 = vadd.f32 %v7317_v57, %v10292_v3  ;;  %v7366_v61 = vpop.f32.mrf.mxu0 }
 0x1be   : > { %v3386_v53 = vpop.f32.mrf.mxu1 }
 0x1bf   : > { %v10408_v15 = vadd.f32 %v7365_v6, %v3479_v59  ;;  %v3477_v18 = vadd.f32 %v3386_v53, %v10296_v39  ;;  %v10411_v41 = vpop.f32.mrf.mxu0 }
 0x1c0   : > { %v7318_v49 = vpop.f32.mrf.mxu1 }
 0x1c1   : > { %v10413_v21 = vadd.f32 %v3773_v30, %v3477_v18  ;;  %v3480_v11 = vadd.f32 %v7318_v49, %v10300_v34  ;;  %v7369_v24 = vpop.f32.mrf.mxu0 }
 0x1c2   : > { %v10416_v48 = vpop.f32.mrf.mxu1 }
 0x1c3   : > { %v10418_v10 = vadd.f32 %v7366_v61, %v3480_v11  ;;  %v3789_v33 = vpop.f32.mrf.mxu0 }
 0x1c4   : > { %v7321_v3 = vpop.f32.mrf.mxu1 }
 0x1c5   : > { %v3483_v54 = vadd.f32 %v7321_v3, %v10308_v55  ;;  %v7370_v8 = vpop.f32.mrf.mxu0 }
 0x1c6   : > { %v3402_v20 = vpop.f32.mrf.mxu1 }
 0x1c7   : > { %v10421_v38 = vadd.f32 %v7369_v24, %v3483_v54  ;;  %v3481_v39 = vadd.f32 %v3402_v20, %v10313_v2  ;;  %v10424_v0 = vpop.f32.mrf.mxu0 }
 0x1c8   : > { %v7322_v32 = vpop.f32.mrf.mxu1 }
 0x1c9   : > { %v10426_v45 = vadd.f32 %v3789_v33, %v3481_v39  ;;  %v3484_v34 = vadd.f32 %v7322_v32, %v10317_v46  ;;  %v7373_v1 = vpop.f32.mrf.mxu0 }
 0x1ca   : > { %v10429_v6 = vpop.f32.mrf.mxu1 }
 0x1cb   : > { %v10431_v30 = vadd.f32 %v7370_v8, %v3484_v34  ;;  %v3805_v57 = vpop.f32.mrf.mxu0 }
 0x1cc   : > { %v7325_v55 = vpop.f32.mrf.mxu1 }
 0x1cd   : > { %v3487_v59 = vadd.f32 %v7325_v55, %v10324_v19  ;;  %v7374_v61 = vpop.f32.mrf.mxu0 }
 0x1ce   : > { %v3418_v53 = vpop.f32.mrf.mxu1 }
 0x1cf   : > { %v10434_v18 = vadd.f32 %v7373_v1, %v3487_v59  ;;  %v3485_v2 = vadd.f32 %v3418_v53, %v10329_v16  ;;  %v10437_v49 = vpop.f32.mrf.mxu0 }
 0x1d0   : > { %v7326_v11 = vpop.f32.mrf.mxu1 }
 0x1d1   : > { %v10439_v24 = vadd.f32 %v3805_v57, %v3485_v2  ;;  %v3488_v46 = vadd.f32 %v7326_v11, %v10333_v23  ;;  %v7377_v33 = vpop.f32.mrf.mxu0 }
 0x1d2   : > { %v10442_v3 = vpop.f32.mrf.mxu1 }
 0x1d3   : > { %v10444_v54 = vadd.f32 %v7374_v61, %v3488_v46  ;;  %v3821_v8 = vpop.f32.mrf.mxu0 }
 0x1d4   : > { %v7329_v19 = vpop.f32.mrf.mxu1 }
 0x1d5   : > { %v3491_v20 = vadd.f32 %v7329_v19, %v10338_v63  ;;  %v7378_v39 = vpop.f32.mrf.mxu0 }
 0x1d6   : > { %v3434_v32 = vpop.f32.mrf.mxu1 }
 0x1d7   : > { %v10447_v34 = vadd.f32 %v7377_v33, %v3491_v20  ;;  %v3489_v16 = vadd.f32 %v3434_v32, %v10342_v50  ;;  %v10450_v1 = vpop.f32.mrf.mxu0 }
 0x1d8   : > { %v7330_v57 = vpop.f32.mrf.mxu1 }
 0x1d9   : > { %v10452_v55 = vadd.f32 %v3821_v8, %v3489_v16  ;;  %v3492_v23 = vadd.f32 %v7330_v57, %v10346_v5  ;;  %v7381_v59 = vpop.f32.mrf.mxu0  ;;  %v3468_v57 = vadd.f32 %v10373_v31, %v10243_v43 }
 0x1da   : > { %v10455_v61 = vpop.f32.mrf.mxu1 }
 0x1db   : > { %v10457_v53 = vadd.f32 %v7378_v39, %v3492_v23  ;;  %v3837_v2 = vpop.f32.mrf.mxu0 }
 0x1dc   : > { %v7333_v63 = vpop.f32.mrf.mxu1 }
 0x1dd   : > { %v3495_v11 = vadd.f32 %v7333_v63, %v10352_v58  ;;  %v7382_v46 = vpop.f32.mrf.mxu0 }
 0x1de   : > { %v3450_v33 = vpop.f32.mrf.mxu1 }
 0x1df   : > { %v10460_v19 = vadd.f32 %v7381_v59, %v3495_v11  ;;  %v3493_v50 = vadd.f32 %v3450_v33, %v10356_v56  ;;  %v10463_v20 = vpop.f32.mrf.mxu0  ;;  %v3466_v56 = vadd.f32 %v10379_v37, %v10246_v25  ;;  %v3855_v33 = vadd.f32 %v10366_v44, %v3468_v57 }
 0x1e0   : > { %11018 = vst [vmem:[#allocation13_spill] sm:$0xff] %v10463_v20  ;;  %v7334_v8 = vpop.f32.mrf.mxu1 }
 0x1e1   : > { %v10465_v32 = vadd.f32 %v3837_v2, %v3493_v50  ;;  %v3496_v5 = vadd.f32 %v7334_v8, %v10360_v9  ;;  %v7449_v16 = vpop.f32.mrf.mxu0  ;;  %v10480_v9 = vld [vmem:[%s10832_s2] ss:$0 sm:$0xff]  ;;  %v3853_v8 = vadd.f32 %v10371_v28, %v3466_v56 }
 0x1e2   : > { %v10468_v39 = vpop.f32.mrf.mxu1 }
 0x1e3   : > { %11019 = vst [vmem:[#allocation14_spill] sm:$0xff] %v10465_v32  ;;  %v10472_v58 = vadd.f32 %v7382_v46, %v3496_v5  ;;  %v4977_v23 = vpop.f32.mrf.mxu0 }
 0x1e4   : > { %v7401_v59 = vpop.f32.mrf.mxu1 }
 0x1e5   : > { %11020 = vst [vmem:[#allocation18_spill] sm:$0xff] %v10472_v58  ;;  %v4608_v63 = vadd.f32 %v7401_v59, %v10368_v22  ;;  %v7450_v11 = vpop.f32.mrf.mxu0  ;;  %v10489_v22 = vld [vmem:[%s10832_s2 + $0x1] ss:$0 sm:$0xff]  ;;  %v3470_v58 = vadd.f32 %v10390_v47, %v10275_v42 }
 0x1e6   : > { %v4479_v2 = vpop.f32.mrf.mxu1 }
 0x1e7   : > { %v5106_v50 = vadd.f32 %v7449_v16, %v4608_v63  ;;  %v4606_v43 = vadd.f32 %v4479_v2, %v10376_v51  ;;  %v4980_v31 = vpop.f32.mrf.mxu0 }
 0x1e8   : > { %v7402_v46 = vpop.f32.mrf.mxu1 }
 0x1e9   : > { %v5143_v25 = vmul.f32 %v10480_v9, %v5106_v50  ;;  %v5104_v37 = vadd.f32 %v4977_v23, %v4606_v43  ;;  %v4609_v5 = vadd.f32 %v7402_v46, %v3855_v33  ;;  %v7453_v59 = vpop.f32.mrf.mxu0 }
 0x1ea   : > { %v4482_v20 = vpop.f32.mrf.mxu1 }
 0x1eb   : > { %v5141_v44 = vmul.f32 %v10480_v9, %v5104_v37  ;;  %v5107_v16 = vadd.f32 %v7450_v11, %v4609_v5  ;;  %v4607_v57 = vadd.f32 %v4482_v20, %v3853_v8  ;;  %v4993_v51 = vpop.f32.mrf.mxu0  ;;  %v5180_v63 = vadd.f32 %v10489_v22, %v5143_v25 }
 0x1ec   : > { %v7405_v2 = vpop.f32.mrf.mxu1 }
 0x1ed   : > { %v5144_v28 = vmul.f32 %v10480_v9, %v5107_v16  ;;  %v5105_v56 = vadd.f32 %v4980_v31, %v4607_v57  ;;  %v7454_v50 = vpop.f32.mrf.mxu0  ;;  %v5178_v23 = vadd.f32 %v10489_v22, %v5141_v44  ;;  %v4612_v33 = vadd.f32 %v7405_v2, %v10382_v27 }
 0x1ee   : > { %v4495_v43 = vpop.f32.mrf.mxu1  ;;  %v5212_v25 = vmax.f32 %v5180_v63, 0.0  ;;  %v3857_v27 = vadd.f32 %v10385_v40, %v3470_v58  ;;  %v3474_v58 = vadd.f32 %v10403_v29, %v10289_v13 }
 0x1ef   : > { %v5181_v46 = vadd.f32 %v10489_v22, %v5144_v28  ;;  %v5142_v20 = vmul.f32 %v10480_v9, %v5105_v56  ;;  %v4610_v11 = vadd.f32 %v4495_v43, %v10387_v35  ;;  %v4996_v8 = vpop.f32.mrf.mxu0  ;;  %v5110_v37 = vadd.f32 %v7453_v59, %v4612_v33 }
 0x1f0   : > { %v7406_v5 = vpop.f32.mrf.mxu1  ;;  %v5210_v44 = vmax.f32 %v5178_v23, 0.0 }
 0x1f1   : > { %v5213_v31 = vmax.f32 %v5181_v46, 0.0  ;;  %v5179_v16 = vadd.f32 %v10489_v22, %v5142_v20  ;;  %v5108_v57 = vadd.f32 %v4993_v51, %v4610_v11  ;;  %v4613_v42 = vadd.f32 %v7406_v5, %v10392_v7 }
 0x1f2   : > { %v7457_v47 = vpop.f32.mrf.mxu0  ;;  %v5147_v2 = vmul.f32 %v10480_v9, %v5110_v37  ;;  %v4498_v28 = vpop.f32.mrf.mxu1 }
 0x1f3   : > { %v5243_v56 = vpack.c.bf16 %v5213_v31, %v5212_v25  ;;  %v5211_v32 = vmax.f32 %v5179_v16, 0.0  ;;  %v5145_v35 = vmul.f32 %v10480_v9, %v5108_v57  ;;  %v5111_v63 = vadd.f32 %v7454_v50, %v4613_v42 }
 0x1f4   : > { %v5009_v59 = vpop.f32.mrf.mxu0  ;;  %v5184_v33 = vadd.f32 %v10489_v22, %v5147_v2  ;;  %v4611_v43 = vadd.f32 %v4498_v28, %v3857_v27  ;;  %v7409_v46 = vpop.f32.mrf.mxu1  ;;  %v3861_v27 = vadd.f32 %v10398_v26, %v3474_v58  ;;  %v3478_v26 = vadd.f32 %v10416_v48, %v10305_v62 }
 0x1f5   : > { %v5148_v51 = vmul.f32 %v10480_v9, %v5111_v63  ;;  %v4616_v7 = vadd.f32 %v7409_v46, %v10395_v17  ;;  %v5242_v20 = vpack.c.bf16 %v5211_v32, %v5210_v44  ;;  %v5182_v25 = vadd.f32 %v10489_v22, %v5145_v35 }
 0x1f6   : > { %v7458_v40 = vpop.f32.mrf.mxu0  ;;  %v5109_v23 = vadd.f32 %v4996_v8, %v4611_v43  ;;  %v4511_v11 = vpop.f32.mrf.mxu1  ;;  %v5216_v16 = vmax.f32 %v5184_v33, 0.0 }
 0x1f7   : > { %v5185_v50 = vadd.f32 %v10489_v22, %v5148_v51  ;;  %v5114_v37 = vadd.f32 %v7457_v47, %v4616_v7  ;;  %v4614_v5 = vadd.f32 %v4511_v11, %v10400_v60  ;;  %7495 = vmatprep.mubr.bf16.mxu1 %v5242_v20  ;;  %v5214_v60 = vmax.f32 %v5182_v25, 0.0 }
 0x1f8   : > { %v5012_v31 = vpop.f32.mrf.mxu0  ;;  %v5146_v57 = vmul.f32 %v10480_v9, %v5109_v23  ;;  %v7410_v17 = vpop.f32.mrf.mxu1  ;;  %7496 = vmatmul.mubr.bf16.vlgmr.msra.gmra.mxu1 %v5243_v56 }
 0x1f9   : > { %v5217_v32 = vmax.f32 %v5185_v50, 0.0  ;;  %v5151_v42 = vmul.f32 %v10480_v9, %v5114_v37  ;;  %v5112_v13 = vadd.f32 %v5009_v59, %v4614_v5  ;;  %v4617_v29 = vadd.f32 %v7410_v17, %v10405_v4 }
 0x1fa   : > { %v7461_v8 = vpop.f32.mrf.mxu0  ;;  %v5183_v47 = vadd.f32 %v10489_v22, %v5146_v57  ;;  %v4514_v44 = vpop.f32.mrf.mxu1  ;;  %v3865_v17 = vadd.f32 %v10411_v41, %v3478_v26  ;;  %v3482_v41 = vadd.f32 %v10429_v6, %v10321_v12 }
 0x1fb   : > { %v5245_v2 = vpack.c.bf16 %v5217_v32, %v5216_v16  ;;  %v5115_v28 = vadd.f32 %v7458_v40, %v4617_v29  ;;  %v5188_v33 = vadd.f32 %v10489_v22, %v5151_v42  ;;  %v5149_v56 = vmul.f32 %v10480_v9, %v5112_v13 }
 0x1fc   : > { %v5025_v35 = vpop.f32.mrf.mxu0  ;;  %v5215_v63 = vmax.f32 %v5183_v47, 0.0  ;;  %v4615_v43 = vadd.f32 %v4514_v44, %v3861_v27  ;;  %v7413_v46 = vpop.f32.mrf.mxu1 }
 0x1fd   : > { %v5152_v59 = vmul.f32 %v10480_v9, %v5115_v28  ;;  %v4620_v4 = vadd.f32 %v7413_v46, %v10408_v15  ;;  %v5220_v50 = vmax.f32 %v5188_v33, 0.0  ;;  %v5186_v37 = vadd.f32 %v10489_v22, %v5149_v56 }
 0x1fe   : > { %v7462_v51 = vpop.f32.mrf.mxu0  ;;  %v5113_v7 = vadd.f32 %v5012_v31, %v4615_v43  ;;  %v4527_v20 = vpop.f32.mrf.mxu1  ;;  %v5244_v58 = vpack.c.bf16 %v5215_v63, %v5214_v60 }
 0x1ff   : > { %v5189_v40 = vadd.f32 %v10489_v22, %v5152_v59  ;;  %v5118_v23 = vadd.f32 %v7461_v8, %v4620_v4  ;;  %v4618_v11 = vadd.f32 %v4527_v20, %v10413_v21  ;;  %v5218_v27 = vmax.f32 %v5186_v37, 0.0 }
 0x200   : > { %v5028_v25 = vpop.f32.mrf.mxu0  ;;  %v5150_v5 = vmul.f32 %v10480_v9, %v5113_v7  ;;  %7499 = vmatprep.mubr.bf16.mxu1 %v5244_v58  ;;  %v7414_v15 = vpop.f32.mrf.mxu1 }
 0x201   : > { %v5221_v16 = vmax.f32 %v5189_v40, 0.0  ;;  %v5155_v57 = vmul.f32 %v10480_v9, %v5118_v23  ;;  %v5116_v62 = vadd.f32 %v5025_v35, %v4618_v11  ;;  %v4621_v48 = vadd.f32 %v7414_v15, %v10418_v10  ;;  %7500 = vmatmul.mubr.bf16.gmra.mxu1 %v5245_v2 }
 0x202   : > { %v5187_v21 = vadd.f32 %v10489_v22, %v5150_v5  ;;  %v4530_v32 = vpop.f32.mrf.mxu1  ;;  %v3869_v23 = vadd.f32 %v10424_v0, %v3482_v41  ;;  %v3486_v0 = vadd.f32 %v10442_v3, %v10335_v52 }
 0x203   : > { %v7465_v31 = vpop.f32.mrf.mxu0  ;;  %v5247_v42 = vpack.c.bf16 %v5221_v16, %v5220_v50  ;;  %v5153_v13 = vmul.f32 %v10480_v9, %v5116_v62  ;;  %v5119_v29 = vadd.f32 %v7462_v51, %v4621_v48  ;;  %v5192_v44 = vadd.f32 %v10489_v22, %v5155_v57 }
 0x204   : > { %v5219_v47 = vmax.f32 %v5187_v21, 0.0  ;;  %v4619_v60 = vadd.f32 %v4530_v32, %v3865_v17  ;;  %v7417_v28 = vpop.f32.mrf.mxu1 }
 0x205   : > { %v5041_v8 = vpop.f32.mrf.mxu0  ;;  %v5156_v10 = vmul.f32 %v10480_v9, %v5119_v29  ;;  %v4624_v2 = vadd.f32 %v7417_v28, %v10421_v38  ;;  %v5190_v43 = vadd.f32 %v10489_v22, %v5153_v13  ;;  %v5224_v26 = vmax.f32 %v5192_v44, 0.0 }
 0x206   : > { %v5117_v63 = vadd.f32 %v5028_v25, %v4619_v60  ;;  %v4543_v33 = vpop.f32.mrf.mxu1  ;;  %v5246_v56 = vpack.c.bf16 %v5219_v47, %v5218_v27 }
 0x207   : > { %v7466_v35 = vpop.f32.mrf.mxu0  ;;  %v5193_v46 = vadd.f32 %v10489_v22, %v5156_v10  ;;  %v5122_v59 = vadd.f32 %v7465_v31, %v4624_v2  ;;  %v4622_v4 = vadd.f32 %v4543_v33, %v10426_v45  ;;  %v5222_v45 = vmax.f32 %v5190_v43, 0.0 }
 0x208   : > { %v5154_v7 = vmul.f32 %v10480_v9, %v5117_v63  ;;  %7503 = vmatprep.mubr.bf16.mxu1 %v5246_v56  ;;  %v7418_v38 = vpop.f32.mrf.mxu1 }
 0x209   : > { %v5044_v51 = vpop.f32.mrf.mxu0  ;;  %v5225_v20 = vmax.f32 %v5193_v46, 0.0  ;;  %v5159_v58 = vmul.f32 %v10480_v9, %v5122_v59  ;;  %v5120_v12 = vadd.f32 %v5041_v8, %v4622_v4  ;;  %v4625_v6 = vadd.f32 %v7418_v38, %v10431_v30  ;;  %7504 = vmatmul.mubr.bf16.gmra.mxu1 %v5247_v42 }
 0x20a   : > { %v5191_v11 = vadd.f32 %v10489_v22, %v5154_v7  ;;  %v4546_v25 = vpop.f32.mrf.mxu1 }
 0x20b   : > { %v7469_v40 = vpop.f32.mrf.mxu0  ;;  %v5249_v50 = vpack.c.bf16 %v5225_v20, %v5224_v26  ;;  %v5123_v37 = vadd.f32 %v7466_v35, %v4625_v6  ;;  %v5196_v16 = vadd.f32 %v10489_v22, %v5159_v58  ;;  %v5157_v57 = vmul.f32 %v10480_v9, %v5120_v12 }
 0x20c   : > { %v5223_v15 = vmax.f32 %v5191_v11, 0.0  ;;  %v4623_v62 = vadd.f32 %v4546_v25, %v3869_v23  ;;  %v7421_v48 = vpop.f32.mrf.mxu1  ;;  %v3873_v35 = vadd.f32 %v10437_v49, %v3486_v0  ;;  %v3490_v49 = vadd.f32 %v10455_v61, %v10349_v36 }
 0x20d   : > { %v5057_v5 = vpop.f32.mrf.mxu0  ;;  %v5160_v30 = vmul.f32 %v10480_v9, %v5123_v37  ;;  %v4628_v31 = vadd.f32 %v7421_v48, %v10434_v18  ;;  %v5228_v47 = vmax.f32 %v5196_v16, 0.0  ;;  %v5194_v44 = vadd.f32 %v10489_v22, %v5157_v57 }
 0x20e   : > { %v5121_v21 = vadd.f32 %v5044_v51, %v4623_v62  ;;  %v4559_v32 = vpop.f32.mrf.mxu1  ;;  %v5248_v42 = vpack.c.bf16 %v5223_v15, %v5222_v45  ;;  %v3877_v16 = vadd.f32 %v10450_v1, %v3490_v49  ;;  %v3494_v1 = vadd.f32 %v10468_v39, %v10363_v14  ;;  %v11022_v14 = vld [vmem:[#allocation18_spill] sm:$0xff] }
 0x20f   : > { %v7470_v17 = vpop.f32.mrf.mxu0  ;;  %v5197_v13 = vadd.f32 %v10489_v22, %v5160_v30  ;;  %v5126_v29 = vadd.f32 %v7469_v40, %v4628_v31  ;;  %v4626_v8 = vadd.f32 %v4559_v32, %v10439_v24  ;;  %v5226_v46 = vmax.f32 %v5194_v44, 0.0 }
 0x210   : > { %v5158_v60 = vmul.f32 %v10480_v9, %v5121_v21  ;;  %7507 = vmatprep.mubr.bf16.mxu1 %v5248_v42  ;;  %v7422_v18 = vpop.f32.mrf.mxu1 }
 0x211   : > { %v5060_v27 = vpop.f32.mrf.mxu0  ;;  %v5229_v28 = vmax.f32 %v5197_v13, 0.0  ;;  %v5163_v10 = vmul.f32 %v10480_v9, %v5126_v29  ;;  %v5124_v52 = vadd.f32 %v5057_v5, %v4626_v8  ;;  %v4629_v3 = vadd.f32 %v7422_v18, %v10444_v54  ;;  %7508 = vmatmul.mubr.bf16.gmra.mxu1 %v5249_v50 }
 0x212   : > { %v5195_v24 = vadd.f32 %v10489_v22, %v5158_v60  ;;  %v4562_v41 = vpop.f32.mrf.mxu1  ;;  %v11021_v60 = vld [vmem:[#allocation14_spill] sm:$0xff] }
 0x213   : > { %v7473_v2 = vpop.f32.mrf.mxu0  ;;  %v5251_v63 = vpack.c.bf16 %v5229_v28, %v5228_v47  ;;  %v5161_v33 = vmul.f32 %v10480_v9, %v5124_v52  ;;  %v5127_v56 = vadd.f32 %v7470_v17, %v4629_v3  ;;  %v5200_v4 = vadd.f32 %v10489_v22, %v5163_v10 }
 0x214   : > { %v5227_v59 = vmax.f32 %v5195_v24, 0.0  ;;  %v4627_v51 = vadd.f32 %v4562_v41, %v3873_v35  ;;  %v7425_v26 = vpop.f32.mrf.mxu1  ;;  %v11023_v41 = vld [vmem:[#allocation13_spill] sm:$0xff] }
 0x215   : > { %v5073_v43 = vpop.f32.mrf.mxu0  ;;  %v5164_v54 = vmul.f32 %v10480_v9, %v5127_v56  ;;  %v4632_v7 = vadd.f32 %v7425_v26, %v10447_v34  ;;  %v5198_v6 = vadd.f32 %v10489_v22, %v5161_v33  ;;  %v5232_v45 = vmax.f32 %v5200_v4, 0.0 }
 0x216   : > { %v5125_v20 = vadd.f32 %v5060_v27, %v4627_v51  ;;  %v4575_v58 = vpop.f32.mrf.mxu1  ;;  %v5250_v12 = vpack.c.bf16 %v5227_v59, %v5226_v46 }
 0x217   : > { %v7474_v38 = vpop.f32.mrf.mxu0  ;;  %v5201_v40 = vadd.f32 %v10489_v22, %v5164_v54  ;;  %v5130_v23 = vadd.f32 %v7473_v2, %v4632_v7  ;;  %v4630_v11 = vadd.f32 %v4575_v58, %v10452_v55  ;;  %v5230_v55 = vmax.f32 %v5198_v6, 0.0 }
 0x218   : > { %v5162_v50 = vmul.f32 %v10480_v9, %v5125_v20  ;;  %7511 = vmatprep.mubr.bf16.mxu1 %v5250_v12  ;;  %v7426_v34 = vpop.f32.mrf.mxu1 }
 0x219   : > { %v5076_v25 = vpop.f32.mrf.mxu0  ;;  %v5233_v37 = vmax.f32 %v5201_v40, 0.0  ;;  %v5167_v5 = vmul.f32 %v10480_v9, %v5130_v23  ;;  %v5128_v36 = vadd.f32 %v5073_v43, %v4630_v11  ;;  %v4633_v61 = vadd.f32 %v7426_v34, %v10457_v53  ;;  %7512 = vmatmul.mubr.bf16.gmra.mxu1 %v5251_v63 }
 0x21a   : > { %v5199_v57 = vadd.f32 %v10489_v22, %v5162_v50  ;;  %v4578_v62 = vpop.f32.mrf.mxu1  ;;  %v3881_v63 = vadd.f32 %v11023_v41, %v3494_v1 }
 0x21b   : > { %v7477_v15 = vpop.f32.mrf.mxu0  ;;  %v5253_v48 = vpack.c.bf16 %v5233_v37, %v5232_v45  ;;  %v5131_v30 = vadd.f32 %v7474_v38, %v4633_v61  ;;  %v5204_v17 = vadd.f32 %v10489_v22, %v5167_v5  ;;  %v5165_v0 = vmul.f32 %v10480_v9, %v5128_v36 }
 0x21c   : > { %v5231_v31 = vmax.f32 %v5199_v57, 0.0  ;;  %v4631_v21 = vadd.f32 %v4578_v62, %v3877_v16  ;;  %v7429_v32 = vpop.f32.mrf.mxu1 }
 0x21d   : > { %v5168_v42 = vmul.f32 %v10480_v9, %v5131_v30  ;;  %v4636_v53 = vadd.f32 %v7429_v32, %v10460_v19  ;;  %v5089_v13 = vpop.f32.mrf.mxu0  ;;  %v5236_v28 = vmax.f32 %v5204_v17, 0.0  ;;  %v5202_v10 = vadd.f32 %v10489_v22, %v5165_v0  ;;  %v10611_v0 = vld [vmem:[%s10837_s7] ss:$0 sm:$0xff] }
 0x21e   : > { %v5129_v29 = vadd.f32 %v5076_v25, %v4631_v21  ;;  %v4591_v8 = vpop.f32.mrf.mxu1  ;;  %v5252_v27 = vpack.c.bf16 %v5231_v31, %v5230_v55 }
 0x21f   : > { %v5205_v47 = vadd.f32 %v10489_v22, %v5168_v42  ;;  %v5134_v44 = vadd.f32 %v7477_v15, %v4636_v53  ;;  %v4634_v18 = vadd.f32 %v4591_v8, %v11021_v60  ;;  %v7478_v24 = vpop.f32.mrf.mxu0  ;;  %v5234_v59 = vmax.f32 %v5202_v10, 0.0  ;;  %v10619_v42 = vld [vmem:[%s10837_s7 + $0x1] ss:$0 sm:$0xff]  ;;  %v10624_v53 = vld [vmem:[%s10834_s4] ss:$0 sm:$0xff] }
 0x220   : > { %v5166_v52 = vmul.f32 %v10480_v9, %v5129_v29  ;;  %7515 = vmatprep.mubr.bf16.mxu1 %v5252_v27  ;;  %v7430_v3 = vpop.f32.mrf.mxu1  ;;  %v10632_v8 = vld [vmem:[%s10834_s4 + $0x1] ss:$0 sm:$0xff] }
 0x221   : > { %v5237_v19 = vmax.f32 %v5205_v47, 0.0  ;;  %v5171_v2 = vmul.f32 %v10480_v9, %v5134_v44  ;;  %v5132_v35 = vadd.f32 %v5089_v13, %v4634_v18  ;;  %v4637_v39 = vadd.f32 %v7430_v3, %v11022_v14  ;;  %7516 = vmatmul.mubr.bf16.gmra.mxu1 %v5253_v48  ;;  %v5092_v38 = vpop.f32.mrf.mxu0 }
 0x222   : > { %v5203_v33 = vadd.f32 %v10489_v22, %v5166_v52  ;;  %v4594_v56 = vpop.f32.mrf.mxu1 }
 0x223   : > { %v5255_v43 = vpack.c.bf16 %v5237_v19, %v5236_v28  ;;  %v5135_v46 = vadd.f32 %v7478_v24, %v4637_v39  ;;  %v5169_v51 = vmul.f32 %v10480_v9, %v5132_v35  ;;  %v4635_v26 = vadd.f32 %v4594_v56, %v3881_v63 }
 0x224   : > { %v5235_v4 = vmax.f32 %v5203_v33, 0.0  ;;  %v5208_v54 = vadd.f32 %v10489_v22, %v5171_v2 }
 0x225   : > { %v5172_v7 = vmul.f32 %v10480_v9, %v5135_v46  ;;  %v5133_v49 = vadd.f32 %v5092_v38, %v4635_v26  ;;  %v5206_v12 = vadd.f32 %v10489_v22, %v5169_v51 }
 0x226   : > { %v5254_v20 = vpack.c.bf16 %v5235_v4, %v5234_v59  ;;  %v5240_v40 = vmax.f32 %v5208_v54, 0.0 }
 0x227   : > { %v5209_v58 = vadd.f32 %v10489_v22, %v5172_v7  ;;  %v5170_v6 = vmul.f32 %v10480_v9, %v5133_v49  ;;  %v5238_v45 = vmax.f32 %v5206_v12, 0.0 }
 0x228   : > { %7519 = vmatprep.mubr.bf16.mxu1 %v5254_v20 }
 0x229   : > { %v5241_v23 = vmax.f32 %v5209_v58, 0.0  ;;  %7520 = vmatmul.mubr.bf16.gmra.mxu1 %v5255_v43  ;;  %v5207_v11 = vadd.f32 %v10489_v22, %v5170_v6 }
 0x22b   : > { %v5257_v25 = vpack.c.bf16 %v5241_v23, %v5240_v40  ;;  %v5239_v50 = vmax.f32 %v5207_v11, 0.0 }
 0x22d   : > { %v5256_v34 = vpack.c.bf16 %v5239_v50, %v5238_v45 }
 0x22f   : > { %7523 = vmatprep.mubr.bf16.mxu1 %v5256_v34 }
 0x230   : > { %v7545_v37 = vpop.f32.mrf.mxu0 }
 0x231   : > { %7524 = vmatmul.mubr.bf16.gmra.mxu1 %v5257_v25  ;;  %v5917_v32 = vmul.f32 %v7545_v37, %v10611_v0 }
 0x232   : > { %v5783_v5 = vpop.f32.mrf.mxu0 }
 0x233   : > { %v5915_v1 = vmul.f32 %v10611_v0, %v5783_v5  ;;  %v5954_v27 = vadd.f32 %v10619_v42, %v5917_v32 }
 0x234   : > { %v7546_v36 = vpop.f32.mrf.mxu0 }
 0x235   : > { %v5918_v44 = vmul.f32 %v7546_v36, %v10611_v0  ;;  %v5952_v52 = vadd.f32 %v10619_v42, %v5915_v1 }
 0x236   : > { %v5786_v61 = vpop.f32.mrf.mxu0 }
 0x237   : > { %v5916_v2 = vmul.f32 %v10611_v0, %v5786_v61  ;;  %v5955_v39 = vadd.f32 %v10619_v42, %v5918_v44 }
 0x238   : > { %v7549_v15 = vpop.f32.mrf.mxu0 }
 0x239   : > { %v5921_v24 = vmul.f32 %v7549_v15, %v10611_v0  ;;  %v5953_v59 = vadd.f32 %v10619_v42, %v5916_v2 }
 0x23a   : > { %v5799_v16 = vpop.f32.mrf.mxu0 }
 0x23b   : > { %v5958_v7 = vadd.f32 %v10619_v42, %v5921_v24  ;;  %v5919_v38 = vmul.f32 %v10611_v0, %v5799_v16 }
 0x23c   : > { %v7550_v57 = vpop.f32.mrf.mxu0 }
 0x23d   : > { %v5922_v6 = vmul.f32 %v7550_v57, %v10611_v0  ;;  %v5956_v37 = vadd.f32 %v10619_v42, %v5919_v38 }
 0x23e   : > { %v5802_v9 = vpop.f32.mrf.mxu0 }
 0x23f   : > { %v5920_v45 = vmul.f32 %v10611_v0, %v5802_v9  ;;  %v5959_v16 = vadd.f32 %v10619_v42, %v5922_v6 }
 0x240   : > { %v7553_v62 = vpop.f32.mrf.mxu0 }
 0x241   : > { %v5925_v50 = vmul.f32 %v7553_v62, %v10611_v0 }
 0x242   : > { %v10596_v55 = vpop.f32.mrf.mxu0 }
 0x244   : > { %v10598_v48 = vpop.f32.mrf.mxu0 }
 0x246   : > { %v10600_v22 = vpop.f32.mrf.mxu0 }
 0x248   : > { %v10602_v30 = vpop.f32.mrf.mxu0 }
 0x24a   : > { %v10604_v31 = vpop.f32.mrf.mxu0 }
 0x24c   : > { %v10606_v17 = vpop.f32.mrf.mxu0 }
 0x24e   : > { %v10613_v21 = vpop.f32.mrf.mxu0 }
 0x250   : > { %v10626_v13 = vpop.f32.mrf.mxu0 }
 0x252   : > { %v10637_v18 = vpop.f32.mrf.mxu0 }
 0x254   : > { %v10653_v63 = vpop.f32.mrf.mxu0 }
 0x256   : > { %v10663_v20 = vpop.f32.mrf.mxu0 }
 0x258   : > { %v10675_v15 = vpop.f32.mrf.mxu0 }
 0x2b8   : > { %v7497_v29 = vpop.f32.mrf.mxu1 }
 0x2b9   : > { %v5490_v47 = vmul.f32 %v7497_v29, %v10624_v53  ;;  %v5957_v29 = vadd.f32 %v10619_v42, %v5920_v45  ;;  %v5930_v45 = vmul.f32 %v10606_v17, %v10611_v0 }
 0x2ba   : > { %v5356_v60 = vpop.f32.mrf.mxu1 }
 0x2bb   : > { %v5527_v28 = vadd.f32 %v10632_v8, %v5490_v47  ;;  %v5488_v10 = vmul.f32 %v10624_v53, %v5356_v60  ;;  %v5923_v47 = vmul.f32 %v10611_v0, %v10596_v55 }
 0x2bc   : > { %v7498_v3 = vpop.f32.mrf.mxu1 }
 0x2bd   : > { %v5986_v19 = vadd.f32 %v5954_v27, %v5527_v28  ;;  %v5525_v35 = vadd.f32 %v10632_v8, %v5488_v10  ;;  %v5491_v14 = vmul.f32 %v7498_v3, %v10624_v53  ;;  %v5962_v27 = vadd.f32 %v10619_v42, %v5925_v50  ;;  %v10688_v3 = vpop.f32.mrf.mxu0 }
 0x2be   : > { %v5359_v41 = vpop.f32.mrf.mxu1  ;;  %v5960_v24 = vadd.f32 %v10619_v42, %v5923_v47 }
 0x2bf   : > { %v6018_v33 = vmax.f32 %v5986_v19, 0.0  ;;  %v5984_v56 = vadd.f32 %v5952_v52, %v5525_v35  ;;  %v5528_v43 = vadd.f32 %v10632_v8, %v5491_v14  ;;  %v5489_v46 = vmul.f32 %v10624_v53, %v5359_v41 }
 0x2c0   : > { %v5926_v19 = vmul.f32 %v10598_v48, %v10611_v0  ;;  %v5924_v41 = vmul.f32 %v10611_v0, %v10600_v22 }
 0x2c1   : > { %6050 = vst [vmem:[%s10650_s28 + $0x10] sm:$0xff] %v6018_v33  ;;  %v6016_v4 = vmax.f32 %v5984_v56, 0.0  ;;  %v5987_v51 = vadd.f32 %v5955_v39, %v5528_v43  ;;  %v5526_v26 = vadd.f32 %v10632_v8, %v5489_v46  ;;  %v7501_v54 = vpop.f32.mrf.mxu1  ;;  %v5929_v33 = vmul.f32 %v10602_v30, %v10611_v0 }
 0x2c2   : > { %v5494_v49 = vmul.f32 %v7501_v54, %v10624_v53  ;;  %v5961_v38 = vadd.f32 %v10619_v42, %v5924_v41 }
 0x2c3   : > { %6048 = vst [vmem:[%s10650_s28] sm:$0xff] %v6016_v4  ;;  %v6019_v58 = vmax.f32 %v5987_v51, 0.0  ;;  %v5985_v12 = vadd.f32 %v5953_v59, %v5526_v26  ;;  %v5372_v40 = vpop.f32.mrf.mxu1  ;;  %v10703_v4 = vpop.f32.mrf.mxu0  ;;  %v5963_v51 = vadd.f32 %v10619_v42, %v5926_v19 }
 0x2c4   : > { %v5531_v23 = vadd.f32 %v10632_v8, %v5494_v49  ;;  %v5492_v11 = vmul.f32 %v10624_v53, %v5372_v40  ;;  %v5966_v49 = vadd.f32 %v10619_v42, %v5929_v33 }
 0x2c5   : > { %6051 = vst [vmem:[%s10650_s28 + $0x18] sm:$0xff] %v6019_v58  ;;  %v6017_v25 = vmax.f32 %v5985_v12, 0.0  ;;  %v7502_v34 = vpop.f32.mrf.mxu1  ;;  %v5927_v58 = vmul.f32 %v10611_v0, %v10604_v31 }
 0x2c6   : > { %v5990_v5 = vadd.f32 %v5958_v7, %v5531_v23  ;;  %v5529_v36 = vadd.f32 %v10632_v8, %v5492_v11  ;;  %v5495_v61 = vmul.f32 %v7502_v34, %v10624_v53 }
 0x2c7   : > { %6049 = vst [vmem:[%s10650_s28 + $0x8] sm:$0xff] %v6017_v25  ;;  %v5375_v57 = vpop.f32.mrf.mxu1  ;;  %v10716_v25 = vpop.f32.mrf.mxu0 }
 0x2c8   : > { %v6022_v32 = vmax.f32 %v5990_v5, 0.0  ;;  %v5988_v9 = vadd.f32 %v5956_v37, %v5529_v36  ;;  %v5532_v62 = vadd.f32 %v10632_v8, %v5495_v61  ;;  %v5493_v1 = vmul.f32 %v10624_v53, %v5375_v57 }
 0x2c9   : > { %v7505_v44 = vpop.f32.mrf.mxu1  ;;  %v5964_v36 = vadd.f32 %v10619_v42, %v5927_v58  ;;  %v5928_v61 = vmul.f32 %v10611_v0, %v10613_v21 }
 0x2ca   : > { %6054 = vst [vmem:[%s10650_s28 + $0x30] sm:$0xff] %v6022_v32  ;;  %v6020_v60 = vmax.f32 %v5988_v9, 0.0  ;;  %v5991_v28 = vadd.f32 %v5959_v16, %v5532_v62  ;;  %v5530_v10 = vadd.f32 %v10632_v8, %v5493_v1  ;;  %v5498_v52 = vmul.f32 %v7505_v44, %v10624_v53  ;;  %v7569_v1 = vpop.f32.mrf.mxu0 }
 0x2cb   : > { %v5388_v2 = vpop.f32.mrf.mxu1  ;;  %v5933_v16 = vmul.f32 %v10626_v13, %v10611_v0 }
 0x2cc   : > { %6052 = vst [vmem:[%s10650_s28 + $0x20] sm:$0xff] %v6020_v60  ;;  %v6023_v35 = vmax.f32 %v5991_v28, 0.0  ;;  %v5989_v14 = vadd.f32 %v5957_v29, %v5530_v10  ;;  %v5535_v55 = vadd.f32 %v10632_v8, %v5498_v52  ;;  %v5496_v39 = vmul.f32 %v10624_v53, %v5388_v2 }
 0x2cd   : > { %v7506_v56 = vpop.f32.mrf.mxu1  ;;  %v5967_v29 = vadd.f32 %v10619_v42, %v5930_v45  ;;  %v5965_v60 = vadd.f32 %v10619_v42, %v5928_v61  ;;  %v5970_v28 = vadd.f32 %v10619_v42, %v5933_v16  ;;  %v5931_v10 = vmul.f32 %v10611_v0, %v10637_v18 }
 0x2ce   : > { %6055 = vst [vmem:[%s10650_s28 + $0x38] sm:$0xff] %v6023_v35  ;;  %v6021_v48 = vmax.f32 %v5989_v14, 0.0  ;;  %v5994_v43 = vadd.f32 %v5962_v27, %v5535_v55  ;;  %v5533_v46 = vadd.f32 %v10632_v8, %v5496_v39  ;;  %v5499_v59 = vmul.f32 %v7506_v56, %v10624_v53  ;;  %v5879_v55 = vpop.f32.mrf.mxu0 }
 0x2cf   : > { %v5391_v26 = vpop.f32.mrf.mxu1  ;;  %v5934_v39 = vmul.f32 %v10653_v63, %v10611_v0 }
 0x2d0   : > { %6053 = vst [vmem:[%s10650_s28 + $0x28] sm:$0xff] %v6021_v48  ;;  %v6026_v54 = vmax.f32 %v5994_v43, 0.0  ;;  %v5992_v22 = vadd.f32 %v5960_v24, %v5533_v46  ;;  %v5536_v30 = vadd.f32 %v10632_v8, %v5499_v59  ;;  %v5497_v7 = vmul.f32 %v10624_v53, %v5391_v26 }
 0x2d1   : > { %v7509_v12 = vpop.f32.mrf.mxu1  ;;  %v5968_v48 = vadd.f32 %v10619_v42, %v5931_v10  ;;  %v5932_v43 = vmul.f32 %v10611_v0, %v10663_v20  ;;  %v5937_v46 = vmul.f32 %v10675_v15, %v10611_v0  ;;  %v5939_v10 = vmul.f32 %v10611_v0, %v5879_v55 }
 0x2d2   : > { %6058 = vst [vmem:[%s10650_s28 + $0x50] sm:$0xff] %v6026_v54  ;;  %v6024_v6 = vmax.f32 %v5992_v22, 0.0  ;;  %v5995_v40 = vadd.f32 %v5963_v51, %v5536_v30  ;;  %v5534_v23 = vadd.f32 %v10632_v8, %v5497_v7  ;;  %v5502_v11 = vmul.f32 %v7509_v12, %v10624_v53  ;;  %v7570_v22 = vpop.f32.mrf.mxu0 }
 0x2d3   : > { %v5404_v50 = vpop.f32.mrf.mxu1  ;;  %v5971_v30 = vadd.f32 %v10619_v42, %v5934_v39  ;;  %v5969_v58 = vadd.f32 %v10619_v42, %v5932_v43  ;;  %v5974_v12 = vadd.f32 %v10619_v42, %v5937_v46 }
 0x2d4   : > { %6056 = vst [vmem:[%s10650_s28 + $0x40] sm:$0xff] %v6024_v6  ;;  %v6027_v34 = vmax.f32 %v5995_v40, 0.0  ;;  %v5993_v37 = vadd.f32 %v5961_v38, %v5534_v23  ;;  %v5539_v31 = vadd.f32 %v10632_v8, %v5502_v11  ;;  %v5500_v5 = vmul.f32 %v10624_v53, %v5404_v50 }
 0x2d5   : > { %v7510_v57 = vpop.f32.mrf.mxu1  ;;  %v5935_v6 = vmul.f32 %v10611_v0, %v10688_v3 }
 0x2d6   : > { %6059 = vst [vmem:[%s10650_s28 + $0x58] sm:$0xff] %v6027_v34  ;;  %v6025_v17 = vmax.f32 %v5993_v37, 0.0  ;;  %v5998_v32 = vadd.f32 %v5966_v49, %v5539_v31  ;;  %v5537_v9 = vadd.f32 %v10632_v8, %v5500_v5  ;;  %v5503_v62 = vmul.f32 %v7510_v57, %v10624_v53  ;;  %v5882_v34 = vpop.f32.mrf.mxu0 }
 0x2d7   : > { %v5407_v27 = vpop.f32.mrf.mxu1  ;;  %v5938_v37 = vmul.f32 %v10703_v4, %v10611_v0  ;;  %v5972_v16 = vadd.f32 %v10619_v42, %v5935_v6  ;;  %v5936_v57 = vmul.f32 %v10611_v0, %v10716_v25  ;;  %v5940_v43 = vmul.f32 %v10611_v0, %v5882_v34 }
 0x2d8   : > { %6057 = vst [vmem:[%s10650_s28 + $0x48] sm:$0xff] %v6025_v17  ;;  %v6030_v47 = vmax.f32 %v5998_v32, 0.0  ;;  %v5996_v21 = vadd.f32 %v5964_v36, %v5537_v9  ;;  %v5540_v44 = vadd.f32 %v10632_v8, %v5503_v62  ;;  %v5501_v13 = vmul.f32 %v10624_v53, %v5407_v27  ;;  %v7573_v27 = vpop.f32.mrf.mxu0 }
 0x2d9   : > { %v7513_v52 = vpop.f32.mrf.mxu1  ;;  %v5941_v17 = vmul.f32 %v7569_v1, %v10611_v0  ;;  %v5945_v46 = vmul.f32 %v7573_v27, %v10611_v0 }
 0x2da   : > { %6062 = vst [vmem:[%s10650_s28 + $0x70] sm:$0xff] %v6030_v47  ;;  %v6028_v19 = vmax.f32 %v5996_v21, 0.0  ;;  %v5999_v2 = vadd.f32 %v5967_v29, %v5540_v44  ;;  %v5538_v35 = vadd.f32 %v10632_v8, %v5501_v13  ;;  %v5506_v14 = vmul.f32 %v7513_v52, %v10624_v53  ;;  %v5895_v39 = vpop.f32.mrf.mxu0 }
 0x2db   : > { %v5420_v24 = vpop.f32.mrf.mxu1  ;;  %v5975_v47 = vadd.f32 %v10619_v42, %v5938_v37  ;;  %v5943_v6 = vmul.f32 %v10611_v0, %v5895_v39 }
 0x2dc   : > { %6060 = vst [vmem:[%s10650_s28 + $0x60] sm:$0xff] %v6028_v19  ;;  %v6031_v41 = vmax.f32 %v5999_v2, 0.0  ;;  %v5997_v33 = vadd.f32 %v5965_v60, %v5538_v35  ;;  %v5543_v18 = vadd.f32 %v10632_v8, %v5506_v14  ;;  %v5504_v56 = vmul.f32 %v10624_v53, %v5420_v24 }
 0x2dd   : > { %v7514_v59 = vpop.f32.mrf.mxu1  ;;  %v5973_v60 = vadd.f32 %v10619_v42, %v5936_v57  ;;  %v5942_v24 = vmul.f32 %v7570_v22, %v10611_v0  ;;  %v7574_v22 = vpop.f32.mrf.mxu0 }
 0x2de   : > { %6063 = vst [vmem:[%s10650_s28 + $0x78] sm:$0xff] %v6031_v41  ;;  %v6029_v63 = vmax.f32 %v5997_v33, 0.0  ;;  %v6002_v51 = vadd.f32 %v5970_v28, %v5543_v18  ;;  %v5541_v26 = vadd.f32 %v10632_v8, %v5504_v56  ;;  %v5507_v54 = vmul.f32 %v7514_v59, %v10624_v53 }
 0x2df   : > { %v5423_v7 = vpop.f32.mrf.mxu1  ;;  %v5978_v28 = vadd.f32 %v10619_v42, %v5941_v17  ;;  %v5898_v34 = vpop.f32.mrf.mxu0  ;;  %v5946_v37 = vmul.f32 %v7574_v22, %v10611_v0 }
 0x2e0   : > { %6061 = vst [vmem:[%s10650_s28 + $0x68] sm:$0xff] %v6029_v63  ;;  %v6034_v38 = vmax.f32 %v6002_v51, 0.0  ;;  %v6000_v20 = vadd.f32 %v5968_v48, %v5541_v26  ;;  %v5544_v49 = vadd.f32 %v10632_v8, %v5507_v54  ;;  %v5505_v15 = vmul.f32 %v10624_v53, %v5423_v7 }
 0x2e1   : > { %v7517_v40 = vpop.f32.mrf.mxu1  ;;  %v5976_v48 = vadd.f32 %v10619_v42, %v5939_v10  ;;  %v5944_v57 = vmul.f32 %v10611_v0, %v5898_v34 }
 0x2e2   : > { %6066 = vst [vmem:[%s10650_s28 + $0x90] sm:$0xff] %v6034_v38  ;;  %v6032_v23 = vmax.f32 %v6000_v20, 0.0  ;;  %v6003_v11 = vadd.f32 %v5971_v30, %v5544_v49  ;;  %v5542_v45 = vadd.f32 %v10632_v8, %v5505_v15  ;;  %v5510_v50 = vmul.f32 %v7517_v40, %v10624_v53 }
 0x2e3   : > { %v5436_v31 = vpop.f32.mrf.mxu1  ;;  %v5979_v30 = vadd.f32 %v10619_v42, %v5942_v24 }
 0x2e4   : > { %6064 = vst [vmem:[%s10650_s28 + $0x80] sm:$0xff] %v6032_v23  ;;  %v6035_v5 = vmax.f32 %v6003_v11, 0.0  ;;  %v6001_v36 = vadd.f32 %v5969_v58, %v5542_v45  ;;  %v5547_v3 = vadd.f32 %v10632_v8, %v5510_v50  ;;  %v5508_v61 = vmul.f32 %v10624_v53, %v5436_v31 }
 0x2e5   : > { %v7518_v32 = vpop.f32.mrf.mxu1  ;;  %v5977_v58 = vadd.f32 %v10619_v42, %v5940_v43 }
 0x2e6   : > { %6067 = vst [vmem:[%s10650_s28 + $0x98] sm:$0xff] %v6035_v5  ;;  %v6033_v9 = vmax.f32 %v6001_v36, 0.0  ;;  %v6006_v4 = vadd.f32 %v5974_v12, %v5547_v3  ;;  %v5545_v62 = vadd.f32 %v10632_v8, %v5508_v61  ;;  %v5511_v29 = vmul.f32 %v7518_v32, %v10624_v53 }
 0x2e7   : > { %v5439_v21 = vpop.f32.mrf.mxu1  ;;  %v5982_v12 = vadd.f32 %v10619_v42, %v5945_v46 }
 0x2e8   : > { %6065 = vst [vmem:[%s10650_s28 + $0x88] sm:$0xff] %v6033_v9  ;;  %v6038_v44 = vmax.f32 %v6006_v4, 0.0  ;;  %v6004_v13 = vadd.f32 %v5972_v16, %v5545_v62  ;;  %v5548_v25 = vadd.f32 %v10632_v8, %v5511_v29  ;;  %v5509_v1 = vmul.f32 %v10624_v53, %v5439_v21 }
 0x2e9   : > { %v7521_v52 = vpop.f32.mrf.mxu1  ;;  %v5980_v16 = vadd.f32 %v10619_v42, %v5943_v6  ;;  %v5983_v29 = vadd.f32 %v10619_v42, %v5946_v37 }
 0x2ea   : > { %6070 = vst [vmem:[%s10650_s28 + $0xb0] sm:$0xff] %v6038_v44  ;;  %v6036_v19 = vmax.f32 %v6004_v13, 0.0  ;;  %v6007_v2 = vadd.f32 %v5975_v47, %v5548_v25  ;;  %v5546_v35 = vadd.f32 %v10632_v8, %v5509_v1  ;;  %v5514_v14 = vmul.f32 %v7521_v52, %v10624_v53 }
 0x2eb   : > { %v5452_v41 = vpop.f32.mrf.mxu1  ;;  %v5981_v13 = vadd.f32 %v10619_v42, %v5944_v57 }
 0x2ec   : > { %6068 = vst [vmem:[%s10650_s28 + $0xa0] sm:$0xff] %v6036_v19  ;;  %v6039_v33 = vmax.f32 %v6007_v2, 0.0  ;;  %v6005_v18 = vadd.f32 %v5973_v60, %v5546_v35  ;;  %v5551_v56 = vadd.f32 %v10632_v8, %v5514_v14  ;;  %v5512_v55 = vmul.f32 %v10624_v53, %v5452_v41 }
 0x2ed   : > { %v7522_v59 = vpop.f32.mrf.mxu1 }
 0x2ee   : > { %6071 = vst [vmem:[%s10650_s28 + $0xb8] sm:$0xff] %v6039_v33  ;;  %v6037_v63 = vmax.f32 %v6005_v18, 0.0  ;;  %v6010_v51 = vadd.f32 %v5978_v28, %v5551_v56  ;;  %v5549_v26 = vadd.f32 %v10632_v8, %v5512_v55  ;;  %v5515_v54 = vmul.f32 %v7522_v59, %v10624_v53 }
 0x2ef   : > { %v5455_v7 = vpop.f32.mrf.mxu1 }
 0x2f0   : > { %6069 = vst [vmem:[%s10650_s28 + $0xa8] sm:$0xff] %v6037_v63  ;;  %v6042_v38 = vmax.f32 %v6010_v51, 0.0  ;;  %v6008_v20 = vadd.f32 %v5976_v48, %v5549_v26  ;;  %v5552_v49 = vadd.f32 %v10632_v8, %v5515_v54  ;;  %v5513_v15 = vmul.f32 %v10624_v53, %v5455_v7 }
 0x2f1   : > { %v7525_v40 = vpop.f32.mrf.mxu1 }
 0x2f2   : > { %6074 = vst [vmem:[%s10650_s28 + $0xd0] sm:$0xff] %v6042_v38  ;;  %v6040_v23 = vmax.f32 %v6008_v20, 0.0  ;;  %v6011_v11 = vadd.f32 %v5979_v30, %v5552_v49  ;;  %v5550_v45 = vadd.f32 %v10632_v8, %v5513_v15  ;;  %v5518_v50 = vmul.f32 %v7525_v40, %v10624_v53 }
 0x2f3   : > { %v5468_v31 = vpop.f32.mrf.mxu1 }
 0x2f4   : > { %6072 = vst [vmem:[%s10650_s28 + $0xc0] sm:$0xff] %v6040_v23  ;;  %v6043_v5 = vmax.f32 %v6011_v11, 0.0  ;;  %v6009_v36 = vadd.f32 %v5977_v58, %v5550_v45  ;;  %v5555_v3 = vadd.f32 %v10632_v8, %v5518_v50  ;;  %v5516_v61 = vmul.f32 %v10624_v53, %v5468_v31 }
 0x2f5   : > { %v7526_v17 = vpop.f32.mrf.mxu1 }
 0x2f6   : > { %6075 = vst [vmem:[%s10650_s28 + $0xd8] sm:$0xff] %v6043_v5  ;;  %v6041_v32 = vmax.f32 %v6009_v36, 0.0  ;;  %v6014_v9 = vadd.f32 %v5982_v12, %v5555_v3  ;;  %v5553_v4 = vadd.f32 %v10632_v8, %v5516_v61  ;;  %v5519_v62 = vmul.f32 %v7526_v17, %v10624_v53 }
 0x2f7   : > { %v5471_v27 = vpop.f32.mrf.mxu1 }
 0x2f8   : > { %6073 = vst [vmem:[%s10650_s28 + $0xc8] sm:$0xff] %v6041_v32  ;;  %v6046_v47 = vmax.f32 %v6014_v9, 0.0  ;;  %v6012_v21 = vadd.f32 %v5980_v16, %v5553_v4  ;;  %v5556_v44 = vadd.f32 %v10632_v8, %v5519_v62  ;;  %v5517_v0 = vmul.f32 %v10624_v53, %v5471_v27 }
 0x2fa   : > { %6078 = vst [vmem:[%s10650_s28 + $0xf0] sm:$0xff] %v6046_v47  ;;  %v6044_v25 = vmax.f32 %v6012_v21, 0.0  ;;  %v6015_v1 = vadd.f32 %v5983_v29, %v5556_v44  ;;  %v5554_v60 = vadd.f32 %v10632_v8, %v5517_v0 }
 0x2fc   : > { %6076 = vst [vmem:[%s10650_s28 + $0xe0] sm:$0xff] %v6044_v25  ;;  %v6047_v28 = vmax.f32 %v6015_v1, 0.0  ;;  %v6013_v10 = vadd.f32 %v5981_v13, %v5554_v60 }
 0x2fe   : > { %6079 = vst [vmem:[%s10650_s28 + $0xf8] sm:$0xff] %v6047_v28  ;;  %v6045_v52 = vmax.f32 %v6013_v10, 0.0 }
 0x300   : > { %6077 = vst [vmem:[%s10650_s28 + $0xe8] sm:$0xff] %v6045_v52 }
 0x301 PF: > { %s18_s27 = sadd.s32 1, %s7767_s27  }
 0x302   : > { %p15_p4 = scmp.ge.s32.totalorder %s18_s27, 4  }
 0x304   :  { %17 = sbr.rel (!%p15_p4) target bundleno = 1 (0x1), region = 95 }

</bundles_post_ra>
